<compile_context>
chip_gen: v5e
topology: v5e:2x2
jax: 0.10.0
libtpu: 0.0.40
codegen_flags: <defaults>
</compile_context>

<pallas_src>
import jax
import jax.numpy as jnp
from jax.experimental import pallas as pl
from jax.experimental.pallas import tpu as pltpu

KH = KW = 3  # kernel_size = 3


def conv2d_kernel(x_ref, w_ref, b_ref, o_ref):
    # x_ref: (1, Cin, H, W)      VMEM  (one batch element; W on lanes, H on sublanes)
    # w_ref: (Cout*Cin*KH*KW,)   SMEM  (OIHW weights, flattened -> scalar reads)
    # b_ref: (Cout,)             SMEM
    # o_ref: (1, Cout, OH, OW)   VMEM
    _, Cin, H, W = x_ref.shape
    _, Cout, OH, OW = o_ref.shape
    taps_per_out = Cin * KH * KW

    # Build the Cin*KH*KW shifted (OH, OW) views once. The kw offset is a
    # small lane shift and the kh offset a sublane shift (XLU-side work on an
    # already-loaded tile) -- no reshapes, no full-array relayouts. These
    # views are reused for every output channel.
    taps = []
    for ci in range(Cin):
        xc = x_ref[0, ci]                        # (H, W) fp32, already in vregs
        for kh in range(KH):
            xr = xc[kh:kh + OH, :]               # sublane (row) shift
            for kw in range(KW):
                taps.append(xr[:, kw:kw + OW])   # lane (col) shift

    # Pure-VPU convolution: 162 scalar-weighted FMAs on (OH, OW) tiles.
    # Bias is folded into the accumulator init (cheap SMEM-scalar splat).
    for co in range(Cout):
        acc = jnp.full((OH, OW), b_ref[co], dtype=jnp.float32)
        for t in range(taps_per_out):
            acc = acc + taps[t] * w_ref[co * taps_per_out + t]
        o_ref[0, co] = acc.astype(o_ref.dtype)


def conv2d_pallas(x_nchw, w_oihw, bias):
    """Valid (no padding), stride-1 conv matching torch.nn.Conv2d(3, 6, 3)."""
    N, Cin, H, W = x_nchw.shape
    Cout = w_oihw.shape[0]
    OH, OW = H - KH + 1, W - KW + 1

    # Weights/bias go to SMEM as flat scalar tables (no lane padding at all).
    w_flat = w_oihw.reshape(Cout * Cin * KH * KW)

    return pl.pallas_call(
        conv2d_kernel,
        out_shape=jax.ShapeDtypeStruct((N, Cout, OH, OW), x_nchw.dtype),
        grid=(N,),
        in_specs=[
            pl.BlockSpec((1, Cin, H, W), lambda n: (n, 0, 0, 0)),
            pl.BlockSpec(memory_space=pltpu.MemorySpace.SMEM),
            pl.BlockSpec(memory_space=pltpu.MemorySpace.SMEM),
        ],
        out_specs=pl.BlockSpec((1, Cout, OH, OW), lambda n: (n, 0, 0, 0)),
        compiler_params=pltpu.CompilerParams(
            dimension_semantics=("parallel",),
        ),
    )(x_nchw, w_flat, bias)


if __name__ == "__main__":
    key = jax.random.PRNGKey(0)
    kx, kw_, kb = jax.random.split(key, 3)

    # Small shapes consistent with Conv2d(3, 6, 3): NCHW input.
    N, Cin, H, W = 2, 3, 16, 16
    Cout = 6

    x = jax.random.normal(kx, (N, Cin, H, W), dtype=jnp.float32)

    # Deterministic parameter init (mirrors PyTorch's uniform(-1/sqrt(fan_in), +...)).
    fan_in = Cin * KH * KW
    bound = 1.0 / (fan_in ** 0.5)
    weight = jax.random.uniform(kw_, (Cout, Cin, KH, KW), jnp.float32, -bound, bound)
    bias = jax.random.uniform(kb, (Cout,), jnp.float32, -bound, bound)

    out = conv2d_pallas(x, weight, bias)
    out = jax.block_until_ready(out)

    # Correctness check against XLA's conv (same semantics as torch Conv2d, valid padding).
    ref = jax.lax.conv_general_dilated(
        x, weight, window_strides=(1, 1), padding="VALID",
        dimension_numbers=("NCHW", "OIHW", "NCHW"),
    ) + bias[None, :, None, None]

    assert out.shape == (N, Cout, H - KH + 1, W - KW + 1), out.shape
    assert jnp.allclose(out, ref, atol=1e-4, rtol=1e-4), "mismatch vs reference conv"

    print("KERNEL_OK")
</pallas_src>

<mosaic_0001>
module attributes {stable_mosaic.version = 11 : i64} {
  func.func @conv2d_kernel(%arg0: i32, %arg1: memref<1x3x16x16xf32, #tpu.memory_space<vmem>>, %arg2: memref<162xf32, #tpu.memory_space<smem>>, %arg3: memref<6xf32, #tpu.memory_space<smem>>, %arg4: memref<1x6x14x14xf32, #tpu.memory_space<vmem>>) attributes {dimension_semantics = [#tpu.dimension_semantics<parallel>], iteration_bounds = array<i64: 2>, scalar_prefetch = 0 : i64, scratch_operands = 0 : i64, tpu.core_type = #tpu.core_type<tc>, window_params = [{transform_indices = @transform_0, window_bounds = array<i64: 1, 3, 16, 16>}, {transform_indices = @transform_1, window_bounds = array<i64: 162>}, {transform_indices = @transform_2, window_bounds = array<i64: 6>}, {transform_indices = @transform_3, window_bounds = array<i64: 1, 6, 14, 14>}]} {
    %c0 = arith.constant 0 : index
    %c0_0 = arith.constant 0 : index
    %c0_1 = arith.constant 0 : index
    %c0_2 = arith.constant 0 : index
    %0 = vector.load %arg1[%c0, %c0_0, %c0_1, %c0_2] : memref<1x3x16x16xf32, #tpu.memory_space<vmem>>, vector<1x1x16x16xf32>
    %1 = vector.shape_cast %0 : vector<1x1x16x16xf32> to vector<16x16xf32>
    %2 = vector.extract_strided_slice %1 {offsets = [0, 0], sizes = [14, 16], strides = [1, 1]} : vector<16x16xf32> to vector<14x16xf32>
    %3 = vector.extract_strided_slice %2 {offsets = [0, 0], sizes = [14, 14], strides = [1, 1]} : vector<14x16xf32> to vector<14x14xf32>
    %4 = vector.extract_strided_slice %2 {offsets = [0, 1], sizes = [14, 14], strides = [1, 1]} : vector<14x16xf32> to vector<14x14xf32>
    %5 = vector.extract_strided_slice %2 {offsets = [0, 2], sizes = [14, 14], strides = [1, 1]} : vector<14x16xf32> to vector<14x14xf32>
    %6 = vector.extract_strided_slice %1 {offsets = [1, 0], sizes = [14, 16], strides = [1, 1]} : vector<16x16xf32> to vector<14x16xf32>
    %7 = vector.extract_strided_slice %6 {offsets = [0, 0], sizes = [14, 14], strides = [1, 1]} : vector<14x16xf32> to vector<14x14xf32>
    %8 = vector.extract_strided_slice %6 {offsets = [0, 1], sizes = [14, 14], strides = [1, 1]} : vector<14x16xf32> to vector<14x14xf32>
    %9 = vector.extract_strided_slice %6 {offsets = [0, 2], sizes = [14, 14], strides = [1, 1]} : vector<14x16xf32> to vector<14x14xf32>
    %10 = vector.extract_strided_slice %1 {offsets = [2, 0], sizes = [14, 16], strides = [1, 1]} : vector<16x16xf32> to vector<14x16xf32>
    %11 = vector.extract_strided_slice %10 {offsets = [0, 0], sizes = [14, 14], strides = [1, 1]} : vector<14x16xf32> to vector<14x14xf32>
    %12 = vector.extract_strided_slice %10 {offsets = [0, 1], sizes = [14, 14], strides = [1, 1]} : vector<14x16xf32> to vector<14x14xf32>
    %13 = vector.extract_strided_slice %10 {offsets = [0, 2], sizes = [14, 14], strides = [1, 1]} : vector<14x16xf32> to vector<14x14xf32>
    %c0_3 = arith.constant 0 : index
    %c1 = arith.constant 1 : index
    %c0_4 = arith.constant 0 : index
    %c0_5 = arith.constant 0 : index
    %14 = vector.load %arg1[%c0_3, %c1, %c0_4, %c0_5] : memref<1x3x16x16xf32, #tpu.memory_space<vmem>>, vector<1x1x16x16xf32>
    %15 = vector.shape_cast %14 : vector<1x1x16x16xf32> to vector<16x16xf32>
    %16 = vector.extract_strided_slice %15 {offsets = [0, 0], sizes = [14, 16], strides = [1, 1]} : vector<16x16xf32> to vector<14x16xf32>
    %17 = vector.extract_strided_slice %16 {offsets = [0, 0], sizes = [14, 14], strides = [1, 1]} : vector<14x16xf32> to vector<14x14xf32>
    %18 = vector.extract_strided_slice %16 {offsets = [0, 1], sizes = [14, 14], strides = [1, 1]} : vector<14x16xf32> to vector<14x14xf32>
    %19 = vector.extract_strided_slice %16 {offsets = [0, 2], sizes = [14, 14], strides = [1, 1]} : vector<14x16xf32> to vector<14x14xf32>
    %20 = vector.extract_strided_slice %15 {offsets = [1, 0], sizes = [14, 16], strides = [1, 1]} : vector<16x16xf32> to vector<14x16xf32>
    %21 = vector.extract_strided_slice %20 {offsets = [0, 0], sizes = [14, 14], strides = [1, 1]} : vector<14x16xf32> to vector<14x14xf32>
    %22 = vector.extract_strided_slice %20 {offsets = [0, 1], sizes = [14, 14], strides = [1, 1]} : vector<14x16xf32> to vector<14x14xf32>
    %23 = vector.extract_strided_slice %20 {offsets = [0, 2], sizes = [14, 14], strides = [1, 1]} : vector<14x16xf32> to vector<14x14xf32>
    %24 = vector.extract_strided_slice %15 {offsets = [2, 0], sizes = [14, 16], strides = [1, 1]} : vector<16x16xf32> to vector<14x16xf32>
    %25 = vector.extract_strided_slice %24 {offsets = [0, 0], sizes = [14, 14], strides = [1, 1]} : vector<14x16xf32> to vector<14x14xf32>
    %26 = vector.extract_strided_slice %24 {offsets = [0, 1], sizes = [14, 14], strides = [1, 1]} : vector<14x16xf32> to vector<14x14xf32>
    %27 = vector.extract_strided_slice %24 {offsets = [0, 2], sizes = [14, 14], strides = [1, 1]} : vector<14x16xf32> to vector<14x14xf32>
    %c0_6 = arith.constant 0 : index
    %c2 = arith.constant 2 : index
    %c0_7 = arith.constant 0 : index
    %c0_8 = arith.constant 0 : index
    %28 = vector.load %arg1[%c0_6, %c2, %c0_7, %c0_8] : memref<1x3x16x16xf32, #tpu.memory_space<vmem>>, vector<1x1x16x16xf32>
    %29 = vector.shape_cast %28 : vector<1x1x16x16xf32> to vector<16x16xf32>
    %30 = vector.extract_strided_slice %29 {offsets = [0, 0], sizes = [14, 16], strides = [1, 1]} : vector<16x16xf32> to vector<14x16xf32>
    %31 = vector.extract_strided_slice %30 {offsets = [0, 0], sizes = [14, 14], strides = [1, 1]} : vector<14x16xf32> to vector<14x14xf32>
    %32 = vector.extract_strided_slice %30 {offsets = [0, 1], sizes = [14, 14], strides = [1, 1]} : vector<14x16xf32> to vector<14x14xf32>
    %33 = vector.extract_strided_slice %30 {offsets = [0, 2], sizes = [14, 14], strides = [1, 1]} : vector<14x16xf32> to vector<14x14xf32>
    %34 = vector.extract_strided_slice %29 {offsets = [1, 0], sizes = [14, 16], strides = [1, 1]} : vector<16x16xf32> to vector<14x16xf32>
    %35 = vector.extract_strided_slice %34 {offsets = [0, 0], sizes = [14, 14], strides = [1, 1]} : vector<14x16xf32> to vector<14x14xf32>
    %36 = vector.extract_strided_slice %34 {offsets = [0, 1], sizes = [14, 14], strides = [1, 1]} : vector<14x16xf32> to vector<14x14xf32>
    %37 = vector.extract_strided_slice %34 {offsets = [0, 2], sizes = [14, 14], strides = [1, 1]} : vector<14x16xf32> to vector<14x14xf32>
    %38 = vector.extract_strided_slice %29 {offsets = [2, 0], sizes = [14, 16], strides = [1, 1]} : vector<16x16xf32> to vector<14x16xf32>
    %39 = vector.extract_strided_slice %38 {offsets = [0, 0], sizes = [14, 14], strides = [1, 1]} : vector<14x16xf32> to vector<14x14xf32>
    %40 = vector.extract_strided_slice %38 {offsets = [0, 1], sizes = [14, 14], strides = [1, 1]} : vector<14x16xf32> to vector<14x14xf32>
    %41 = vector.extract_strided_slice %38 {offsets = [0, 2], sizes = [14, 14], strides = [1, 1]} : vector<14x16xf32> to vector<14x14xf32>
    %c0_9 = arith.constant 0 : index
    %42 = memref.load %arg3[%c0_9] : memref<6xf32, #tpu.memory_space<smem>>
    %43 = vector.broadcast %42 : f32 to vector<14x14xf32>
    %c0_10 = arith.constant 0 : index
    %44 = memref.load %arg2[%c0_10] : memref<162xf32, #tpu.memory_space<smem>>
    %45 = vector.broadcast %44 : f32 to vector<14x14xf32>
    %46 = arith.mulf %3, %45 : vector<14x14xf32>
    %47 = arith.addf %43, %46 : vector<14x14xf32>
    %c1_11 = arith.constant 1 : index
    %48 = memref.load %arg2[%c1_11] : memref<162xf32, #tpu.memory_space<smem>>
    %49 = vector.broadcast %48 : f32 to vector<14x14xf32>
    %50 = arith.mulf %4, %49 : vector<14x14xf32>
    %51 = arith.addf %47, %50 : vector<14x14xf32>
    %c2_12 = arith.constant 2 : index
    %52 = memref.load %arg2[%c2_12] : memref<162xf32, #tpu.memory_space<smem>>
    %53 = vector.broadcast %52 : f32 to vector<14x14xf32>
    %54 = arith.mulf %5, %53 : vector<14x14xf32>
    %55 = arith.addf %51, %54 : vector<14x14xf32>
    %c3 = arith.constant 3 : index
    %56 = memref.load %arg2[%c3] : memref<162xf32, #tpu.memory_space<smem>>
    %57 = vector.broadcast %56 : f32 to vector<14x14xf32>
    %58 = arith.mulf %7, %57 : vector<14x14xf32>
    %59 = arith.addf %55, %58 : vector<14x14xf32>
    %c4 = arith.constant 4 : index
    %60 = memref.load %arg2[%c4] : memref<162xf32, #tpu.memory_space<smem>>
    %61 = vector.broadcast %60 : f32 to vector<14x14xf32>
    %62 = arith.mulf %8, %61 : vector<14x14xf32>
    %63 = arith.addf %59, %62 : vector<14x14xf32>
    %c5 = arith.constant 5 : index
    %64 = memref.load %arg2[%c5] : memref<162xf32, #tpu.memory_space<smem>>
    %65 = vector.broadcast %64 : f32 to vector<14x14xf32>
    %66 = arith.mulf %9, %65 : vector<14x14xf32>
    %67 = arith.addf %63, %66 : vector<14x14xf32>
    %c6 = arith.constant 6 : index
    %68 = memref.load %arg2[%c6] : memref<162xf32, #tpu.memory_space<smem>>
    %69 = vector.broadcast %68 : f32 to vector<14x14xf32>
    %70 = arith.mulf %11, %69 : vector<14x14xf32>
    %71 = arith.addf %67, %70 : vector<14x14xf32>
    %c7 = arith.constant 7 : index
    %72 = memref.load %arg2[%c7] : memref<162xf32, #tpu.memory_space<smem>>
    %73 = vector.broadcast %72 : f32 to vector<14x14xf32>
    %74 = arith.mulf %12, %73 : vector<14x14xf32>
    %75 = arith.addf %71, %74 : vector<14x14xf32>
    %c8 = arith.constant 8 : index
    %76 = memref.load %arg2[%c8] : memref<162xf32, #tpu.memory_space<smem>>
    %77 = vector.broadcast %76 : f32 to vector<14x14xf32>
    %78 = arith.mulf %13, %77 : vector<14x14xf32>
    %79 = arith.addf %75, %78 : vector<14x14xf32>
    %c9 = arith.constant 9 : index
    %80 = memref.load %arg2[%c9] : memref<162xf32, #tpu.memory_space<smem>>
    %81 = vector.broadcast %80 : f32 to vector<14x14xf32>
    %82 = arith.mulf %17, %81 : vector<14x14xf32>
    %83 = arith.addf %79, %82 : vector<14x14xf32>
    %c10 = arith.constant 10 : index
    %84 = memref.load %arg2[%c10] : memref<162xf32, #tpu.memory_space<smem>>
    %85 = vector.broadcast %84 : f32 to vector<14x14xf32>
    %86 = arith.mulf %18, %85 : vector<14x14xf32>
    %87 = arith.addf %83, %86 : vector<14x14xf32>
    %c11 = arith.constant 11 : index
    %88 = memref.load %arg2[%c11] : memref<162xf32, #tpu.memory_space<smem>>
    %89 = vector.broadcast %88 : f32 to vector<14x14xf32>
    %90 = arith.mulf %19, %89 : vector<14x14xf32>
    %91 = arith.addf %87, %90 : vector<14x14xf32>
    %c12 = arith.constant 12 : index
    %92 = memref.load %arg2[%c12] : memref<162xf32, #tpu.memory_space<smem>>
    %93 = vector.broadcast %92 : f32 to vector<14x14xf32>
    %94 = arith.mulf %21, %93 : vector<14x14xf32>
    %95 = arith.addf %91, %94 : vector<14x14xf32>
    %c13 = arith.constant 13 : index
    %96 = memref.load %arg2[%c13] : memref<162xf32, #tpu.memory_space<smem>>
    %97 = vector.broadcast %96 : f32 to vector<14x14xf32>
    %98 = arith.mulf %22, %97 : vector<14x14xf32>
    %99 = arith.addf %95, %98 : vector<14x14xf32>
    %c14 = arith.constant 14 : index
    %100 = memref.load %arg2[%c14] : memref<162xf32, #tpu.memory_space<smem>>
    %101 = vector.broadcast %100 : f32 to vector<14x14xf32>
    %102 = arith.mulf %23, %101 : vector<14x14xf32>
    %103 = arith.addf %99, %102 : vector<14x14xf32>
    %c15 = arith.constant 15 : index
    %104 = memref.load %arg2[%c15] : memref<162xf32, #tpu.memory_space<smem>>
    %105 = vector.broadcast %104 : f32 to vector<14x14xf32>
    %106 = arith.mulf %25, %105 : vector<14x14xf32>
    %107 = arith.addf %103, %106 : vector<14x14xf32>
    %c16 = arith.constant 16 : index
    %108 = memref.load %arg2[%c16] : memref<162xf32, #tpu.memory_space<smem>>
    %109 = vector.broadcast %108 : f32 to vector<14x14xf32>
    %110 = arith.mulf %26, %109 : vector<14x14xf32>
    %111 = arith.addf %107, %110 : vector<14x14xf32>
    %c17 = arith.constant 17 : index
    %112 = memref.load %arg2[%c17] : memref<162xf32, #tpu.memory_space<smem>>
    %113 = vector.broadcast %112 : f32 to vector<14x14xf32>
    %114 = arith.mulf %27, %113 : vector<14x14xf32>
    %115 = arith.addf %111, %114 : vector<14x14xf32>
    %c18 = arith.constant 18 : index
    %116 = memref.load %arg2[%c18] : memref<162xf32, #tpu.memory_space<smem>>
    %117 = vector.broadcast %116 : f32 to vector<14x14xf32>
    %118 = arith.mulf %31, %117 : vector<14x14xf32>
    %119 = arith.addf %115, %118 : vector<14x14xf32>
    %c19 = arith.constant 19 : index
    %120 = memref.load %arg2[%c19] : memref<162xf32, #tpu.memory_space<smem>>
    %121 = vector.broadcast %120 : f32 to vector<14x14xf32>
    %122 = arith.mulf %32, %121 : vector<14x14xf32>
    %123 = arith.addf %119, %122 : vector<14x14xf32>
    %c20 = arith.constant 20 : index
    %124 = memref.load %arg2[%c20] : memref<162xf32, #tpu.memory_space<smem>>
    %125 = vector.broadcast %124 : f32 to vector<14x14xf32>
    %126 = arith.mulf %33, %125 : vector<14x14xf32>
    %127 = arith.addf %123, %126 : vector<14x14xf32>
    %c21 = arith.constant 21 : index
    %128 = memref.load %arg2[%c21] : memref<162xf32, #tpu.memory_space<smem>>
    %129 = vector.broadcast %128 : f32 to vector<14x14xf32>
    %130 = arith.mulf %35, %129 : vector<14x14xf32>
    %131 = arith.addf %127, %130 : vector<14x14xf32>
    %c22 = arith.constant 22 : index
    %132 = memref.load %arg2[%c22] : memref<162xf32, #tpu.memory_space<smem>>
    %133 = vector.broadcast %132 : f32 to vector<14x14xf32>
    %134 = arith.mulf %36, %133 : vector<14x14xf32>
    %135 = arith.addf %131, %134 : vector<14x14xf32>
    %c23 = arith.constant 23 : index
    %136 = memref.load %arg2[%c23] : memref<162xf32, #tpu.memory_space<smem>>
    %137 = vector.broadcast %136 : f32 to vector<14x14xf32>
    %138 = arith.mulf %37, %137 : vector<14x14xf32>
    %139 = arith.addf %135, %138 : vector<14x14xf32>
    %c24 = arith.constant 24 : index
    %140 = memref.load %arg2[%c24] : memref<162xf32, #tpu.memory_space<smem>>
    %141 = vector.broadcast %140 : f32 to vector<14x14xf32>
    %142 = arith.mulf %39, %141 : vector<14x14xf32>
    %143 = arith.addf %139, %142 : vector<14x14xf32>
    %c25 = arith.constant 25 : index
    %144 = memref.load %arg2[%c25] : memref<162xf32, #tpu.memory_space<smem>>
    %145 = vector.broadcast %144 : f32 to vector<14x14xf32>
    %146 = arith.mulf %40, %145 : vector<14x14xf32>
    %147 = arith.addf %143, %146 : vector<14x14xf32>
    %c26 = arith.constant 26 : index
    %148 = memref.load %arg2[%c26] : memref<162xf32, #tpu.memory_space<smem>>
    %149 = vector.broadcast %148 : f32 to vector<14x14xf32>
    %150 = arith.mulf %41, %149 : vector<14x14xf32>
    %151 = arith.addf %147, %150 : vector<14x14xf32>
    %c0_13 = arith.constant 0 : index
    %c0_14 = arith.constant 0 : index
    %c0_15 = arith.constant 0 : index
    %c0_16 = arith.constant 0 : index
    %152 = vector.load %arg4[%c0_13, %c0_14, %c0_15, %c0_16] : memref<1x6x14x14xf32, #tpu.memory_space<vmem>>, vector<1x1x14x14xf32>
    %153 = vector.shape_cast %152 : vector<1x1x14x14xf32> to vector<14x14xf32>
    %154 = vector.shape_cast %151 : vector<14x14xf32> to vector<1x1x14x14xf32>
    tpu.vector_store %arg4[%c0_13, %c0_14, %c0_15, %c0_16], %154 {strides = array<i32>} : memref<1x6x14x14xf32, #tpu.memory_space<vmem>>, vector<1x1x14x14xf32>,
    %c1_17 = arith.constant 1 : index
    %155 = memref.load %arg3[%c1_17] : memref<6xf32, #tpu.memory_space<smem>>
    %156 = vector.broadcast %155 : f32 to vector<14x14xf32>
    %c27 = arith.constant 27 : index
    %157 = memref.load %arg2[%c27] : memref<162xf32, #tpu.memory_space<smem>>
    %158 = vector.broadcast %157 : f32 to vector<14x14xf32>
    %159 = arith.mulf %3, %158 : vector<14x14xf32>
    %160 = arith.addf %156, %159 : vector<14x14xf32>
    %c28 = arith.constant 28 : index
    %161 = memref.load %arg2[%c28] : memref<162xf32, #tpu.memory_space<smem>>
    %162 = vector.broadcast %161 : f32 to vector<14x14xf32>
    %163 = arith.mulf %4, %162 : vector<14x14xf32>
    %164 = arith.addf %160, %163 : vector<14x14xf32>
    %c29 = arith.constant 29 : index
    %165 = memref.load %arg2[%c29] : memref<162xf32, #tpu.memory_space<smem>>
    %166 = vector.broadcast %165 : f32 to vector<14x14xf32>
    %167 = arith.mulf %5, %166 : vector<14x14xf32>
    %168 = arith.addf %164, %167 : vector<14x14xf32>
    %c30 = arith.constant 30 : index
    %169 = memref.load %arg2[%c30] : memref<162xf32, #tpu.memory_space<smem>>
    %170 = vector.broadcast %169 : f32 to vector<14x14xf32>
    %171 = arith.mulf %7, %170 : vector<14x14xf32>
    %172 = arith.addf %168, %171 : vector<14x14xf32>
    %c31 = arith.constant 31 : index
    %173 = memref.load %arg2[%c31] : memref<162xf32, #tpu.memory_space<smem>>
    %174 = vector.broadcast %173 : f32 to vector<14x14xf32>
    %175 = arith.mulf %8, %174 : vector<14x14xf32>
    %176 = arith.addf %172, %175 : vector<14x14xf32>
    %c32 = arith.constant 32 : index
    %177 = memref.load %arg2[%c32] : memref<162xf32, #tpu.memory_space<smem>>
    %178 = vector.broadcast %177 : f32 to vector<14x14xf32>
    %179 = arith.mulf %9, %178 : vector<14x14xf32>
    %180 = arith.addf %176, %179 : vector<14x14xf32>
    %c33 = arith.constant 33 : index
    %181 = memref.load %arg2[%c33] : memref<162xf32, #tpu.memory_space<smem>>
    %182 = vector.broadcast %181 : f32 to vector<14x14xf32>
    %183 = arith.mulf %11, %182 : vector<14x14xf32>
    %184 = arith.addf %180, %183 : vector<14x14xf32>
    %c34 = arith.constant 34 : index
    %185 = memref.load %arg2[%c34] : memref<162xf32, #tpu.memory_space<smem>>
    %186 = vector.broadcast %185 : f32 to vector<14x14xf32>
    %187 = arith.mulf %12, %186 : vector<14x14xf32>
    %188 = arith.addf %184, %187 : vector<14x14xf32>
    %c35 = arith.constant 35 : index
    %189 = memref.load %arg2[%c35] : memref<162xf32, #tpu.memory_space<smem>>
    %190 = vector.broadcast %189 : f32 to vector<14x14xf32>
    %191 = arith.mulf %13, %190 : vector<14x14xf32>
    %192 = arith.addf %188, %191 : vector<14x14xf32>
    %c36 = arith.constant 36 : index
    %193 = memref.load %arg2[%c36] : memref<162xf32, #tpu.memory_space<smem>>
    %194 = vector.broadcast %193 : f32 to vector<14x14xf32>
    %195 = arith.mulf %17, %194 : vector<14x14xf32>
    %196 = arith.addf %192, %195 : vector<14x14xf32>
    %c37 = arith.constant 37 : index
    %197 = memref.load %arg2[%c37] : memref<162xf32, #tpu.memory_space<smem>>
    %198 = vector.broadcast %197 : f32 to vector<14x14xf32>
    %199 = arith.mulf %18, %198 : vector<14x14xf32>
    %200 = arith.addf %196, %199 : vector<14x14xf32>
    %c38 = arith.constant 38 : index
    %201 = memref.load %arg2[%c38] : memref<162xf32, #tpu.memory_space<smem>>
    %202 = vector.broadcast %201 : f32 to vector<14x14xf32>
    %203 = arith.mulf %19, %202 : vector<14x14xf32>
    %204 = arith.addf %200, %203 : vector<14x14xf32>
    %c39 = arith.constant 39 : index
    %205 = memref.load %arg2[%c39] : memref<162xf32, #tpu.memory_space<smem>>
    %206 = vector.broadcast %205 : f32 to vector<14x14xf32>
    %207 = arith.mulf %21, %206 : vector<14x14xf32>
    %208 = arith.addf %204, %207 : vector<14x14xf32>
    %c40 = arith.constant 40 : index
    %209 = memref.load %arg2[%c40] : memref<162xf32, #tpu.memory_space<smem>>
    %210 = vector.broadcast %209 : f32 to vector<14x14xf32>
    %211 = arith.mulf %22, %210 : vector<14x14xf32>
    %212 = arith.addf %208, %211 : vector<14x14xf32>
    %c41 = arith.constant 41 : index
    %213 = memref.load %arg2[%c41] : memref<162xf32, #tpu.memory_space<smem>>
    %214 = vector.broadcast %213 : f32 to vector<14x14xf32>
    %215 = arith.mulf %23, %214 : vector<14x14xf32>
    %216 = arith.addf %212, %215 : vector<14x14xf32>
    %c42 = arith.constant 42 : index
    %217 = memref.load %arg2[%c42] : memref<162xf32, #tpu.memory_space<smem>>
    %218 = vector.broadcast %217 : f32 to vector<14x14xf32>
    %219 = arith.mulf %25, %218 : vector<14x14xf32>
    %220 = arith.addf %216, %219 : vector<14x14xf32>
    %c43 = arith.constant 43 : index
    %221 = memref.load %arg2[%c43] : memref<162xf32, #tpu.memory_space<smem>>
    %222 = vector.broadcast %221 : f32 to vector<14x14xf32>
    %223 = arith.mulf %26, %222 : vector<14x14xf32>
    %224 = arith.addf %220, %223 : vector<14x14xf32>
    %c44 = arith.constant 44 : index
    %225 = memref.load %arg2[%c44] : memref<162xf32, #tpu.memory_space<smem>>
    %226 = vector.broadcast %225 : f32 to vector<14x14xf32>
    %227 = arith.mulf %27, %226 : vector<14x14xf32>
    %228 = arith.addf %224, %227 : vector<14x14xf32>
    %c45 = arith.constant 45 : index
    %229 = memref.load %arg2[%c45] : memref<162xf32, #tpu.memory_space<smem>>
    %230 = vector.broadcast %229 : f32 to vector<14x14xf32>
    %231 = arith.mulf %31, %230 : vector<14x14xf32>
    %232 = arith.addf %228, %231 : vector<14x14xf32>
    %c46 = arith.constant 46 : index
    %233 = memref.load %arg2[%c46] : memref<162xf32, #tpu.memory_space<smem>>
    %234 = vector.broadcast %233 : f32 to vector<14x14xf32>
    %235 = arith.mulf %32, %234 : vector<14x14xf32>
    %236 = arith.addf %232, %235 : vector<14x14xf32>
    %c47 = arith.constant 47 : index
    %237 = memref.load %arg2[%c47] : memref<162xf32, #tpu.memory_space<smem>>
    %238 = vector.broadcast %237 : f32 to vector<14x14xf32>
    %239 = arith.mulf %33, %238 : vector<14x14xf32>
    %240 = arith.addf %236, %239 : vector<14x14xf32>
    %c48 = arith.constant 48 : index
    %241 = memref.load %arg2[%c48] : memref<162xf32, #tpu.memory_space<smem>>
    %242 = vector.broadcast %241 : f32 to vector<14x14xf32>
    %243 = arith.mulf %35, %242 : vector<14x14xf32>
    %244 = arith.addf %240, %243 : vector<14x14xf32>
    %c49 = arith.constant 49 : index
    %245 = memref.load %arg2[%c49] : memref<162xf32, #tpu.memory_space<smem>>
    %246 = vector.broadcast %245 : f32 to vector<14x14xf32>
    %247 = arith.mulf %36, %246 : vector<14x14xf32>
    %248 = arith.addf %244, %247 : vector<14x14xf32>
    %c50 = arith.constant 50 : index
    %249 = memref.load %arg2[%c50] : memref<162xf32, #tpu.memory_space<smem>>
    %250 = vector.broadcast %249 : f32 to vector<14x14xf32>
    %251 = arith.mulf %37, %250 : vector<14x14xf32>
    %252 = arith.addf %248, %251 : vector<14x14xf32>
    %c51 = arith.constant 51 : index
    %253 = memref.load %arg2[%c51] : memref<162xf32, #tpu.memory_space<smem>>
    %254 = vector.broadcast %253 : f32 to vector<14x14xf32>
    %255 = arith.mulf %39, %254 : vector<14x14xf32>
    %256 = arith.addf %252, %255 : vector<14x14xf32>
    %c52 = arith.constant 52 : index
    %257 = memref.load %arg2[%c52] : memref<162xf32, #tpu.memory_space<smem>>
    %258 = vector.broadcast %257 : f32 to vector<14x14xf32>
    %259 = arith.mulf %40, %258 : vector<14x14xf32>
    %260 = arith.addf %256, %259 : vector<14x14xf32>
    %c53 = arith.constant 53 : index
    %261 = memref.load %arg2[%c53] : memref<162xf32, #tpu.memory_space<smem>>
    %262 = vector.broadcast %261 : f32 to vector<14x14xf32>
    %263 = arith.mulf %41, %262 : vector<14x14xf32>
    %264 = arith.addf %260, %263 : vector<14x14xf32>
    %c0_18 = arith.constant 0 : index
    %c1_19 = arith.constant 1 : index
    %c0_20 = arith.constant 0 : index
    %c0_21 = arith.constant 0 : index
    %265 = vector.load %arg4[%c0_18, %c1_19, %c0_20, %c0_21] : memref<1x6x14x14xf32, #tpu.memory_space<vmem>>, vector<1x1x14x14xf32>
    %266 = vector.shape_cast %265 : vector<1x1x14x14xf32> to vector<14x14xf32>
    %267 = vector.shape_cast %264 : vector<14x14xf32> to vector<1x1x14x14xf32>
    tpu.vector_store %arg4[%c0_18, %c1_19, %c0_20, %c0_21], %267 {strides = array<i32>} : memref<1x6x14x14xf32, #tpu.memory_space<vmem>>, vector<1x1x14x14xf32>,
    %c2_22 = arith.constant 2 : index
    %268 = memref.load %arg3[%c2_22] : memref<6xf32, #tpu.memory_space<smem>>
    %269 = vector.broadcast %268 : f32 to vector<14x14xf32>
    %c54 = arith.constant 54 : index
    %270 = memref.load %arg2[%c54] : memref<162xf32, #tpu.memory_space<smem>>
    %271 = vector.broadcast %270 : f32 to vector<14x14xf32>
    %272 = arith.mulf %3, %271 : vector<14x14xf32>
    %273 = arith.addf %269, %272 : vector<14x14xf32>
    %c55 = arith.constant 55 : index
    %274 = memref.load %arg2[%c55] : memref<162xf32, #tpu.memory_space<smem>>
    %275 = vector.broadcast %274 : f32 to vector<14x14xf32>
    %276 = arith.mulf %4, %275 : vector<14x14xf32>
    %277 = arith.addf %273, %276 : vector<14x14xf32>
    %c56 = arith.constant 56 : index
    %278 = memref.load %arg2[%c56] : memref<162xf32, #tpu.memory_space<smem>>
    %279 = vector.broadcast %278 : f32 to vector<14x14xf32>
    %280 = arith.mulf %5, %279 : vector<14x14xf32>
    %281 = arith.addf %277, %280 : vector<14x14xf32>
    %c57 = arith.constant 57 : index
    %282 = memref.load %arg2[%c57] : memref<162xf32, #tpu.memory_space<smem>>
    %283 = vector.broadcast %282 : f32 to vector<14x14xf32>
    %284 = arith.mulf %7, %283 : vector<14x14xf32>
    %285 = arith.addf %281, %284 : vector<14x14xf32>
    %c58 = arith.constant 58 : index
    %286 = memref.load %arg2[%c58] : memref<162xf32, #tpu.memory_space<smem>>
    %287 = vector.broadcast %286 : f32 to vector<14x14xf32>
    %288 = arith.mulf %8, %287 : vector<14x14xf32>
    %289 = arith.addf %285, %288 : vector<14x14xf32>
    %c59 = arith.constant 59 : index
    %290 = memref.load %arg2[%c59] : memref<162xf32, #tpu.memory_space<smem>>
    %291 = vector.broadcast %290 : f32 to vector<14x14xf32>
    %292 = arith.mulf %9, %291 : vector<14x14xf32>
    %293 = arith.addf %289, %292 : vector<14x14xf32>
    %c60 = arith.constant 60 : index
    %294 = memref.load %arg2[%c60] : memref<162xf32, #tpu.memory_space<smem>>
    %295 = vector.broadcast %294 : f32 to vector<14x14xf32>
    %296 = arith.mulf %11, %295 : vector<14x14xf32>
    %297 = arith.addf %293, %296 : vector<14x14xf32>
    %c61 = arith.constant 61 : index
    %298 = memref.load %arg2[%c61] : memref<162xf32, #tpu.memory_space<smem>>
    %299 = vector.broadcast %298 : f32 to vector<14x14xf32>
    %300 = arith.mulf %12, %299 : vector<14x14xf32>
    %301 = arith.addf %297, %300 : vector<14x14xf32>
    %c62 = arith.constant 62 : index
    %302 = memref.load %arg2[%c62] : memref<162xf32, #tpu.memory_space<smem>>
    %303 = vector.broadcast %302 : f32 to vector<14x14xf32>
    %304 = arith.mulf %13, %303 : vector<14x14xf32>
    %305 = arith.addf %301, %304 : vector<14x14xf32>
    %c63 = arith.constant 63 : index
    %306 = memref.load %arg2[%c63] : memref<162xf32, #tpu.memory_space<smem>>
    %307 = vector.broadcast %306 : f32 to vector<14x14xf32>
    %308 = arith.mulf %17, %307 : vector<14x14xf32>
    %309 = arith.addf %305, %308 : vector<14x14xf32>
    %c64 = arith.constant 64 : index
    %310 = memref.load %arg2[%c64] : memref<162xf32, #tpu.memory_space<smem>>
    %311 = vector.broadcast %310 : f32 to vector<14x14xf32>
    %312 = arith.mulf %18, %311 : vector<14x14xf32>
    %313 = arith.addf %309, %312 : vector<14x14xf32>
    %c65 = arith.constant 65 : index
    %314 = memref.load %arg2[%c65] : memref<162xf32, #tpu.memory_space<smem>>
    %315 = vector.broadcast %314 : f32 to vector<14x14xf32>
    %316 = arith.mulf %19, %315 : vector<14x14xf32>
    %317 = arith.addf %313, %316 : vector<14x14xf32>
    %c66 = arith.constant 66 : index
    %318 = memref.load %arg2[%c66] : memref<162xf32, #tpu.memory_space<smem>>
    %319 = vector.broadcast %318 : f32 to vector<14x14xf32>
    %320 = arith.mulf %21, %319 : vector<14x14xf32>
    %321 = arith.addf %317, %320 : vector<14x14xf32>
    %c67 = arith.constant 67 : index
    %322 = memref.load %arg2[%c67] : memref<162xf32, #tpu.memory_space<smem>>
    %323 = vector.broadcast %322 : f32 to vector<14x14xf32>
    %324 = arith.mulf %22, %323 : vector<14x14xf32>
    %325 = arith.addf %321, %324 : vector<14x14xf32>
    %c68 = arith.constant 68 : index
    %326 = memref.load %arg2[%c68] : memref<162xf32, #tpu.memory_space<smem>>
    %327 = vector.broadcast %326 : f32 to vector<14x14xf32>
    %328 = arith.mulf %23, %327 : vector<14x14xf32>
    %329 = arith.addf %325, %328 : vector<14x14xf32>
    %c69 = arith.constant 69 : index
    %330 = memref.load %arg2[%c69] : memref<162xf32, #tpu.memory_space<smem>>
    %331 = vector.broadcast %330 : f32 to vector<14x14xf32>
    %332 = arith.mulf %25, %331 : vector<14x14xf32>
    %333 = arith.addf %329, %332 : vector<14x14xf32>
    %c70 = arith.constant 70 : index
    %334 = memref.load %arg2[%c70] : memref<162xf32, #tpu.memory_space<smem>>
    %335 = vector.broadcast %334 : f32 to vector<14x14xf32>
    %336 = arith.mulf %26, %335 : vector<14x14xf32>
    %337 = arith.addf %333, %336 : vector<14x14xf32>
    %c71 = arith.constant 71 : index
    %338 = memref.load %arg2[%c71] : memref<162xf32, #tpu.memory_space<smem>>
    %339 = vector.broadcast %338 : f32 to vector<14x14xf32>
    %340 = arith.mulf %27, %339 : vector<14x14xf32>
    %341 = arith.addf %337, %340 : vector<14x14xf32>
    %c72 = arith.constant 72 : index
    %342 = memref.load %arg2[%c72] : memref<162xf32, #tpu.memory_space<smem>>
    %343 = vector.broadcast %342 : f32 to vector<14x14xf32>
    %344 = arith.mulf %31, %343 : vector<14x14xf32>
    %345 = arith.addf %341, %344 : vector<14x14xf32>
    %c73 = arith.constant 73 : index
    %346 = memref.load %arg2[%c73] : memref<162xf32, #tpu.memory_space<smem>>
    %347 = vector.broadcast %346 : f32 to vector<14x14xf32>
    %348 = arith.mulf %32, %347 : vector<14x14xf32>
    %349 = arith.addf %345, %348 : vector<14x14xf32>
    %c74 = arith.constant 74 : index
    %350 = memref.load %arg2[%c74] : memref<162xf32, #tpu.memory_space<smem>>
    %351 = vector.broadcast %350 : f32 to vector<14x14xf32>
    %352 = arith.mulf %33, %351 : vector<14x14xf32>
    %353 = arith.addf %349, %352 : vector<14x14xf32>
    %c75 = arith.constant 75 : index
    %354 = memref.load %arg2[%c75] : memref<162xf32, #tpu.memory_space<smem>>
    %355 = vector.broadcast %354 : f32 to vector<14x14xf32>
    %356 = arith.mulf %35, %355 : vector<14x14xf32>
    %357 = arith.addf %353, %356 : vector<14x14xf32>
    %c76 = arith.constant 76 : index
    %358 = memref.load %arg2[%c76] : memref<162xf32, #tpu.memory_space<smem>>
    %359 = vector.broadcast %358 : f32 to vector<14x14xf32>
    %360 = arith.mulf %36, %359 : vector<14x14xf32>
    %361 = arith.addf %357, %360 : vector<14x14xf32>
    %c77 = arith.constant 77 : index
    %362 = memref.load %arg2[%c77] : memref<162xf32, #tpu.memory_space<smem>>
    %363 = vector.broadcast %362 : f32 to vector<14x14xf32>
    %364 = arith.mulf %37, %363 : vector<14x14xf32>
    %365 = arith.addf %361, %364 : vector<14x14xf32>
    %c78 = arith.constant 78 : index
    %366 = memref.load %arg2[%c78] : memref<162xf32, #tpu.memory_space<smem>>
    %367 = vector.broadcast %366 : f32 to vector<14x14xf32>
    %368 = arith.mulf %39, %367 : vector<14x14xf32>
    %369 = arith.addf %365, %368 : vector<14x14xf32>
    %c79 = arith.constant 79 : index
    %370 = memref.load %arg2[%c79] : memref<162xf32, #tpu.memory_space<smem>>
    %371 = vector.broadcast %370 : f32 to vector<14x14xf32>
    %372 = arith.mulf %40, %371 : vector<14x14xf32>
    %373 = arith.addf %369, %372 : vector<14x14xf32>
    %c80 = arith.constant 80 : index
    %374 = memref.load %arg2[%c80] : memref<162xf32, #tpu.memory_space<smem>>
    %375 = vector.broadcast %374 : f32 to vector<14x14xf32>
    %376 = arith.mulf %41, %375 : vector<14x14xf32>
    %377 = arith.addf %373, %376 : vector<14x14xf32>
    %c0_23 = arith.constant 0 : index
    %c2_24 = arith.constant 2 : index
    %c0_25 = arith.constant 0 : index
    %c0_26 = arith.constant 0 : index
    %378 = vector.load %arg4[%c0_23, %c2_24, %c0_25, %c0_26] : memref<1x6x14x14xf32, #tpu.memory_space<vmem>>, vector<1x1x14x14xf32>
    %379 = vector.shape_cast %378 : vector<1x1x14x14xf32> to vector<14x14xf32>
    %380 = vector.shape_cast %377 : vector<14x14xf32> to vector<1x1x14x14xf32>
    tpu.vector_store %arg4[%c0_23, %c2_24, %c0_25, %c0_26], %380 {strides = array<i32>} : memref<1x6x14x14xf32, #tpu.memory_space<vmem>>, vector<1x1x14x14xf32>,
    %c3_27 = arith.constant 3 : index
    %381 = memref.load %arg3[%c3_27] : memref<6xf32, #tpu.memory_space<smem>>
    %382 = vector.broadcast %381 : f32 to vector<14x14xf32>
    %c81 = arith.constant 81 : index
    %383 = memref.load %arg2[%c81] : memref<162xf32, #tpu.memory_space<smem>>
    %384 = vector.broadcast %383 : f32 to vector<14x14xf32>
    %385 = arith.mulf %3, %384 : vector<14x14xf32>
    %386 = arith.addf %382, %385 : vector<14x14xf32>
    %c82 = arith.constant 82 : index
    %387 = memref.load %arg2[%c82] : memref<162xf32, #tpu.memory_space<smem>>
    %388 = vector.broadcast %387 : f32 to vector<14x14xf32>
    %389 = arith.mulf %4, %388 : vector<14x14xf32>
    %390 = arith.addf %386, %389 : vector<14x14xf32>
    %c83 = arith.constant 83 : index
    %391 = memref.load %arg2[%c83] : memref<162xf32, #tpu.memory_space<smem>>
    %392 = vector.broadcast %391 : f32 to vector<14x14xf32>
    %393 = arith.mulf %5, %392 : vector<14x14xf32>
    %394 = arith.addf %390, %393 : vector<14x14xf32>
    %c84 = arith.constant 84 : index
    %395 = memref.load %arg2[%c84] : memref<162xf32, #tpu.memory_space<smem>>
    %396 = vector.broadcast %395 : f32 to vector<14x14xf32>
    %397 = arith.mulf %7, %396 : vector<14x14xf32>
    %398 = arith.addf %394, %397 : vector<14x14xf32>
    %c85 = arith.constant 85 : index
    %399 = memref.load %arg2[%c85] : memref<162xf32, #tpu.memory_space<smem>>
    %400 = vector.broadcast %399 : f32 to vector<14x14xf32>
    %401 = arith.mulf %8, %400 : vector<14x14xf32>
    %402 = arith.addf %398, %401 : vector<14x14xf32>
    %c86 = arith.constant 86 : index
    %403 = memref.load %arg2[%c86] : memref<162xf32, #tpu.memory_space<smem>>
    %404 = vector.broadcast %403 : f32 to vector<14x14xf32>
    %405 = arith.mulf %9, %404 : vector<14x14xf32>
    %406 = arith.addf %402, %405 : vector<14x14xf32>
    %c87 = arith.constant 87 : index
    %407 = memref.load %arg2[%c87] : memref<162xf32, #tpu.memory_space<smem>>
    %408 = vector.broadcast %407 : f32 to vector<14x14xf32>
    %409 = arith.mulf %11, %408 : vector<14x14xf32>
    %410 = arith.addf %406, %409 : vector<14x14xf32>
    %c88 = arith.constant 88 : index
    %411 = memref.load %arg2[%c88] : memref<162xf32, #tpu.memory_space<smem>>
    %412 = vector.broadcast %411 : f32 to vector<14x14xf32>
    %413 = arith.mulf %12, %412 : vector<14x14xf32>
    %414 = arith.addf %410, %413 : vector<14x14xf32>
    %c89 = arith.constant 89 : index
    %415 = memref.load %arg2[%c89] : memref<162xf32, #tpu.memory_space<smem>>
    %416 = vector.broadcast %415 : f32 to vector<14x14xf32>
    %417 = arith.mulf %13, %416 : vector<14x14xf32>
    %418 = arith.addf %414, %417 : vector<14x14xf32>
    %c90 = arith.constant 90 : index
    %419 = memref.load %arg2[%c90] : memref<162xf32, #tpu.memory_space<smem>>
    %420 = vector.broadcast %419 : f32 to vector<14x14xf32>
    %421 = arith.mulf %17, %420 : vector<14x14xf32>
    %422 = arith.addf %418, %421 : vector<14x14xf32>
    %c91 = arith.constant 91 : index
    %423 = memref.load %arg2[%c91] : memref<162xf32, #tpu.memory_space<smem>>
    %424 = vector.broadcast %423 : f32 to vector<14x14xf32>
    %425 = arith.mulf %18, %424 : vector<14x14xf32>
    %426 = arith.addf %422, %425 : vector<14x14xf32>
    %c92 = arith.constant 92 : index
    %427 = memref.load %arg2[%c92] : memref<162xf32, #tpu.memory_space<smem>>
    %428 = vector.broadcast %427 : f32 to vector<14x14xf32>
    %429 = arith.mulf %19, %428 : vector<14x14xf32>
    %430 = arith.addf %426, %429 : vector<14x14xf32>
    %c93 = arith.constant 93 : index
    %431 = memref.load %arg2[%c93] : memref<162xf32, #tpu.memory_space<smem>>
    %432 = vector.broadcast %431 : f32 to vector<14x14xf32>
    %433 = arith.mulf %21, %432 : vector<14x14xf32>
    %434 = arith.addf %430, %433 : vector<14x14xf32>
    %c94 = arith.constant 94 : index
    %435 = memref.load %arg2[%c94] : memref<162xf32, #tpu.memory_space<smem>>
    %436 = vector.broadcast %435 : f32 to vector<14x14xf32>
    %437 = arith.mulf %22, %436 : vector<14x14xf32>
    %438 = arith.addf %434, %437 : vector<14x14xf32>
    %c95 = arith.constant 95 : index
    %439 = memref.load %arg2[%c95] : memref<162xf32, #tpu.memory_space<smem>>
    %440 = vector.broadcast %439 : f32 to vector<14x14xf32>
    %441 = arith.mulf %23, %440 : vector<14x14xf32>
    %442 = arith.addf %438, %441 : vector<14x14xf32>
    %c96 = arith.constant 96 : index
    %443 = memref.load %arg2[%c96] : memref<162xf32, #tpu.memory_space<smem>>
    %444 = vector.broadcast %443 : f32 to vector<14x14xf32>
    %445 = arith.mulf %25, %444 : vector<14x14xf32>
    %446 = arith.addf %442, %445 : vector<14x14xf32>
    %c97 = arith.constant 97 : index
    %447 = memref.load %arg2[%c97] : memref<162xf32, #tpu.memory_space<smem>>
    %448 = vector.broadcast %447 : f32 to vector<14x14xf32>
    %449 = arith.mulf %26, %448 : vector<14x14xf32>
    %450 = arith.addf %446, %449 : vector<14x14xf32>
    %c98 = arith.constant 98 : index
    %451 = memref.load %arg2[%c98] : memref<162xf32, #tpu.memory_space<smem>>
    %452 = vector.broadcast %451 : f32 to vector<14x14xf32>
    %453 = arith.mulf %27, %452 : vector<14x14xf32>
    %454 = arith.addf %450, %453 : vector<14x14xf32>
    %c99 = arith.constant 99 : index
    %455 = memref.load %arg2[%c99] : memref<162xf32, #tpu.memory_space<smem>>
    %456 = vector.broadcast %455 : f32 to vector<14x14xf32>
    %457 = arith.mulf %31, %456 : vector<14x14xf32>
    %458 = arith.addf %454, %457 : vector<14x14xf32>
    %c100 = arith.constant 100 : index
    %459 = memref.load %arg2[%c100] : memref<162xf32, #tpu.memory_space<smem>>
    %460 = vector.broadcast %459 : f32 to vector<14x14xf32>
    %461 = arith.mulf %32, %460 : vector<14x14xf32>
    %462 = arith.addf %458, %461 : vector<14x14xf32>
    %c101 = arith.constant 101 : index
    %463 = memref.load %arg2[%c101] : memref<162xf32, #tpu.memory_space<smem>>
    %464 = vector.broadcast %463 : f32 to vector<14x14xf32>
    %465 = arith.mulf %33, %464 : vector<14x14xf32>
    %466 = arith.addf %462, %465 : vector<14x14xf32>
    %c102 = arith.constant 102 : index
    %467 = memref.load %arg2[%c102] : memref<162xf32, #tpu.memory_space<smem>>
    %468 = vector.broadcast %467 : f32 to vector<14x14xf32>
    %469 = arith.mulf %35, %468 : vector<14x14xf32>
    %470 = arith.addf %466, %469 : vector<14x14xf32>
    %c103 = arith.constant 103 : index
    %471 = memref.load %arg2[%c103] : memref<162xf32, #tpu.memory_space<smem>>
    %472 = vector.broadcast %471 : f32 to vector<14x14xf32>
    %473 = arith.mulf %36, %472 : vector<14x14xf32>
    %474 = arith.addf %470, %473 : vector<14x14xf32>
    %c104 = arith.constant 104 : index
    %475 = memref.load %arg2[%c104] : memref<162xf32, #tpu.memory_space<smem>>
    %476 = vector.broadcast %475 : f32 to vector<14x14xf32>
    %477 = arith.mulf %37, %476 : vector<14x14xf32>
    %478 = arith.addf %474, %477 : vector<14x14xf32>
    %c105 = arith.constant 105 : index
    %479 = memref.load %arg2[%c105] : memref<162xf32, #tpu.memory_space<smem>>
    %480 = vector.broadcast %479 : f32 to vector<14x14xf32>
    %481 = arith.mulf %39, %480 : vector<14x14xf32>
    %482 = arith.addf %478, %481 : vector<14x14xf32>
    %c106 = arith.constant 106 : index
    %483 = memref.load %arg2[%c106] : memref<162xf32, #tpu.memory_space<smem>>
    %484 = vector.broadcast %483 : f32 to vector<14x14xf32>
    %485 = arith.mulf %40, %484 : vector<14x14xf32>
    %486 = arith.addf %482, %485 : vector<14x14xf32>
    %c107 = arith.constant 107 : index
    %487 = memref.load %arg2[%c107] : memref<162xf32, #tpu.memory_space<smem>>
    %488 = vector.broadcast %487 : f32 to vector<14x14xf32>
    %489 = arith.mulf %41, %488 : vector<14x14xf32>
    %490 = arith.addf %486, %489 : vector<14x14xf32>
    %c0_28 = arith.constant 0 : index
    %c3_29 = arith.constant 3 : index
    %c0_30 = arith.constant 0 : index
    %c0_31 = arith.constant 0 : index
    %491 = vector.load %arg4[%c0_28, %c3_29, %c0_30, %c0_31] : memref<1x6x14x14xf32, #tpu.memory_space<vmem>>, vector<1x1x14x14xf32>
    %492 = vector.shape_cast %491 : vector<1x1x14x14xf32> to vector<14x14xf32>
    %493 = vector.shape_cast %490 : vector<14x14xf32> to vector<1x1x14x14xf32>
    tpu.vector_store %arg4[%c0_28, %c3_29, %c0_30, %c0_31], %493 {strides = array<i32>} : memref<1x6x14x14xf32, #tpu.memory_space<vmem>>, vector<1x1x14x14xf32>,
    %c4_32 = arith.constant 4 : index
    %494 = memref.load %arg3[%c4_32] : memref<6xf32, #tpu.memory_space<smem>>
    %495 = vector.broadcast %494 : f32 to vector<14x14xf32>
    %c108 = arith.constant 108 : index
    %496 = memref.load %arg2[%c108] : memref<162xf32, #tpu.memory_space<smem>>
    %497 = vector.broadcast %496 : f32 to vector<14x14xf32>
    %498 = arith.mulf %3, %497 : vector<14x14xf32>
    %499 = arith.addf %495, %498 : vector<14x14xf32>
    %c109 = arith.constant 109 : index
    %500 = memref.load %arg2[%c109] : memref<162xf32, #tpu.memory_space<smem>>
    %501 = vector.broadcast %500 : f32 to vector<14x14xf32>
    %502 = arith.mulf %4, %501 : vector<14x14xf32>
    %503 = arith.addf %499, %502 : vector<14x14xf32>
    %c110 = arith.constant 110 : index
    %504 = memref.load %arg2[%c110] : memref<162xf32, #tpu.memory_space<smem>>
    %505 = vector.broadcast %504 : f32 to vector<14x14xf32>
    %506 = arith.mulf %5, %505 : vector<14x14xf32>
    %507 = arith.addf %503, %506 : vector<14x14xf32>
    %c111 = arith.constant 111 : index
    %508 = memref.load %arg2[%c111] : memref<162xf32, #tpu.memory_space<smem>>
    %509 = vector.broadcast %508 : f32 to vector<14x14xf32>
    %510 = arith.mulf %7, %509 : vector<14x14xf32>
    %511 = arith.addf %507, %510 : vector<14x14xf32>
    %c112 = arith.constant 112 : index
    %512 = memref.load %arg2[%c112] : memref<162xf32, #tpu.memory_space<smem>>
    %513 = vector.broadcast %512 : f32 to vector<14x14xf32>
    %514 = arith.mulf %8, %513 : vector<14x14xf32>
    %515 = arith.addf %511, %514 : vector<14x14xf32>
    %c113 = arith.constant 113 : index
    %516 = memref.load %arg2[%c113] : memref<162xf32, #tpu.memory_space<smem>>
    %517 = vector.broadcast %516 : f32 to vector<14x14xf32>
    %518 = arith.mulf %9, %517 : vector<14x14xf32>
    %519 = arith.addf %515, %518 : vector<14x14xf32>
    %c114 = arith.constant 114 : index
    %520 = memref.load %arg2[%c114] : memref<162xf32, #tpu.memory_space<smem>>
    %521 = vector.broadcast %520 : f32 to vector<14x14xf32>
    %522 = arith.mulf %11, %521 : vector<14x14xf32>
    %523 = arith.addf %519, %522 : vector<14x14xf32>
    %c115 = arith.constant 115 : index
    %524 = memref.load %arg2[%c115] : memref<162xf32, #tpu.memory_space<smem>>
    %525 = vector.broadcast %524 : f32 to vector<14x14xf32>
    %526 = arith.mulf %12, %525 : vector<14x14xf32>
    %527 = arith.addf %523, %526 : vector<14x14xf32>
    %c116 = arith.constant 116 : index
    %528 = memref.load %arg2[%c116] : memref<162xf32, #tpu.memory_space<smem>>
    %529 = vector.broadcast %528 : f32 to vector<14x14xf32>
    %530 = arith.mulf %13, %529 : vector<14x14xf32>
    %531 = arith.addf %527, %530 : vector<14x14xf32>
    %c117 = arith.constant 117 : index
    %532 = memref.load %arg2[%c117] : memref<162xf32, #tpu.memory_space<smem>>
    %533 = vector.broadcast %532 : f32 to vector<14x14xf32>
    %534 = arith.mulf %17, %533 : vector<14x14xf32>
    %535 = arith.addf %531, %534 : vector<14x14xf32>
    %c118 = arith.constant 118 : index
    %536 = memref.load %arg2[%c118] : memref<162xf32, #tpu.memory_space<smem>>
    %537 = vector.broadcast %536 : f32 to vector<14x14xf32>
    %538 = arith.mulf %18, %537 : vector<14x14xf32>
    %539 = arith.addf %535, %538 : vector<14x14xf32>
    %c119 = arith.constant 119 : index
    %540 = memref.load %arg2[%c119] : memref<162xf32, #tpu.memory_space<smem>>
    %541 = vector.broadcast %540 : f32 to vector<14x14xf32>
    %542 = arith.mulf %19, %541 : vector<14x14xf32>
    %543 = arith.addf %539, %542 : vector<14x14xf32>
    %c120 = arith.constant 120 : index
    %544 = memref.load %arg2[%c120] : memref<162xf32, #tpu.memory_space<smem>>
    %545 = vector.broadcast %544 : f32 to vector<14x14xf32>
    %546 = arith.mulf %21, %545 : vector<14x14xf32>
    %547 = arith.addf %543, %546 : vector<14x14xf32>
    %c121 = arith.constant 121 : index
    %548 = memref.load %arg2[%c121] : memref<162xf32, #tpu.memory_space<smem>>
    %549 = vector.broadcast %548 : f32 to vector<14x14xf32>
    %550 = arith.mulf %22, %549 : vector<14x14xf32>
    %551 = arith.addf %547, %550 : vector<14x14xf32>
    %c122 = arith.constant 122 : index
    %552 = memref.load %arg2[%c122] : memref<162xf32, #tpu.memory_space<smem>>
    %553 = vector.broadcast %552 : f32 to vector<14x14xf32>
    %554 = arith.mulf %23, %553 : vector<14x14xf32>
    %555 = arith.addf %551, %554 : vector<14x14xf32>
    %c123 = arith.constant 123 : index
    %556 = memref.load %arg2[%c123] : memref<162xf32, #tpu.memory_space<smem>>
    %557 = vector.broadcast %556 : f32 to vector<14x14xf32>
    %558 = arith.mulf %25, %557 : vector<14x14xf32>
    %559 = arith.addf %555, %558 : vector<14x14xf32>
    %c124 = arith.constant 124 : index
    %560 = memref.load %arg2[%c124] : memref<162xf32, #tpu.memory_space<smem>>
    %561 = vector.broadcast %560 : f32 to vector<14x14xf32>
    %562 = arith.mulf %26, %561 : vector<14x14xf32>
    %563 = arith.addf %559, %562 : vector<14x14xf32>
    %c125 = arith.constant 125 : index
    %564 = memref.load %arg2[%c125] : memref<162xf32, #tpu.memory_space<smem>>
    %565 = vector.broadcast %564 : f32 to vector<14x14xf32>
    %566 = arith.mulf %27, %565 : vector<14x14xf32>
    %567 = arith.addf %563, %566 : vector<14x14xf32>
    %c126 = arith.constant 126 : index
    %568 = memref.load %arg2[%c126] : memref<162xf32, #tpu.memory_space<smem>>
    %569 = vector.broadcast %568 : f32 to vector<14x14xf32>
    %570 = arith.mulf %31, %569 : vector<14x14xf32>
    %571 = arith.addf %567, %570 : vector<14x14xf32>
    %c127 = arith.constant 127 : index
    %572 = memref.load %arg2[%c127] : memref<162xf32, #tpu.memory_space<smem>>
    %573 = vector.broadcast %572 : f32 to vector<14x14xf32>
    %574 = arith.mulf %32, %573 : vector<14x14xf32>
    %575 = arith.addf %571, %574 : vector<14x14xf32>
    %c128 = arith.constant 128 : index
    %576 = memref.load %arg2[%c128] : memref<162xf32, #tpu.memory_space<smem>>
    %577 = vector.broadcast %576 : f32 to vector<14x14xf32>
    %578 = arith.mulf %33, %577 : vector<14x14xf32>
    %579 = arith.addf %575, %578 : vector<14x14xf32>
    %c129 = arith.constant 129 : index
    %580 = memref.load %arg2[%c129] : memref<162xf32, #tpu.memory_space<smem>>
    %581 = vector.broadcast %580 : f32 to vector<14x14xf32>
    %582 = arith.mulf %35, %581 : vector<14x14xf32>
    %583 = arith.addf %579, %582 : vector<14x14xf32>
    %c130 = arith.constant 130 : index
    %584 = memref.load %arg2[%c130] : memref<162xf32, #tpu.memory_space<smem>>
    %585 = vector.broadcast %584 : f32 to vector<14x14xf32>
    %586 = arith.mulf %36, %585 : vector<14x14xf32>
    %587 = arith.addf %583, %586 : vector<14x14xf32>
    %c131 = arith.constant 131 : index
    %588 = memref.load %arg2[%c131] : memref<162xf32, #tpu.memory_space<smem>>
    %589 = vector.broadcast %588 : f32 to vector<14x14xf32>
    %590 = arith.mulf %37, %589 : vector<14x14xf32>
    %591 = arith.addf %587, %590 : vector<14x14xf32>
    %c132 = arith.constant 132 : index
    %592 = memref.load %arg2[%c132] : memref<162xf32, #tpu.memory_space<smem>>
    %593 = vector.broadcast %592 : f32 to vector<14x14xf32>
    %594 = arith.mulf %39, %593 : vector<14x14xf32>
    %595 = arith.addf %591, %594 : vector<14x14xf32>
    %c133 = arith.constant 133 : index
    %596 = memref.load %arg2[%c133] : memref<162xf32, #tpu.memory_space<smem>>
    %597 = vector.broadcast %596 : f32 to vector<14x14xf32>
    %598 = arith.mulf %40, %597 : vector<14x14xf32>
    %599 = arith.addf %595, %598 : vector<14x14xf32>
    %c134 = arith.constant 134 : index
    %600 = memref.load %arg2[%c134] : memref<162xf32, #tpu.memory_space<smem>>
    %601 = vector.broadcast %600 : f32 to vector<14x14xf32>
    %602 = arith.mulf %41, %601 : vector<14x14xf32>
    %603 = arith.addf %599, %602 : vector<14x14xf32>
    %c0_33 = arith.constant 0 : index
    %c4_34 = arith.constant 4 : index
    %c0_35 = arith.constant 0 : index
    %c0_36 = arith.constant 0 : index
    %604 = vector.load %arg4[%c0_33, %c4_34, %c0_35, %c0_36] : memref<1x6x14x14xf32, #tpu.memory_space<vmem>>, vector<1x1x14x14xf32>
    %605 = vector.shape_cast %604 : vector<1x1x14x14xf32> to vector<14x14xf32>
    %606 = vector.shape_cast %603 : vector<14x14xf32> to vector<1x1x14x14xf32>
    tpu.vector_store %arg4[%c0_33, %c4_34, %c0_35, %c0_36], %606 {strides = array<i32>} : memref<1x6x14x14xf32, #tpu.memory_space<vmem>>, vector<1x1x14x14xf32>,
    %c5_37 = arith.constant 5 : index
    %607 = memref.load %arg3[%c5_37] : memref<6xf32, #tpu.memory_space<smem>>
    %608 = vector.broadcast %607 : f32 to vector<14x14xf32>
    %c135 = arith.constant 135 : index
    %609 = memref.load %arg2[%c135] : memref<162xf32, #tpu.memory_space<smem>>
    %610 = vector.broadcast %609 : f32 to vector<14x14xf32>
    %611 = arith.mulf %3, %610 : vector<14x14xf32>
    %612 = arith.addf %608, %611 : vector<14x14xf32>
    %c136 = arith.constant 136 : index
    %613 = memref.load %arg2[%c136] : memref<162xf32, #tpu.memory_space<smem>>
    %614 = vector.broadcast %613 : f32 to vector<14x14xf32>
    %615 = arith.mulf %4, %614 : vector<14x14xf32>
    %616 = arith.addf %612, %615 : vector<14x14xf32>
    %c137 = arith.constant 137 : index
    %617 = memref.load %arg2[%c137] : memref<162xf32, #tpu.memory_space<smem>>
    %618 = vector.broadcast %617 : f32 to vector<14x14xf32>
    %619 = arith.mulf %5, %618 : vector<14x14xf32>
    %620 = arith.addf %616, %619 : vector<14x14xf32>
    %c138 = arith.constant 138 : index
    %621 = memref.load %arg2[%c138] : memref<162xf32, #tpu.memory_space<smem>>
    %622 = vector.broadcast %621 : f32 to vector<14x14xf32>
    %623 = arith.mulf %7, %622 : vector<14x14xf32>
    %624 = arith.addf %620, %623 : vector<14x14xf32>
    %c139 = arith.constant 139 : index
    %625 = memref.load %arg2[%c139] : memref<162xf32, #tpu.memory_space<smem>>
    %626 = vector.broadcast %625 : f32 to vector<14x14xf32>
    %627 = arith.mulf %8, %626 : vector<14x14xf32>
    %628 = arith.addf %624, %627 : vector<14x14xf32>
    %c140 = arith.constant 140 : index
    %629 = memref.load %arg2[%c140] : memref<162xf32, #tpu.memory_space<smem>>
    %630 = vector.broadcast %629 : f32 to vector<14x14xf32>
    %631 = arith.mulf %9, %630 : vector<14x14xf32>
    %632 = arith.addf %628, %631 : vector<14x14xf32>
    %c141 = arith.constant 141 : index
    %633 = memref.load %arg2[%c141] : memref<162xf32, #tpu.memory_space<smem>>
    %634 = vector.broadcast %633 : f32 to vector<14x14xf32>
    %635 = arith.mulf %11, %634 : vector<14x14xf32>
    %636 = arith.addf %632, %635 : vector<14x14xf32>
    %c142 = arith.constant 142 : index
    %637 = memref.load %arg2[%c142] : memref<162xf32, #tpu.memory_space<smem>>
    %638 = vector.broadcast %637 : f32 to vector<14x14xf32>
    %639 = arith.mulf %12, %638 : vector<14x14xf32>
    %640 = arith.addf %636, %639 : vector<14x14xf32>
    %c143 = arith.constant 143 : index
    %641 = memref.load %arg2[%c143] : memref<162xf32, #tpu.memory_space<smem>>
    %642 = vector.broadcast %641 : f32 to vector<14x14xf32>
    %643 = arith.mulf %13, %642 : vector<14x14xf32>
    %644 = arith.addf %640, %643 : vector<14x14xf32>
    %c144 = arith.constant 144 : index
    %645 = memref.load %arg2[%c144] : memref<162xf32, #tpu.memory_space<smem>>
    %646 = vector.broadcast %645 : f32 to vector<14x14xf32>
    %647 = arith.mulf %17, %646 : vector<14x14xf32>
    %648 = arith.addf %644, %647 : vector<14x14xf32>
    %c145 = arith.constant 145 : index
    %649 = memref.load %arg2[%c145] : memref<162xf32, #tpu.memory_space<smem>>
    %650 = vector.broadcast %649 : f32 to vector<14x14xf32>
    %651 = arith.mulf %18, %650 : vector<14x14xf32>
    %652 = arith.addf %648, %651 : vector<14x14xf32>
    %c146 = arith.constant 146 : index
    %653 = memref.load %arg2[%c146] : memref<162xf32, #tpu.memory_space<smem>>
    %654 = vector.broadcast %653 : f32 to vector<14x14xf32>
    %655 = arith.mulf %19, %654 : vector<14x14xf32>
    %656 = arith.addf %652, %655 : vector<14x14xf32>
    %c147 = arith.constant 147 : index
    %657 = memref.load %arg2[%c147] : memref<162xf32, #tpu.memory_space<smem>>
    %658 = vector.broadcast %657 : f32 to vector<14x14xf32>
    %659 = arith.mulf %21, %658 : vector<14x14xf32>
    %660 = arith.addf %656, %659 : vector<14x14xf32>
    %c148 = arith.constant 148 : index
    %661 = memref.load %arg2[%c148] : memref<162xf32, #tpu.memory_space<smem>>
    %662 = vector.broadcast %661 : f32 to vector<14x14xf32>
    %663 = arith.mulf %22, %662 : vector<14x14xf32>
    %664 = arith.addf %660, %663 : vector<14x14xf32>
    %c149 = arith.constant 149 : index
    %665 = memref.load %arg2[%c149] : memref<162xf32, #tpu.memory_space<smem>>
    %666 = vector.broadcast %665 : f32 to vector<14x14xf32>
    %667 = arith.mulf %23, %666 : vector<14x14xf32>
    %668 = arith.addf %664, %667 : vector<14x14xf32>
    %c150 = arith.constant 150 : index
    %669 = memref.load %arg2[%c150] : memref<162xf32, #tpu.memory_space<smem>>
    %670 = vector.broadcast %669 : f32 to vector<14x14xf32>
    %671 = arith.mulf %25, %670 : vector<14x14xf32>
    %672 = arith.addf %668, %671 : vector<14x14xf32>
    %c151 = arith.constant 151 : index
    %673 = memref.load %arg2[%c151] : memref<162xf32, #tpu.memory_space<smem>>
    %674 = vector.broadcast %673 : f32 to vector<14x14xf32>
    %675 = arith.mulf %26, %674 : vector<14x14xf32>
    %676 = arith.addf %672, %675 : vector<14x14xf32>
    %c152 = arith.constant 152 : index
    %677 = memref.load %arg2[%c152] : memref<162xf32, #tpu.memory_space<smem>>
    %678 = vector.broadcast %677 : f32 to vector<14x14xf32>
    %679 = arith.mulf %27, %678 : vector<14x14xf32>
    %680 = arith.addf %676, %679 : vector<14x14xf32>
    %c153 = arith.constant 153 : index
    %681 = memref.load %arg2[%c153] : memref<162xf32, #tpu.memory_space<smem>>
    %682 = vector.broadcast %681 : f32 to vector<14x14xf32>
    %683 = arith.mulf %31, %682 : vector<14x14xf32>
    %684 = arith.addf %680, %683 : vector<14x14xf32>
    %c154 = arith.constant 154 : index
    %685 = memref.load %arg2[%c154] : memref<162xf32, #tpu.memory_space<smem>>
    %686 = vector.broadcast %685 : f32 to vector<14x14xf32>
    %687 = arith.mulf %32, %686 : vector<14x14xf32>
    %688 = arith.addf %684, %687 : vector<14x14xf32>
    %c155 = arith.constant 155 : index
    %689 = memref.load %arg2[%c155] : memref<162xf32, #tpu.memory_space<smem>>
    %690 = vector.broadcast %689 : f32 to vector<14x14xf32>
    %691 = arith.mulf %33, %690 : vector<14x14xf32>
    %692 = arith.addf %688, %691 : vector<14x14xf32>
    %c156 = arith.constant 156 : index
    %693 = memref.load %arg2[%c156] : memref<162xf32, #tpu.memory_space<smem>>
    %694 = vector.broadcast %693 : f32 to vector<14x14xf32>
    %695 = arith.mulf %35, %694 : vector<14x14xf32>
    %696 = arith.addf %692, %695 : vector<14x14xf32>
    %c157 = arith.constant 157 : index
    %697 = memref.load %arg2[%c157] : memref<162xf32, #tpu.memory_space<smem>>
    %698 = vector.broadcast %697 : f32 to vector<14x14xf32>
    %699 = arith.mulf %36, %698 : vector<14x14xf32>
    %700 = arith.addf %696, %699 : vector<14x14xf32>
    %c158 = arith.constant 158 : index
    %701 = memref.load %arg2[%c158] : memref<162xf32, #tpu.memory_space<smem>>
    %702 = vector.broadcast %701 : f32 to vector<14x14xf32>
    %703 = arith.mulf %37, %702 : vector<14x14xf32>
    %704 = arith.addf %700, %703 : vector<14x14xf32>
    %c159 = arith.constant 159 : index
    %705 = memref.load %arg2[%c159] : memref<162xf32, #tpu.memory_space<smem>>
    %706 = vector.broadcast %705 : f32 to vector<14x14xf32>
    %707 = arith.mulf %39, %706 : vector<14x14xf32>
    %708 = arith.addf %704, %707 : vector<14x14xf32>
    %c160 = arith.constant 160 : index
    %709 = memref.load %arg2[%c160] : memref<162xf32, #tpu.memory_space<smem>>
    %710 = vector.broadcast %709 : f32 to vector<14x14xf32>
    %711 = arith.mulf %40, %710 : vector<14x14xf32>
    %712 = arith.addf %708, %711 : vector<14x14xf32>
    %c161 = arith.constant 161 : index
    %713 = memref.load %arg2[%c161] : memref<162xf32, #tpu.memory_space<smem>>
    %714 = vector.broadcast %713 : f32 to vector<14x14xf32>
    %715 = arith.mulf %41, %714 : vector<14x14xf32>
    %716 = arith.addf %712, %715 : vector<14x14xf32>
    %c0_38 = arith.constant 0 : index
    %c5_39 = arith.constant 5 : index
    %c0_40 = arith.constant 0 : index
    %c0_41 = arith.constant 0 : index
    %717 = vector.load %arg4[%c0_38, %c5_39, %c0_40, %c0_41] : memref<1x6x14x14xf32, #tpu.memory_space<vmem>>, vector<1x1x14x14xf32>
    %718 = vector.shape_cast %717 : vector<1x1x14x14xf32> to vector<14x14xf32>
    %719 = vector.shape_cast %716 : vector<14x14xf32> to vector<1x1x14x14xf32>
    tpu.vector_store %arg4[%c0_38, %c5_39, %c0_40, %c0_41], %719 {strides = array<i32>} : memref<1x6x14x14xf32, #tpu.memory_space<vmem>>, vector<1x1x14x14xf32>,
    return
  }
  func.func @transform_0(%arg0: i32) -> (i32, i32, i32, i32) {
    %c0_i32 = arith.constant 0 : i32
    %c0_i32_0 = arith.constant 0 : i32
    %c0_i32_1 = arith.constant 0 : i32
    %c0_i32_2 = arith.constant 0 : i32
    return %arg0, %c0_i32, %c0_i32_0, %c0_i32_1 : i32, i32, i32, i32
  }
  func.func @transform_1(%arg0: i32) -> i32 {
    %c0_i32 = arith.constant 0 : i32
    %c0_i32_0 = arith.constant 0 : i32
    return %c0_i32 : i32
  }
  func.func @transform_2(%arg0: i32) -> i32 {
    %c0_i32 = arith.constant 0 : i32
    %c0_i32_0 = arith.constant 0 : i32
    return %c0_i32 : i32
  }
  func.func @transform_3(%arg0: i32) -> (i32, i32, i32, i32) {
    %c0_i32 = arith.constant 0 : i32
    %c0_i32_0 = arith.constant 0 : i32
    %c0_i32_1 = arith.constant 0 : i32
    %c0_i32_2 = arith.constant 0 : i32
    return %arg0, %c0_i32, %c0_i32_0, %c0_i32_1 : i32, i32, i32, i32
  }
}

</mosaic_0001>

<bundles_post_ra>
// kernel: tpu_custom_call.1
= control target key start
LH: loop header
LB: loop body
LE: loop exit
PB: predicated region body
PF: predicated region fallthrough
CT: control target
= control target key end

     0   :  { %8 = vsyncpa [#allocation3], 0  ;;  %s4420_s0 = inlined_call_operand.hbm [shape: f32[2,3,16,16], index: 0, kind: input, shape index: {}]   ;;  %s4421_s1 = inlined_call_operand.hbm [shape: f32[162], index: 1, kind: input, shape index: {}]   ;;  %s4422_s2 = inlined_call_operand.vmem [shape: f32[6], index: 2, kind: input, shape index: {}]   ;;  %s4423_s3 = inlined_call_operand.vmem [shape: f32[2,6,14,14], index: 3, kind: output, shape index: {}]  }
   0x1   :  { %10 = vsyncpa [#allocation3 + $0x1], 0 }
   0x2   :  { %11 = vsyncpa [#allocation4], 0 }
   0x3   :  { %12 = vsyncpa [#allocation5], 0  ;;  %s3064_s12 = smov 0   ;;  %s3066_s13 = smov 0  }
   0x4   :  { %s3068_s14 = smov 0   ;;  %s3070_s15 = smov 0  }
   0x5 LB: > { %s3083_s16 = sadd.s32 4294967295, %s3036_s15   ;;  %s3086_s17 = sadd.s32 1, %s3036_s15   ;;  %s3036_s15 = sphi %s3070_s15, %s4431_s15   ;;  %s3032_s14 = sphi %s3068_s14, %s4430_s14   ;;  %s3028_s13 = sphi %s3066_s13, %s4429_s13   ;;  %s3024_s12 = sphi %s3064_s12, %s4428_s12  }
   0x6   : > { %s22_s18 = ssub.s32 %s3036_s15, %s3086_s17  ;;  %s25_s19 = sadd.s32 1, %s3032_s14 }
   0x7   : > { %p23_p0 = scmp.eq.s32.totalorder %s22_s18, 0  ;;  %p32_p1 = scmp.ne.s32.totalorder %s3032_s14, %s3028_s13 }
   0x8   : > { %p33_p2 = scmp.eq.s32.totalorder %s3036_s15, 0  ;;  %p38_p3 = scmp.ne.s32.totalorder %s3028_s13, %s3024_s12 }
   0x9   : > { %s3096_s20 = scalar_select %p23_p0, %s3032_s14, %s25_s19  }
   0xa   : > { %p3098_p4 = por %p33_p2, %p32_p1  ;;  %p39_p5 = scmp.eq.s32.totalorder %s3083_s16, 0 }
   0xb   : > { %p2657_p6 = scmp.ge.s32.totalorder %s3036_s15, 1  ;;  %p117_p7 = scmp.lt.s32.totalorder %s3036_s15, 3 }
   0xc   : > { %p3107_p8 = por %p39_p5, %p38_p3  ;;  %s129_s26 = sshll.u32 %s4421_s1, 4  ;;  %s130_s26 = int_to_ptr.hbm [resolvable:$true] %s129_s26 }
   0xd   : > { %p3111_p9 = pnand %p2657_p6, %p117_p7  ;;  %p2875_p11 = scmp.lt.s32.totalorder %s3036_s15, 2 }
   0xe   : > { %s139_s29 = sshll.u32 %s4422_s2, 4  ;;  %s150_s4 = sand.u32 1, %s3032_s14   ;;  %s140_s29 = int_to_ptr.vmem [resolvable:$true] %s139_s29 }
   0xf   : > { %p2862_p10 = pneg %p3111_p9  ;;  %p3128_p13 = pnand %p2875_p11, %p3098_p4 }
  0x10   : > { %s3038_s5 = smov [#allocation6]   ;;  %s3039_s6 = smov [#allocation7]  }
  0x11   : > { %p2863_p12 = pnand %p2862_p10, %p39_p5  ;;  %s2848_s7 = smul.u32 48, %s150_s4 }
  0x12   : > { %s2849_s8 = smul.u32 48, %s3036_s15  ;;  %s151_s21 = scalar_lea.sflag [#allocation3], %s150_s4 }
  0x13   : > { %2865 = dma.hbm_to_smem (!%p2863_p12), %s130_s26, 32, %s3038_s5, [#allocation4]  }
  0x14   : > { %2868 = dma.vmem_to_smem (!%p2863_p12), %s140_s29, 16, %s3039_s6, [#allocation5]  }
  0x15   : > { %s159_s11 = scalar_lea.hbm %s4420_s0, %s2849_s8  ;;  %s154_s12 = scalar_lea.vmem [#allocation2], %s2848_s7 }
  0x16   : > { %s162_s18 = sshll.u32 %s154_s12, 4  ;;  %s160_s19 = sshll.u32 %s159_s11, 4  ;;  %s163_s18 = int_to_ptr.vmem [resolvable:$true] %s162_s18  ;;  %s161_s19 = int_to_ptr.hbm [resolvable:$true] %s160_s19 }
  0x17   : > { %s2964_s24 = sshra.s32 %s161_s19, 4  ;;  %p2968_p1 = pneg %p3128_p13  ;;  %s2965_s24 = int_to_ptr.hbm [resolvable:$true] %s2964_s24 }
  0x18   : > { %s2966_s25 = scalar_lea.hbm %s2965_s24, 48  ;;  %s2971_s27 = scalar_lea.hbm %s4420_s0, 96 }
  0x19   : > { %p2967_p0 = scmp.ne.s32.totalorder %s2965_s24, %s2966_s25  ;;  %p2972_p4 = scmp.lt.s32.totalorder %s2965_s24, %s4420_s0 }
  0x1a   : > { %p2973_p6 = scmp.lt.s32.totalorder %s2971_s27, %s2966_s25 }
  0x1b   : > { %p2969_p2 = pnand %p2968_p1, %p2967_p0 }
  0x1c   : > { %p2974_p7 = por %p2973_p6, %p2972_p4 }
  0x1d   : > { %p2970_p3 = pneg %p2969_p2 }
  0x1f   : > { %p2975_p10 = pnand %p2974_p7, %p2970_p3 }
  0x21   : > { %2978 = shalt.err (!%p2975_p10)
}
  0x22   : > { %s3040_s4 = smov 128   ;;  %s3041_s5 = smov 8  }
  0x23   : > { %2872 = dma.hbm_to_vmem [thread:$0]  (!%p3128_p13), %s161_s19, 768, %s163_s18, %s151_s21, %s3040_s4, %s3040_s4, %s3041_s5  }
  0x24   : > { %174 = sbr.rel (%p3111_p9) target bundleno = 746 (0x2ea), region = 32  ;;  %s176_s6 = sand.u32 (!%p3111_p9), 1, %s3028_s13  }
  0x25   : > { %s2850_s7 = smul.u32 (!%p3111_p9), 48, %s176_s6  ;;  %s177_s8 = scalar_lea.sflag (!%p3111_p9), [#allocation3], %s176_s6 }
  0x27   : > { %s3150_s9 = scalar_lea.vmem (!%p3111_p9), [#allocation2], %s2850_s7 }
  0x29   : > { %3011 = dma.done.wait (%p3107_p8), %s177_s8, 768  }
  0x2a   : > { %3013 = vsyncadd (%p3107_p8), %s177_s8, 4294966528 }
  0x2b   : > { %3015 = dma.done.wait (%p39_p5), [#allocation4], 32  }
  0x2c   : > { %3017 = vsyncadd (%p39_p5), [#allocation4], 4294967264 }
  0x2d   : > { %3019 = dma.done.wait (%p39_p5), [#allocation5], 16  }
  0x2e   : > { %3021 = vsyncadd (%p39_p5), [#allocation5], 4294967280 }
  0x2f   : > { %196 = sfence }
  0x30   : > { %s2671_s23 = sld [smem:[#allocation6 + $0x2]]  ;;  %v3165_v0 = vld [vmem:[%s3150_s9] sm:$0xff]  ;;  %v3170_v5 = vld [vmem:[%s3150_s9 + $0x8] sm:$0xff]  ;;  %s3042_s11 = smov 126   ;;  %vm270_vm0 = vcmask 1046528   ;;  %vm318_vm1 = vcmask 1045504  }
  0x31   : > { %s2670_s30 = sld [smem:[#allocation6 + $0x1]]  ;;  %s3043_s18 = smov 127   ;;  %v3198_v32 = vld [vmem:[%s3150_s9 + $0x18] sm:$0xff]  ;;  %v3201_v34 = vld [vmem:[%s3150_s9 + $0x10] sm:$0xff]  ;;  %vm616_vm2 = vcmask 113664   ;;  %vm618_vm3 = vcmask 111616  }
  0x32   : > { %s2673_s10 = sld [smem:[#allocation6 + $0x4]]  ;;  %p215_p5 = scmp.lt.s32.totalorder %s3083_s16, 1 }
  0x33   : > { %s2674_s22 = sld [smem:[#allocation6 + $0x5]] }
  0x34   : > { %s2677_s12 = sld [smem:[#allocation6 + $0x8]]  ;;  %s4433_s16 = smov (!%p215_p5, %s3083_s16), 1 }
  0x35   : > { %s2676_s19 = sld [smem:[#allocation6 + $0x7]] }
  0x36   : > { %v251_v1 = vstv %s2671_s23  ;;  %s2679_s21 = sld [smem:[#allocation6 + $0xa]] }
  0x37   : > { %v252_v2 = vmul.f32 %v251_v1, %v3165_v0  ;;  %v237_v3 = vstv %s2670_s30  ;;  %v253_v11 = vmul.f32 %v251_v1, %v3170_v5  ;;  %s2682_s24 = sld [smem:[#allocation6 + $0xd]]  ;;  %v3232_v1 = vld [vmem:[%s3150_s9 + $0x28] sm:$0xff] }
  0x38   : > { %v238_v4 = vmul.f32 %v237_v3, %v3165_v0  ;;  %v279_v6 = vstv %s2673_s10  ;;  %v239_v12 = vmul.f32 %v237_v3, %v3170_v5  ;;  %s2680_s25 = sld [smem:[#allocation6 + $0xb]]  ;;  %v3235_v3 = vld [vmem:[%s3150_s9 + $0x20] sm:$0xff] }
  0x39   : > { %256 = vrot.lane.b32.xlu1 %v252_v2, %s3042_s11  ;;  %v281_v7 = vmul.f32 %v279_v6, %v3170_v5  ;;  %v280_v8 = vmul.f32 %v279_v6, %v3165_v0  ;;  %v296_v9 = vstv %s2674_s22  ;;  %s2683_s26 = sld [smem:[#allocation6 + $0xe]] }
  0x3a   : > { %242 = vrot.lane.b32.xlu0 %v238_v4, %s3043_s18  ;;  %v297_v13 = vmul.f32 %v296_v9, %v3165_v0  ;;  %v298_v14 = vmul.f32 %v296_v9, %v3170_v5  ;;  %v344_v16 = vstv %s2677_s12  ;;  %s2685_s15 = sld [smem:[#allocation6 + $0x10]] }
  0x3b   : > { %v285_v10 = vrot.slane %v281_v7, 1  ;;  %v284_v15 = vrot.slane %v280_v8, 1  ;;  %v327_v17 = vstv %s2676_s19  ;;  %v345_v23 = vmul.f32 %v344_v16, %v3165_v0  ;;  %s2686_s27 = sld [smem:[#allocation6 + $0x11]] }
  0x3c   : > { %v302_v18 = vrot.slane %v298_v14, 1  ;;  %v301_v19 = vrot.slane %v297_v13, 1  ;;  %v328_v20 = vmul.f32 %v327_v17, %v3165_v0  ;;  %v329_v22 = vmul.f32 %v327_v17, %v3170_v5  ;;  %s2688_s28 = sld [smem:[#allocation6 + $0x13]] }
  0x3d   : > { %289 = vrot.lane.b32.xlu2 %v285_v10, %s3043_s18  ;;  %v286_v21 = vsel %vm270_vm0, %v284_v15, %v285_v10  ;;  %v346_v24 = vmul.f32 %v344_v16, %v3170_v5  ;;  %v349_v28 = vrot.slane %v345_v23, 2  ;;  %v367_v33 = vstv %s2679_s21  ;;  %s2691_s29 = sld [smem:[#allocation6 + $0x16]] }
  0x3e   : > { %v303_v25 = vsel %vm270_vm0, %v301_v19, %v302_v18  ;;  %v332_v26 = vrot.slane %v328_v20, 2  ;;  %v333_v27 = vrot.slane %v329_v22, 2  ;;  %v408_v35 = vstv %s2682_s24  ;;  %s2689_s4 = sld [smem:[#allocation6 + $0x14]] }
  0x3f   : > { %v350_v29 = vrot.slane %v346_v24, 2  ;;  %v369_v36 = vmul.f32 %v3198_v32, %v367_v33  ;;  %v368_v37 = vmul.f32 %v3201_v34, %v367_v33  ;;  %v409_v38 = vmul.f32 %v3201_v34, %v408_v35  ;;  %s2692_s5 = sld [smem:[#allocation6 + $0x17]] }
  0x40   : > { %v334_v30 = vsel %vm318_vm1, %v332_v26, %v333_v27  ;;  %v410_v39 = vmul.f32 %v3198_v32, %v408_v35  ;;  %v381_v40 = vstv %s2680_s25  ;;  %v425_v44 = vstv %s2683_s26  ;;  %s2694_s6 = sld [smem:[#allocation6 + $0x19]] }
  0x41   : > { %258 = vrot.lane.b32.xlu1 %v253_v11, %s3042_s11  ;;  %v351_v31 = vsel %vm318_vm1, %v349_v28, %v350_v29  ;;  %v413_v41 = vrot.slane %v409_v38, 1  ;;  %v382_v43 = vmul.f32 %v3201_v34, %v381_v40  ;;  %v383_v46 = vmul.f32 %v3198_v32, %v381_v40  ;;  %s2695_s7 = sld [smem:[#allocation6 + $0x1a]] }
  0x42   : > { %244 = vrot.lane.b32.xlu0 %v239_v12, %s3043_s18  ;;  %v414_v42 = vrot.slane %v410_v39, 1  ;;  %v426_v47 = vmul.f32 %v3201_v34, %v425_v44  ;;  %v427_v48 = vmul.f32 %v3198_v32, %v425_v44  ;;  %v455_v49 = vstv %s2685_s15  ;;  %s2698_s8 = sld [smem:[#allocation6 + $0x1c]] }
  0x43   : > { %v472_v52 = vstv %s2686_s27  ;;  %v456_v53 = vmul.f32 %v3201_v34, %v455_v49  ;;  %v457_v54 = vmul.f32 %v3198_v32, %v455_v49  ;;  %v495_v2 = vstv %s2688_s28  ;;  %s2701_s23 = sld [smem:[#allocation6 + $0x1f]] }
  0x44   : > { %v415_v45 = vsel %vm270_vm0, %v413_v41, %v414_v42  ;;  %v431_v50 = vrot.slane %v427_v48, 1  ;;  %v430_v51 = vrot.slane %v426_v47, 1  ;;  %v473_v55 = vmul.f32 %v3201_v34, %v472_v52  ;;  %s2699_s30 = sld [smem:[#allocation6 + $0x1d]] }
  0x45   : > { %287 = vrot.lane.b32.xlu2 %v286_v21, %s3043_s18  ;;  %v474_v56 = vmul.f32 %v3198_v32, %v472_v52  ;;  %v460_v58 = vrot.slane %v456_v53, 2  ;;  %v461_v59 = vrot.slane %v457_v54, 2  ;;  %v536_v4 = vstv %s2691_s29  ;;  %s2702_s10 = sld [smem:[#allocation6 + $0x20]] }
  0x46   : > { %v432_v57 = vsel %vm270_vm0, %v430_v51, %v431_v50  ;;  %v477_v60 = vrot.slane %v473_v55, 2  ;;  %v497_v6 = vmul.f32 %v3232_v1, %v495_v2  ;;  %v496_v7 = vmul.f32 %v3235_v3, %v495_v2  ;;  %s2704_s22 = sld [smem:[#allocation6 + $0x22]] }
  0x47   : > { %v478_v61 = vrot.slane %v474_v56, 2  ;;  %v462_v62 = vsel %vm318_vm1, %v460_v58, %v461_v59  ;;  %v537_v8 = vmul.f32 %v3235_v3, %v536_v4  ;;  %v538_v9 = vmul.f32 %v3232_v1, %v536_v4  ;;  %s2705_s12 = sld [smem:[#allocation6 + $0x23]] }
  0x48   : > { %v509_v10 = vstv %s2689_s4  ;;  %v553_v14 = vstv %s2692_s5  ;;  %v583_v19 = vstv %s2694_s6  ;;  %v600_v22 = vstv %s2695_s7  ;;  %s230_s19 = sld [smem:[#allocation6]] }
  0x49   : > { %306 = vrot.lane.b32.xlu1 %v302_v18, %s3042_s11  ;;  %v479_v63 = vsel %vm318_vm1, %v477_v60, %v478_v61  ;;  %v541_v11 = vrot.slane %v537_v8, 1  ;;  %v542_v12 = vrot.slane %v538_v9, 1  ;;  %v510_v13 = vmul.f32 %v3235_v3, %v509_v10  ;;  %s228_s21 = sld [smem:[#allocation7]] }
  0x4a   : > { %304 = vrot.lane.b32.xlu0 %v303_v25, %s3042_s11  ;;  %v511_v16 = vmul.f32 %v3232_v1, %v509_v10  ;;  %v554_v17 = vmul.f32 %v3235_v3, %v553_v14  ;;  %v555_v18 = vmul.f32 %v3232_v1, %v553_v14  ;;  %v584_v23 = vmul.f32 %v3235_v3, %v583_v19  ;;  %s2672_s24 = sld [smem:[#allocation6 + $0x3]] }
  0x4b   : > { %v543_v15 = vsel %vm270_vm0, %v541_v11, %v542_v12  ;;  %v585_v24 = vmul.f32 %v3232_v1, %v583_v19  ;;  %v601_v25 = vmul.f32 %v3235_v3, %v600_v22  ;;  %v602_v26 = vmul.f32 %v3232_v1, %v600_v22  ;;  %s2707_s25 = sld [smem:[#allocation6 + $0x25]] }
  0x4c   : > { %v559_v20 = vrot.slane %v555_v18, 1  ;;  %v558_v21 = vrot.slane %v554_v17, 1  ;;  %v588_v28 = vrot.slane %v584_v23, 2  ;;  %v687_v47 = vstv %s2702_s10  ;;  %s2710_s26 = sld [smem:[#allocation6 + $0x28]] }
  0x4d   : > { %335 = vrot.lane.b32.xlu2 %v334_v30, %s3043_s18  ;;  %v605_v30 = vrot.slane %v601_v25, 2  ;;  %v689_v51 = vmul.f32 %v687_v47, %v3170_v5  ;;  %v717_v53 = vstv %s2704_s22  ;;  %v734_v56 = vstv %s2705_s12  ;;  %s3302_s15 = sld [smem:[#allocation6 + $0x26]] }
  0x4e   : > { %v719_v58 = vmul.f32 %v717_v53, %v3170_v5  ;;  %v736_v60 = vmul.f32 %v734_v56, %v3170_v5  ;;  %v231_v9 = vstv %s230_s19  ;;  %s3305_s27 = sld [smem:[#allocation6 + $0x6]] }
  0x4f   : > { %v693_v54 = vrot.slane %v689_v51, 1  ;;  %v229_v14 = vstv %s228_s21  ;;  %s3307_s28 = sld [smem:[#allocation6 + $0x29]] }
  0x50   : > { %v723_v2 = vrot.slane %v719_v58, 2  ;;  %s3322_s29 = sld [smem:[#allocation6 + $0x2b]] }
  0x51   : > { %352 = vrot.lane.b32.xlu1 %v351_v31, %s3042_s11  ;;  %v606_v31 = vrot.slane %v602_v26, 2  ;;  %v757_v17 = vstv %s2707_s25  ;;  %s3326_s4 = sld [smem:[#allocation6 + $0x2c]] }
  0x52   : > { %337 = vrot.lane.b32.xlu0 %v333_v27, %s3043_s18  ;;  %v560_v27 = vsel %vm270_vm0, %v558_v21, %v559_v20  ;;  %v798_v21 = vstv %s2710_s26  ;;  %v759_v25 = vmul.f32 %v3198_v32, %v757_v17  ;;  %v758_v26 = vmul.f32 %v3201_v34, %v757_v17  ;;  %s3345_s5 = sld [smem:[#allocation6 + $0x9]] }
  0x53   : > { %v607_v35 = vsel %vm318_vm1, %v605_v30, %v606_v31  ;;  %s3348_s6 = sld [smem:[#allocation6 + $0xc]] }
  0x54   : > { %s3359_s7 = sld [smem:[#allocation6 + $0x2e]] }
  0x55   : > { %354 = vrot.lane.b32.xlu2 %v350_v29, %s3042_s11  ;;  %v589_v29 = vrot.slane %v585_v24, 2  ;;  %s3384_s10 = sld [smem:[#allocation6 + $0x32]] }
  0x56   : > { %s3401_s22 = sld [smem:[#allocation6 + $0x34]] }
  0x57   : > { %v590_v33 = vsel %vm318_vm1, %v588_v28, %v589_v29  ;;  %v800_v28 = vmul.f32 %v3198_v32, %v798_v21  ;;  %s3405_s12 = sld [smem:[#allocation6 + $0x35]] }
  0x58   : > { %s3412_s19 = sld [smem:[#allocation6 + $0x12]] }
  0x59   : > { %374 = vrot.lane.b32.xlu1 %v369_v36, %s3043_s18  ;;  %v629_v36 = vstv %s2698_s8  ;;  %s3361_s8 = sld [smem:[#allocation6 + $0x31]] }
  0x5a   : > { %372 = vrot.lane.b32.xlu0 %v368_v37, %s3043_s18  ;;  %v670_v37 = vstv %s2701_s23  ;;  %v631_v38 = vmul.f32 %v629_v36, %v3170_v5  ;;  %v630_v39 = vmul.f32 %v629_v36, %v3165_v0  ;;  %v771_v36 = vstv %s3302_s15  ;;  %s3368_s23 = sld [smem:[#allocation6 + $0xf]] }
  0x5b   : > { %v671_v40 = vmul.f32 %v670_v37, %v3165_v0  ;;  %v672_v41 = vmul.f32 %v670_v37, %v3170_v5  ;;  %v313_v37 = vstv %s3305_s27  ;;  %v773_v51 = vmul.f32 %v3198_v32, %v771_v36  ;;  %s3423_s21 = sld [smem:[#allocation6 + $0x15]] }
  0x5c   : > { %s3438_s25 = sld [smem:[#allocation6 + $0x37]] }
  0x5d   : > { %386 = vrot.lane.b32.xlu2 %v382_v43, %s3042_s11  ;;  %v643_v43 = vstv %s2699_s30  ;;  %v675_v44 = vrot.slane %v671_v40, 1  ;;  %v772_v40 = vmul.f32 %v3201_v34, %v771_v36  ;;  %s3379_s30 = sld [smem:[#allocation6 + $0x2f]] }
  0x5e   : > { %v645_v49 = vmul.f32 %v643_v43, %v3170_v5  ;;  %s3442_s26 = sld [smem:[#allocation6 + $0x3a]] }
  0x5f   : > { %s3455_s15 = sld [smem:[#allocation6 + $0x38]] }
  0x60   : > { %s3460_s27 = sld [smem:[#allocation6 + $0x3b]] }
  0x61   : > { %416 = vrot.lane.b32.xlu1 %v415_v45, %s3043_s18  ;;  %v676_v45 = vrot.slane %v672_v41, 1 }
  0x62   : > { %388 = vrot.lane.b32.xlu0 %v383_v46, %s3042_s11  ;;  %v644_v46 = vmul.f32 %v643_v43, %v3165_v0 }
  0x63   : > { %v677_v48 = vsel %vm270_vm0, %v675_v44, %v676_v45 }
  0x65   : > { %418 = vrot.lane.b32.xlu2 %v414_v42, %s3043_s18 }
  0x69   : > { %435 = vrot.lane.b32.xlu1 %v431_v50, %s3042_s11  ;;  %v688_v50 = vmul.f32 %v687_v47, %v3165_v0 }
  0x6a   : > { %433 = vrot.lane.b32.xlu0 %v432_v57, %s3042_s11  ;;  %v718_v57 = vmul.f32 %v717_v53, %v3165_v0 }
  0x6b   : > { %v692_v55 = vrot.slane %v688_v50, 1 }
  0x6d   : > { %463 = vrot.lane.b32.xlu2 %v462_v62, %s3043_s18  ;;  %v722_v62 = vrot.slane %v718_v57, 2 }
  0x6f   : > { %v724_v8 = vsel %vm318_vm1, %v722_v62, %v723_v2  ;;  %v845_v62 = vstv %s3322_s29  ;;  %s3484_s29 = sld [smem:[#allocation6 + $0x3e]] }
  0x71   : > { %480 = vrot.lane.b32.xlu1 %v479_v63, %s3042_s11 }
  0x72   : > { %465 = vrot.lane.b32.xlu0 %v461_v59, %s3043_s18  ;;  %v735_v59 = vmul.f32 %v734_v56, %v3165_v0 }
  0x74   : > { %v739_v4 = vrot.slane %v735_v59, 2 }
  0x75   : > { %482 = vrot.lane.b32.xlu2 %v478_v61, %s3042_s11  ;;  %v694_v61 = vsel %vm270_vm0, %v692_v55, %v693_v54 }
  0x79   : > { %502 = vrot.lane.b32.xlu1 %v497_v6, %s3043_s18  ;;  %v740_v6 = vrot.slane %v736_v60, 2 }
  0x7a   : > { %500 = vrot.lane.b32.xlu0 %v496_v7, %s3043_s18 }
  0x7b   : > { %v741_v11 = vsel %vm318_vm1, %v739_v4, %v740_v6 }
  0x7d   : > { %514 = vrot.lane.b32.xlu2 %v510_v13, %s3042_s11  ;;  %v233_v13 = vmul.f32 %v231_v9, %v3170_v5 }
  0x81   : > { %544 = vrot.lane.b32.xlu1 %v543_v15, %s3043_s18 }
  0x82   : > { %516 = vrot.lane.b32.xlu0 %v511_v16, %s3042_s11  ;;  %v265_v16 = vstv %s2672_s24  ;;  %s3435_s24 = sld [smem:[#allocation6 + $0x18]] }
  0x83   : > { %v267_v22 = vmul.f32 %v265_v16, %v3170_v5  ;;  %v266_v23 = vmul.f32 %v265_v16, %v3165_v0 }
  0x85   : > { %546 = vrot.lane.b32.xlu2 %v542_v12, %s3043_s18  ;;  %v232_v12 = vmul.f32 %v231_v9, %v3165_v0 }
  0x87   : > { %v234_v18 = vadd.f32 %v232_v12, %v229_v14 }
  0x89   : > { %563 = vrot.lane.b32.xlu1 %v559_v20, %s3042_s11  ;;  %v235_v20 = vadd.f32 %v233_v13, %v229_v14 }
  0x8a   : > { %561 = vrot.lane.b32.xlu0 %v560_v27, %s3042_s11  ;;  %v799_v27 = vmul.f32 %v3201_v34, %v798_v21 }
  0x8d   : > { %591 = vrot.lane.b32.xlu2 %v590_v33, %s3043_s18  ;;  %v271_v33 = vrot.slane %v266_v23, 1 }
  0x91   : > { %608 = vrot.lane.b32.xlu1 %v607_v35, %s3042_s11 }
  0x92   : > { %593 = vrot.lane.b32.xlu0 %v589_v29, %s3043_s18 }
  0x95   : > { %610 = vrot.lane.b32.xlu2 %v606_v31, %s3042_s11  ;;  %v272_v31 = vrot.slane %v267_v22, 1 }
  0x97   : > { %v3270_v42 = vpop.permute.xlu2 %289 }
  0x99   : > { %636 = vrot.lane.b32.xlu1 %v631_v38, %s3043_s18  ;;  %v803_v38 = vrot.slane %v799_v27, 1 }
  0x9a   : > { %634 = vrot.lane.b32.xlu0 %v630_v39, %s3043_s18  ;;  %v804_v39 = vrot.slane %v800_v28, 1 }
  0x9c   : > { %v805_v50 = vsel %vm270_vm0, %v803_v38, %v804_v39 }
  0x9d   : > { %648 = vrot.lane.b32.xlu2 %v644_v46, %s3042_s11  ;;  %v273_v46 = vsel %vm270_vm0, %v271_v33, %v272_v31 }
  0x9f   : > { %v3280_v52 = vpop.permute.xlu2 %287 }
  0xa1   : > { %678 = vrot.lane.b32.xlu1 %v677_v48, %s3043_s18  ;;  %v314_v48 = vmul.f32 %v313_v37, %v3165_v0 }
  0xa2   : > { %650 = vrot.lane.b32.xlu0 %v645_v49, %s3042_s11  ;;  %v315_v49 = vmul.f32 %v313_v37, %v3170_v5 }
  0xa3   : > { %v319_v58 = vrot.slane %v314_v48, 2 }
  0xa4   : > { %v320_v59 = vrot.slane %v315_v49, 2 }
  0xa5   : > { %680 = vrot.lane.b32.xlu2 %v676_v45, %s3043_s18  ;;  %v815_v45 = vstv %s3307_s28  ;;  %s3480_s28 = sld [smem:[#allocation6 + $0x3d]] }
  0xa6   : > { %v816_v53 = vmul.f32 %v3201_v34, %v815_v45  ;;  %v321_v12 = vsel %vm318_vm1, %v319_v58, %v320_v59 }
  0xa7   : > { %v3290_v63 = vpop.permute.xlu2 %335 }
  0xa9   : > { %697 = vrot.lane.b32.xlu1 %v693_v54, %s3042_s11  ;;  %v817_v54 = vmul.f32 %v3198_v32, %v815_v45 }
  0xaa   : > { %695 = vrot.lane.b32.xlu0 %v694_v61, %s3042_s11  ;;  %v820_v61 = vrot.slane %v816_v53, 1 }
  0xab   : > { %v257_v7 = vpop.permute.xlu1 %256  ;;  %v821_v60 = vrot.slane %v817_v54, 1 }
  0xac   : > { %v243_v10 = vpop.permute.xlu0 %242 }
  0xad   : > { %725 = vrot.lane.b32.xlu2 %v724_v8, %s3043_s18  ;;  %v248_v29 = vadd.f32 %v243_v10, %v234_v18  ;;  %v846_v8 = vmul.f32 %v3201_v34, %v845_v62  ;;  %v822_v14 = vsel %vm270_vm0, %v820_v61, %v821_v60 }
  0xaf   : > { %v3299_v15 = vpop.permute.xlu2 %354  ;;  %v262_v41 = vadd.f32 %v257_v7, %v248_v29  ;;  %v862_v7 = vstv %s3326_s4  ;;  %v850_v16 = vrot.slane %v846_v8, 2  ;;  %v395_v29 = vstv %s3348_s6  ;;  %s2851_s4 = smul.u32 96, %s4433_s16  ;;  %s3510_s16 = sld [smem:[#allocation6 + $0x1b]] }
  0xb0   : > { %v863_v13 = vmul.f32 %v3201_v34, %v862_v7  ;;  %v396_v36 = vmul.f32 %v3201_v34, %v395_v29  ;;  %v397_v37 = vmul.f32 %v3198_v32, %v395_v29  ;;  %s3659_s6 = sld [smem:[#allocation6 + $0x50]] }
  0xb1   : > { %742 = vrot.lane.b32.xlu1 %v741_v11, %s3042_s11  ;;  %v276_v55 = vadd.f32 %v273_v46, %v262_v41  ;;  %v847_v11 = vmul.f32 %v3198_v32, %v845_v62  ;;  %v899_v62 = vstv %s3379_s30  ;;  %s2737_s30 = sld [smem:[#allocation6 + $0x40]] }
  0xb2   : > { %727 = vrot.lane.b32.xlu0 %v723_v2, %s3043_s18  ;;  %v400_v45 = vrot.slane %v396_v36, 1  ;;  %v401_v46 = vrot.slane %v397_v37, 1 }
  0xb3   : > { %v259_v19 = vpop.permute.xlu1 %258  ;;  %v293_v2 = vadd.f32 %v3280_v52, %v276_v55  ;;  %v864_v52 = vmul.f32 %v3198_v32, %v862_v7  ;;  %v900_v7 = vmul.f32 %v3235_v3, %v899_v62 }
  0xb4   : > { %v245_v24 = vpop.permute.xlu0 %244 }
  0xb5   : > { %744 = vrot.lane.b32.xlu2 %v740_v6, %s3042_s11  ;;  %v249_v30 = vadd.f32 %v245_v24, %v235_v20  ;;  %v867_v20 = vrot.slane %v863_v13, 2  ;;  %v868_v21 = vrot.slane %v864_v52, 2 }
  0xb7   : > { %v3316_v35 = vpop.permute.xlu2 %386  ;;  %v263_v43 = vadd.f32 %v259_v19, %v249_v30  ;;  %v851_v19 = vrot.slane %v847_v11, 2  ;;  %v869_v30 = vsel %vm318_vm1, %v867_v20, %v868_v21 }
  0xb9   : > { %764 = vrot.lane.b32.xlu1 %v759_v25, %s3043_s18  ;;  %v277_v56 = vadd.f32 %v272_v31, %v263_v43  ;;  %v852_v24 = vsel %vm318_vm1, %v850_v16, %v851_v19  ;;  %v361_v25 = vstv %s3345_s5  ;;  %s3655_s5 = sld [smem:[#allocation6 + $0x4f]] }
  0xba   : > { %762 = vrot.lane.b32.xlu0 %v758_v26, %s3043_s18  ;;  %v362_v33 = vmul.f32 %v3201_v34, %v361_v25 }
  0xbb   : > { %v307_v44 = vpop.permute.xlu1 %306  ;;  %v294_v4 = vadd.f32 %v3270_v42, %v277_v56  ;;  %v402_v56 = vsel %vm270_vm0, %v400_v45, %v401_v46 }
  0xbc   : > { %v305_v47 = vpop.permute.xlu0 %304 }
  0xbd   : > { %776 = vrot.lane.b32.xlu2 %v772_v40, %s3042_s11  ;;  %v310_v10 = vadd.f32 %v305_v47, %v293_v2  ;;  %v311_v42 = vadd.f32 %v307_v44, %v294_v4  ;;  %v885_v40 = vstv %s3359_s7  ;;  %v926_v44 = vstv %s3361_s8  ;;  %s3503_s7 = scalar_lea.vmem %s4423_s3, %s2851_s4  ;;  %s3517_s8 = sld [smem:[#allocation7 + $0x1]] }
  0xbe   : > { %v887_v49 = vmul.f32 %v3232_v1, %v885_v40  ;;  %v927_v53 = vmul.f32 %v3235_v3, %v926_v44  ;;  %v928_v54 = vmul.f32 %v3232_v1, %v926_v44  ;;  %s3632_s4 = sld [smem:[#allocation6 + $0x4d]] }
  0xbf   : > { %v3336_v57 = vpop.permute.xlu2 %418  ;;  %v324_v18 = vadd.f32 %v321_v12, %v310_v10  ;;  %v325_v22 = vadd.f32 %v320_v59, %v311_v42  ;;  %v901_v42 = vmul.f32 %v3232_v1, %v899_v62 }
  0xc0   : > { %v931_v4 = vrot.slane %v927_v53, 1 }
  0xc1   : > { %806 = vrot.lane.b32.xlu1 %v805_v50, %s3043_s18  ;;  %v341_v27 = vadd.f32 %v3290_v63, %v324_v18  ;;  %v886_v50 = vmul.f32 %v3235_v3, %v885_v40  ;;  %v489_v40 = vstv %s3412_s19  ;;  %s3543_s19 = sld [smem:[#allocation6 + $0x44]] }
  0xc2   : > { %778 = vrot.lane.b32.xlu0 %v773_v51, %s3042_s11  ;;  %v442_v51 = vstv %s3368_s23  ;;  %s3524_s23 = sld [smem:[#allocation6 + $0x1e]] }
  0xc3   : > { %v353_v6 = vpop.permute.xlu1 %352  ;;  %v443_v61 = vmul.f32 %v3201_v34, %v442_v51  ;;  %v444_v2 = vmul.f32 %v3198_v32, %v442_v51 }
  0xc4   : > { %v338_v9 = vpop.permute.xlu0 %337  ;;  %v358_v31 = vadd.f32 %v353_v6, %v341_v27  ;;  %v932_v6 = vrot.slane %v928_v54, 1  ;;  %v491_v54 = vmul.f32 %v3232_v1, %v489_v40 }
  0xc5   : > { %808 = vrot.lane.b32.xlu2 %v804_v39, %s3043_s18  ;;  %v342_v28 = vadd.f32 %v338_v9, %v325_v22  ;;  %v363_v39 = vmul.f32 %v3198_v32, %v361_v25  ;;  %v943_v9 = vstv %s3384_s10  ;;  %v447_v12 = vrot.slane %v443_v61, 2  ;;  %s2740_s10 = sld [smem:[#allocation6 + $0x43]] }
  0xc6   : > { %v364_v41 = vadd.f32 %v362_v33, %v358_v31  ;;  %v448_v13 = vrot.slane %v444_v2, 2  ;;  %v933_v52 = vsel %vm270_vm0, %v931_v4, %v932_v6  ;;  %v944_v18 = vmul.f32 %v3235_v3, %v943_v9 }
  0xc7   : > { %v3355_v17 = vpop.permute.xlu2 %463  ;;  %v359_v63 = vadd.f32 %v3299_v15, %v342_v28  ;;  %v990_v28 = vstv %s3405_s12  ;;  %s3540_s12 = sld [smem:[#allocation6 + $0x21]] }
  0xc8   : > { %v449_v22 = vsel %vm318_vm1, %v447_v12, %v448_v13  ;;  %v948_v27 = vrot.slane %v944_v18, 1  ;;  %v991_v33 = vmul.f32 %v3235_v3, %v990_v28  ;;  %v992_v36 = vmul.f32 %v3232_v1, %v990_v28 }
  0xc9   : > { %825 = vrot.lane.b32.xlu1 %v821_v60, %s3042_s11  ;;  %v365_v15 = vadd.f32 %v363_v39, %v359_v63 }
  0xca   : > { %823 = vrot.lane.b32.xlu0 %v822_v14, %s3042_s11  ;;  %v945_v14 = vmul.f32 %v3232_v1, %v943_v9 }
  0xcb   : > { %v375_v23 = vpop.permute.xlu1 %374 }
  0xcc   : > { %v373_v26 = vpop.permute.xlu0 %372  ;;  %v379_v55 = vadd.f32 %v375_v23, %v365_v15  ;;  %v949_v23 = vrot.slane %v945_v14, 1 }
  0xcd   : > { %853 = vrot.lane.b32.xlu2 %v852_v24, %s3043_s18  ;;  %v378_v48 = vadd.f32 %v373_v26, %v364_v41  ;;  %v973_v24 = vstv %s3401_s22  ;;  %s3535_s22 = sld [smem:[#allocation6 + $0x41]] }
  0xce   : > { %v974_v29 = vmul.f32 %v3235_v3, %v973_v24  ;;  %v975_v31 = vmul.f32 %v3232_v1, %v973_v24  ;;  %v950_v63 = vsel %vm270_vm0, %v948_v27, %v949_v23 }
  0xcf   : > { %v3374_v38 = vpop.permute.xlu2 %482  ;;  %v392_v59 = vadd.f32 %v3316_v35, %v378_v48 }
  0xd0   : > { %v978_v39 = vrot.slane %v974_v29, 2  ;;  %v979_v45 = vrot.slane %v975_v31, 2  ;;  %v1076_v29 = vstv %s3460_s27  ;;  %s3609_s27 = sld [smem:[#allocation6 + $0x4c]] }
  0xd1   : > { %870 = vrot.lane.b32.xlu1 %v869_v30, %s3042_s11  ;;  %v405_v10 = vadd.f32 %v402_v56, %v392_v59 }
  0xd2   : > { %855 = vrot.lane.b32.xlu0 %v851_v19, %s3043_s18 }
  0xd3   : > { %v417_v43 = vpop.permute.xlu1 %416 }
  0xd4   : > { %v389_v47 = vpop.permute.xlu0 %388  ;;  %v422_v16 = vadd.f32 %v417_v43, %v405_v10 }
  0xd5   : > { %872 = vrot.lane.b32.xlu2 %v868_v21, %s3042_s11  ;;  %v393_v60 = vadd.f32 %v389_v47, %v379_v55  ;;  %v996_v47 = vrot.slane %v992_v36, 2 }
  0xd7   : > { %v3393_v58 = vpop.permute.xlu2 %514  ;;  %v406_v11 = vadd.f32 %v401_v46, %v393_v60  ;;  %v995_v46 = vrot.slane %v991_v33, 2 }
  0xd9   : > { %892 = vrot.lane.b32.xlu1 %v887_v49, %s3043_s18  ;;  %v423_v20 = vadd.f32 %v3336_v57, %v406_v11  ;;  %v490_v49 = vmul.f32 %v3235_v3, %v489_v40  ;;  %v997_v55 = vsel %vm318_vm1, %v995_v46, %v996_v47  ;;  %v1106_v46 = vstv %s3480_s28  ;;  %s3616_s28 = sld [smem:[#allocation6 + $0x2a]] }
  0xda   : > { %890 = vrot.lane.b32.xlu0 %v886_v50, %s3043_s18  ;;  %v523_v50 = vstv %s3423_s21  ;;  %s3564_s21 = sld [smem:[#allocation6 + $0x46]] }
  0xdb   : > { %v436_v8 = vpop.permute.xlu1 %435  ;;  %v524_v56 = vmul.f32 %v3235_v3, %v523_v50  ;;  %v525_v59 = vmul.f32 %v3232_v1, %v523_v50  ;;  %v1107_v50 = vmul.f32 %v1106_v46, %v3165_v0 }
  0xdc   : > { %v434_v35 = vpop.permute.xlu0 %433  ;;  %v440_v25 = vadd.f32 %v436_v8, %v423_v20 }
  0xdd   : > { %904 = vrot.lane.b32.xlu2 %v900_v7, %s3042_s11  ;;  %v439_v21 = vadd.f32 %v434_v35, %v422_v16  ;;  %v528_v4 = vrot.slane %v524_v56, 1  ;;  %v1018_v7 = vstv %s3438_s25  ;;  %v1059_v35 = vstv %s3442_s26  ;;  %s3589_s25 = sld [smem:[#allocation6 + $0x24]] }
  0xde   : > { %v453_v37 = vadd.f32 %v448_v13, %v440_v25  ;;  %v1019_v16 = vmul.f32 %v1018_v7, %v3165_v0  ;;  %v1060_v18 = vmul.f32 %v1059_v35, %v3165_v0  ;;  %v1061_v20 = vmul.f32 %v1059_v35, %v3170_v5  ;;  %s3596_s26 = sld [smem:[#allocation6 + $0x27]] }
  0xdf   : > { %v3414_v19 = vpop.permute.xlu2 %546  ;;  %v452_v57 = vadd.f32 %v449_v22, %v439_v21 }
  0xe0   : > { %v1064_v24 = vrot.slane %v1060_v18, 1  ;;  %v1065_v25 = vrot.slane %v1061_v20, 1  ;;  %v3546_v18 = vld [vmem:[%s3150_s9] sm:$0xff] }
  0xe1   : > { %934 = vrot.lane.b32.xlu1 %v933_v52, %s3043_s18  ;;  %v469_v43 = vadd.f32 %v3355_v17, %v452_v57  ;;  %v980_v17 = vsel %vm318_vm1, %v978_v39, %v979_v45 }
  0xe2   : > { %906 = vrot.lane.b32.xlu0 %v901_v42, %s3042_s11  ;;  %v1020_v42 = vmul.f32 %v1018_v7, %v3170_v5  ;;  %v1066_v36 = vsel %vm270_vm0, %v1064_v24, %v1065_v25 }
  0xe3   : > { %v481_v26 = vpop.permute.xlu1 %480 }
  0xe4   : > { %v466_v30 = vpop.permute.xlu0 %465  ;;  %v486_v15 = vadd.f32 %v481_v26, %v469_v43  ;;  %v1077_v43 = vmul.f32 %v1076_v29, %v3165_v0 }
  0xe5   : > { %936 = vrot.lane.b32.xlu2 %v932_v6, %s3043_s18  ;;  %v470_v44 = vadd.f32 %v466_v30, %v453_v37  ;;  %v529_v6 = vrot.slane %v525_v59, 1 }
  0xe6   : > { %v492_v60 = vadd.f32 %v490_v49, %v486_v15  ;;  %v1123_v49 = vstv %s3484_s29  ;;  %s3627_s29 = sld [smem:[#allocation6 + $0x4a]] }
  0xe7   : > { %v3431_v41 = vpop.permute.xlu2 %591  ;;  %v487_v53 = vadd.f32 %v3374_v38, %v470_v44  ;;  %v570_v38 = vstv %s3435_s24  ;;  %v530_v14 = vsel %vm270_vm0, %v528_v4, %v529_v6  ;;  %s3568_s24 = sld [smem:[#allocation6 + $0x47]] }
  0xe8   : > { %v571_v11 = vmul.f32 %v3235_v3, %v570_v38  ;;  %v572_v12 = vmul.f32 %v3232_v1, %v570_v38 }
  0xe9   : > { %953 = vrot.lane.b32.xlu1 %v949_v23, %s3042_s11  ;;  %v493_v62 = vadd.f32 %v491_v54, %v487_v53  ;;  %v1032_v23 = vstv %s3455_s15  ;;  %v1108_v53 = vmul.f32 %v1106_v46, %v3170_v5  ;;  %v1124_v54 = vmul.f32 %v1123_v49, %v3165_v0  ;;  %s3607_s15 = sld [smem:[#allocation6 + $0x49]] }
  0xea   : > { %951 = vrot.lane.b32.xlu0 %v950_v63, %s3042_s11  ;;  %v575_v1 = vrot.slane %v571_v11, 2  ;;  %v576_v3 = vrot.slane %v572_v12, 2  ;;  %v1033_v26 = vmul.f32 %v1032_v23, %v3165_v0  ;;  %v1034_v37 = vmul.f32 %v1032_v23, %v3170_v5 }
  0xeb   : > { %v503_v48 = vpop.permute.xlu1 %502  ;;  %v1078_v63 = vmul.f32 %v1076_v29, %v3170_v5  ;;  %v1128_v38 = vrot.slane %v1124_v54, 2  ;;  %v621_v11 = vstv %s3517_s8  ;;  %v657_v12 = vstv %s3524_s23  ;;  %s3677_s8 = sld [smem:[#allocation6 + $0x30]] }
  0xec   : > { %v501_v51 = vpop.permute.xlu0 %500  ;;  %v507_v8 = vadd.f32 %v503_v48, %v493_v62  ;;  %v577_v57 = vsel %vm318_vm1, %v575_v1, %v576_v3  ;;  %v1081_v48 = vrot.slane %v1077_v43, 1  ;;  %v658_v20 = vmul.f32 %v3546_v18, %v657_v12  ;;  %v3550_v1 = vld [vmem:[%s3150_s9 + $0x8] sm:$0xff]  ;;  %s3689_s23 = sld [smem:[#allocation6 + $0x33]] }
  0xed   : > { %981 = vrot.lane.b32.xlu2 %v980_v17, %s3043_s18  ;;  %v506_v2 = vadd.f32 %v501_v51, %v492_v60  ;;  %v1111_v60 = vrot.slane %v1107_v50, 2  ;;  %v1160_v29 = vstv %s3535_s22  ;;  %v1234_v54 = vstv %s3564_s21  ;;  %s3709_s22 = sld [smem:[#allocation6 + $0x53]] }
  0xee   : > { %s2765_s21 = sld [smem:[#allocation6 + $0x59]] }
  0xef   : > { %v3451_v61 = vpop.permute.xlu2 %610  ;;  %v520_v13 = vadd.f32 %v3393_v58, %v506_v2  ;;  %v1112_v2 = vrot.slane %v1108_v53, 2 }
  0xf1   : > { %998 = vrot.lane.b32.xlu1 %v997_v55, %s3042_s11  ;;  %v533_v58 = vadd.f32 %v530_v14, %v520_v13  ;;  %v1125_v55 = vmul.f32 %v1123_v49, %v3170_v5  ;;  %v1146_v13 = vstv %s2737_s30  ;;  %v1187_v14 = vstv %s2740_s10  ;;  %s3692_s30 = sld [smem:[#allocation6 + $0x52]] }
  0xf2   : > { %983 = vrot.lane.b32.xlu0 %v979_v45, %s3043_s18  ;;  %v1082_v45 = vrot.slane %v1078_v63, 1  ;;  %v1189_v23 = vmul.f32 %v3198_v32, %v1187_v14  ;;  %v1204_v63 = vstv %s3543_s19  ;;  %s3696_s10 = sld [smem:[#allocation6 + $0x55]] }
  0xf3   : > { %v545_v9 = vpop.permute.xlu1 %544  ;;  %s3730_s19 = sld [smem:[#allocation6 + $0x58]] }
  0xf4   : > { %v517_v10 = vpop.permute.xlu0 %516  ;;  %v550_v27 = vadd.f32 %v545_v9, %v533_v58  ;;  %v1083_v59 = vsel %vm270_vm0, %v1081_v48, %v1082_v45  ;;  %v1148_v58 = vmul.f32 %v3198_v32, %v1146_v13  ;;  %v1206_v48 = vmul.f32 %v3198_v32, %v1204_v63 }
  0xf5   : > { %v521_v52 = vadd.f32 %v517_v10, %v507_v8  ;;  %1000 = vrot.lane.b32.xlu2 %v996_v47, %s3042_s11  ;;  %v623_v8 = vstv %s3510_s16  ;;  %s3666_s16 = sld [smem:[#allocation6 + $0x2d]] }
  0xf6   : > { %v624_v10 = vmul.f32 %v623_v8, %v3165_v0  ;;  %v1210_v53 = vrot.slane %v1206_v48, 1 }
  0xf7   : > { %v3472_v21 = vpop.permute.xlu2 %648  ;;  %v534_v22 = vadd.f32 %v529_v6, %v521_v52  ;;  %v1113_v6 = vsel %vm318_vm1, %v1111_v60, %v1112_v2  ;;  %v625_v52 = vmul.f32 %v623_v8, %v3170_v5  ;;  %v1147_v5 = vmul.f32 %v3201_v34, %v1146_v13  ;;  %v3586_v60 = vld [vmem:[%s3150_s9 + $0x10] sm:$0xff] }
  0xf8   : > { %v626_v0 = vadd.f32 %v624_v10, %v621_v11 }
  0xf9   : > { %1025 = vrot.lane.b32.xlu1 %v1020_v42, %s3043_s18  ;;  %v551_v31 = vadd.f32 %v3414_v19, %v534_v22  ;;  %v1188_v22 = vmul.f32 %v3201_v34, %v1187_v14  ;;  %v627_v24 = vadd.f32 %v625_v52, %v621_v11 }
  0xfa   : > { %1023 = vrot.lane.b32.xlu0 %v1019_v16, %s3043_s18 }
  0xfb   : > { %v564_v28 = vpop.permute.xlu1 %563 }
  0xfc   : > { %v562_v30 = vpop.permute.xlu0 %561  ;;  %v568_v39 = vadd.f32 %v564_v28, %v551_v31  ;;  %v1193_v31 = vrot.slane %v1189_v23, 1  ;;  %v785_v23 = vstv %s3596_s26  ;;  %s2730_s26 = sld [smem:[#allocation6 + $0x39]] }
  0xfd   : > { %v567_v33 = vadd.f32 %v562_v30, %v550_v27  ;;  %1037 = vrot.lane.b32.xlu2 %v1033_v26, %s3042_s11  ;;  %v662_v27 = vrot.slane %v658_v20, 1  ;;  %v704_v30 = vstv %s3540_s12  ;;  %s3714_s12 = sld [smem:[#allocation6 + $0x56]] }
  0xfe   : > { %v581_v15 = vadd.f32 %v576_v3, %v568_v39  ;;  %v659_v3 = vmul.f32 %v3550_v1, %v657_v12  ;;  %v706_v46 = vmul.f32 %v3550_v1, %v704_v30 }
  0xff   : > { %v580_v40 = vadd.f32 %v577_v57, %v567_v33  ;;  %v3494_v44 = vpop.permute.xlu2 %680  ;;  %v1192_v57 = vrot.slane %v1188_v22, 1  ;;  %v1161_v33 = vmul.f32 %v3201_v34, %v1160_v29 }
 0x100   : > { %v663_v28 = vrot.slane %v659_v3, 1  ;;  %v751_v3 = vstv %s3589_s25  ;;  %s3758_s25 = sld [smem:[#allocation7 + $0x2]] }
 0x101   : > { %1067 = vrot.lane.b32.xlu1 %v1066_v36, %s3043_s18  ;;  %v597_v19 = vadd.f32 %v3431_v41, %v580_v40 }
 0x102   : > { %1039 = vrot.lane.b32.xlu0 %v1034_v37, %s3042_s11  ;;  %v664_v43 = vsel %vm270_vm0, %v662_v27, %v663_v28  ;;  %v752_v27 = vmul.f32 %v3586_v60, %v751_v3 }
 0x103   : > { %v609_v47 = vpop.permute.xlu1 %608 }
 0x104   : > { %v614_v17 = vadd.f32 %v609_v47, %v597_v19  ;;  %v594_v41 = vpop.permute.xlu0 %593  ;;  %v1194_v47 = vsel %vm270_vm0, %v1192_v57, %v1193_v31 }
 0x105   : > { %v598_v51 = vadd.f32 %v594_v41, %v581_v15  ;;  %1069 = vrot.lane.b32.xlu2 %v1065_v25, %s3043_s18  ;;  %v1162_v15 = vmul.f32 %v3198_v32, %v1160_v29 }
 0x106   : > { %617 = vst.msk [vmem:[%s3503_s7] sm:$0xff] %vm616_vm2, %v614_v17 }
 0x107   : > { %v615_v56 = vadd.f32 %v3451_v61, %v598_v51  ;;  %v3519_v62 = vpop.permute.xlu2 %725  ;;  %v1129_v61 = vrot.slane %v1125_v55, 2  ;;  %v710_v51 = vrot.slane %v706_v46, 2  ;;  %v3639_v46 = vld [vmem:[%s3150_s9 + $0x20] sm:$0xff] }
 0x109   : > { %619 = vst.msk [vmem:[%s3503_s7 + $0x8] sm:$0x3f] %vm618_vm3, %v615_v56  ;;  %1086 = vrot.lane.b32.xlu1 %v1082_v45, %s3042_s11  ;;  %v1130_v9 = vsel %vm318_vm1, %v1128_v38, %v1129_v61  ;;  %v705_v45 = vmul.f32 %v3546_v18, %v704_v30 }
 0x10a   : > { %1084 = vrot.lane.b32.xlu0 %v1083_v59, %s3042_s11  ;;  %v1251_v59 = vstv %s3568_s24  ;;  %s3751_s24 = sld [smem:[#allocation6 + $0x36]] }
 0x10b   : > { %v637_v4 = vpop.permute.xlu1 %636  ;;  %v709_v41 = vrot.slane %v705_v45, 2  ;;  %v1252_v8 = vmul.f32 %v3586_v60, %v1251_v59 }
 0x10c   : > { %v635_v7 = vpop.permute.xlu0 %634  ;;  %v641_v36 = vadd.f32 %v637_v4, %v627_v24  ;;  %v3593_v4 = vld [vmem:[%s3150_s9 + $0x18] sm:$0xff] }
 0x10d   : > { %1114 = vrot.lane.b32.xlu2 %v1113_v6, %s3043_s18  ;;  %v640_v26 = vadd.f32 %v635_v7, %v626_v0  ;;  %v1236_v6 = vmul.f32 %v3593_v4, %v1234_v54  ;;  %v711_v7 = vsel %vm318_vm1, %v709_v41, %v710_v51  ;;  %v787_v29 = vmul.f32 %v3593_v4, %v785_v23 }
 0x10e   : > { %v753_v57 = vmul.f32 %v3593_v4, %v751_v3 }
 0x10f   : > { %v3531_v35 = vpop.permute.xlu2 %744  ;;  %v654_v40 = vadd.f32 %v3472_v21, %v640_v26  ;;  %v1205_v21 = vmul.f32 %v3201_v34, %v1204_v63  ;;  %v1235_v34 = vmul.f32 %v3586_v60, %v1234_v54  ;;  %v1240_v52 = vrot.slane %v1236_v6, 2 }
 0x111   : > { %1131 = vrot.lane.b32.xlu1 %v1130_v9, %s3042_s11  ;;  %v667_v50 = vadd.f32 %v664_v43, %v654_v40  ;;  %v1209_v56 = vrot.slane %v1205_v21, 1  ;;  %v1253_v9 = vmul.f32 %v3593_v4, %v1251_v59 }
 0x112   : > { %1116 = vrot.lane.b32.xlu0 %v1112_v2, %s3043_s18 }
 0x113   : > { %v679_v42 = vpop.permute.xlu1 %678  ;;  %v1211_v11 = vsel %vm270_vm0, %v1209_v56, %v1210_v53  ;;  %v1257_v14 = vrot.slane %v1253_v9, 2 }
 0x114   : > { %v651_v16 = vpop.permute.xlu0 %650  ;;  %v684_v55 = vadd.f32 %v679_v42, %v667_v50  ;;  %v1256_v42 = vrot.slane %v1252_v8, 2 }
 0x115   : > { %1133 = vrot.lane.b32.xlu2 %v1129_v61, %s3042_s11  ;;  %v655_v19 = vadd.f32 %v651_v16, %v641_v36 }
 0x116   : > { %v1258_v24 = vsel %vm318_vm1, %v1256_v42, %v1257_v14 }
 0x117   : > { %v3558_v25 = vpop.permute.xlu2 %776  ;;  %v668_v17 = vadd.f32 %v663_v28, %v655_v19  ;;  %v786_v28 = vmul.f32 %v3586_v60, %v785_v23  ;;  %v3635_v19 = vld [vmem:[%s3150_s9 + $0x28] sm:$0xff] }
 0x119   : > { %1153 = vrot.lane.b32.xlu1 %v1148_v58, %s3043_s18  ;;  %v685_v38 = vadd.f32 %v3494_v44, %v668_v17  ;;  %v1239_v44 = vrot.slane %v1235_v34, 2  ;;  %v790_v63 = vrot.slane %v786_v28, 1 }
 0x11a   : > { %1151 = vrot.lane.b32.xlu0 %v1147_v5, %s3043_s18 }
 0x11b   : > { %v698_v37 = vpop.permute.xlu1 %697  ;;  %v1241_v20 = vsel %vm318_vm1, %v1239_v44, %v1240_v52 }
 0x11c   : > { %v696_v39 = vpop.permute.xlu0 %695  ;;  %v702_v10 = vadd.f32 %v698_v37, %v685_v38  ;;  %v1315_v37 = vstv %s3609_s27  ;;  %v1332_v38 = vstv %s3632_s4  ;;  %s2770_s27 = sld [smem:[#allocation6 + $0x5e]] }
 0x11d   : > { %1165 = vrot.lane.b32.xlu2 %v1161_v33, %s3042_s11  ;;  %v701_v61 = vadd.f32 %v696_v39, %v684_v55  ;;  %v791_v39 = vrot.slane %v787_v29, 1  ;;  %v1316_v48 = vmul.f32 %v3639_v46, %v1315_v37  ;;  %v1317_v21 = vmul.f32 %v3635_v19, %v1315_v37  ;;  %s3781_s4 = sld [smem:[#allocation6 + $0x5f]] }
 0x11e   : > { %v715_v16 = vadd.f32 %v710_v51, %v702_v10  ;;  %v1288_v55 = vstv %s3627_s29  ;;  %s3778_s29 = sld [smem:[#allocation6 + $0x3c]] }
 0x11f   : > { %v3579_v49 = vpop.permute.xlu2 %808  ;;  %v714_v13 = vadd.f32 %v711_v7, %v701_v61  ;;  %v792_v17 = vsel %vm270_vm0, %v790_v63, %v791_v39  ;;  %v1320_v56 = vrot.slane %v1316_v48, 1  ;;  %v1321_v59 = vrot.slane %v1317_v21, 1 }
 0x120   : > { %v1289_v34 = vmul.f32 %v3639_v46, %v1288_v55  ;;  %v1290_v10 = vmul.f32 %v3635_v19, %v1288_v55 }
 0x121   : > { %1195 = vrot.lane.b32.xlu1 %v1194_v47, %s3043_s18  ;;  %v731_v5 = vadd.f32 %v3519_v62, %v714_v13  ;;  %v1322_v9 = vsel %vm270_vm0, %v1320_v56, %v1321_v59  ;;  %v1333_v13 = vmul.f32 %v3639_v46, %v1332_v38 }
 0x122   : > { %1167 = vrot.lane.b32.xlu0 %v1162_v15, %s3042_s11  ;;  %v832_v15 = vstv %s3616_s28  ;;  %s3774_s28 = sld [smem:[#allocation6 + $0x5c]] }
 0x123   : > { %v743_v32 = vpop.permute.xlu1 %742  ;;  %v833_v54 = vmul.f32 %v3586_v60, %v832_v15 }
 0x124   : > { %v728_v2 = vpop.permute.xlu0 %727  ;;  %v748_v26 = vadd.f32 %v743_v32, %v731_v5  ;;  %v834_v32 = vmul.f32 %v3593_v4, %v832_v15  ;;  %v1337_v5 = vrot.slane %v1333_v13, 1 }
 0x125   : > { %1197 = vrot.lane.b32.xlu2 %v1193_v31, %s3043_s18  ;;  %v732_v22 = vadd.f32 %v728_v2, %v715_v16  ;;  %v1274_v31 = vstv %s3607_s15  ;;  %v837_v7 = vrot.slane %v833_v54, 2  ;;  %s2767_s15 = sld [smem:[#allocation6 + $0x5b]] }
 0x126   : > { %v754_v33 = vadd.f32 %v752_v27, %v748_v26  ;;  %v1276_v45 = vmul.f32 %v3635_v19, %v1274_v31  ;;  %v1275_v47 = vmul.f32 %v3639_v46, %v1274_v31  ;;  %v838_v8 = vrot.slane %v834_v32, 2 }
 0x127   : > { %v3603_v12 = vpop.permute.xlu2 %853  ;;  %v749_v62 = vadd.f32 %v3531_v35, %v732_v22  ;;  %v1379_v22 = vstv %s3659_s6  ;;  %v879_v31 = vstv %s3666_s16  ;;  %s3800_s6 = sld [smem:[#allocation6 + $0x62]] }
 0x128   : > { %v839_v16 = vsel %vm318_vm1, %v837_v7, %v838_v8  ;;  %v1380_v27 = vmul.f32 %v3639_v46, %v1379_v22  ;;  %v1381_v28 = vmul.f32 %v3635_v19, %v1379_v22  ;;  %v881_v21 = vmul.f32 %v3635_v19, %v879_v31  ;;  %s3818_s16 = sld [smem:[#allocation6 + $0x3f]] }
 0x129   : > { %1214 = vrot.lane.b32.xlu1 %v1210_v53, %s3042_s11  ;;  %v755_v35 = vadd.f32 %v753_v57, %v749_v62 }
 0x12a   : > { %1212 = vrot.lane.b32.xlu0 %v1211_v11, %s3042_s11  ;;  %v1334_v11 = vmul.f32 %v3635_v19, %v1332_v38 }
 0x12b   : > { %v765_v0 = vpop.permute.xlu1 %764 }
 0x12c   : > { %v763_v58 = vpop.permute.xlu0 %762  ;;  %v769_v50 = vadd.f32 %v765_v0, %v755_v35  ;;  %v1338_v0 = vrot.slane %v1334_v11, 1 }
 0x12d   : > { %1242 = vrot.lane.b32.xlu2 %v1241_v20, %s3043_s18  ;;  %v768_v43 = vadd.f32 %v763_v58, %v754_v33  ;;  %v1362_v20 = vstv %s3655_s5  ;;  %s3796_s5 = sld [smem:[#allocation6 + $0x61]] }
 0x12e   : > { %v1363_v23 = vmul.f32 %v3639_v46, %v1362_v20  ;;  %v1364_v26 = vmul.f32 %v3635_v19, %v1362_v20  ;;  %v1339_v62 = vsel %vm270_vm0, %v1337_v5, %v1338_v0 }
 0x12f   : > { %v3622_v30 = vpop.permute.xlu2 %872  ;;  %v782_v51 = vadd.f32 %v3558_v25, %v768_v43 }
 0x130   : > { %v1367_v57 = vrot.slane %v1363_v23, 2  ;;  %v1368_v63 = vrot.slane %v1364_v26, 2 }
 0x131   : > { %1259 = vrot.lane.b32.xlu1 %v1258_v24, %s3042_s11  ;;  %v795_v61 = vadd.f32 %v792_v17, %v782_v51 }
 0x132   : > { %1244 = vrot.lane.b32.xlu0 %v1240_v52, %s3043_s18 }
 0x133   : > { %v807_v36 = vpop.permute.xlu1 %806 }
 0x134   : > { %v779_v40 = vpop.permute.xlu0 %778  ;;  %v812_v44 = vadd.f32 %v807_v36, %v795_v61 }
 0x135   : > { %1261 = vrot.lane.b32.xlu2 %v1257_v14, %s3042_s11  ;;  %v783_v53 = vadd.f32 %v779_v40, %v769_v50  ;;  %v1385_v40 = vrot.slane %v1381_v28, 2 }
 0x137   : > { %v3647_v41 = vpop.permute.xlu2 %904  ;;  %v796_v6 = vadd.f32 %v791_v39, %v783_v53  ;;  %v1384_v39 = vrot.slane %v1380_v27, 2 }
 0x139   : > { %1281 = vrot.lane.b32.xlu1 %v1276_v45, %s3043_s18  ;;  %v813_v42 = vadd.f32 %v3579_v49, %v796_v6  ;;  %v880_v45 = vmul.f32 %v3639_v46, %v879_v31  ;;  %v1386_v50 = vsel %vm318_vm1, %v1384_v39, %v1385_v40 }
 0x13a   : > { %1279 = vrot.lane.b32.xlu0 %v1275_v47, %s3043_s18  ;;  %v913_v47 = vstv %s3677_s8  ;;  %s3822_s8 = sld [smem:[#allocation6 + $0x42]] }
 0x13b   : > { %v826_v2 = vpop.permute.xlu1 %825  ;;  %v914_v17 = vmul.f32 %v3639_v46, %v913_v47  ;;  %v915_v51 = vmul.f32 %v3635_v19, %v913_v47 }
 0x13c   : > { %v824_v25 = vpop.permute.xlu0 %823  ;;  %v830_v3 = vadd.f32 %v826_v2, %v813_v42 }
 0x13d   : > { %1293 = vrot.lane.b32.xlu2 %v1289_v34, %s3042_s11  ;;  %v829_v14 = vadd.f32 %v824_v25, %v812_v44  ;;  %v918_v56 = vrot.slane %v914_v17, 1  ;;  %v1407_v34 = vstv %s3692_s30  ;;  %v1448_v25 = vstv %s3696_s10  ;;  %s3835_s30 = sld [smem:[#allocation6 + $0x67]] }
 0x13e   : > { %v843_v29 = vadd.f32 %v838_v8, %v830_v3  ;;  %v1408_v44 = vmul.f32 %v3546_v18, %v1407_v34  ;;  %v1449_v13 = vmul.f32 %v3546_v18, %v1448_v25  ;;  %v1450_v42 = vmul.f32 %v3550_v1, %v1448_v25  ;;  %s3842_s10 = sld [smem:[#allocation6 + $0x45]] }
 0x13f   : > { %v3668_v52 = vpop.permute.xlu2 %936  ;;  %v842_v49 = vadd.f32 %v839_v16, %v829_v14  ;;  %v1421_v3 = vstv %s3709_s22  ;;  %v1012_v25 = vstv %s3751_s24  ;;  %s3853_s22 = sld [smem:[#allocation6 + $0x65]] }
 0x140   : > { %v1454_v5 = vrot.slane %v1450_v42, 1  ;;  %v1422_v22 = vmul.f32 %v3546_v18, %v1421_v3  ;;  %s3886_s24 = sld [smem:[#allocation6 + $0x48]] }
 0x141   : > { %1323 = vrot.lane.b32.xlu1 %v1322_v9, %s3043_s18  ;;  %v859_v36 = vadd.f32 %v3603_v12, %v842_v49  ;;  %v1369_v12 = vsel %vm318_vm1, %v1367_v57, %v1368_v63  ;;  %v1465_v49 = vstv %s3714_s12  ;;  %v1423_v57 = vmul.f32 %v3550_v1, %v1421_v3  ;;  %s3858_s12 = sld [smem:[#allocation6 + $0x68]] }
 0x142   : > { %1295 = vrot.lane.b32.xlu0 %v1290_v10, %s3042_s11  ;;  %v1409_v10 = vmul.f32 %v3550_v1, %v1407_v34  ;;  %v1467_v31 = vmul.f32 %v3550_v1, %v1465_v49 }
 0x143   : > { %v871_v58 = vpop.permute.xlu1 %870 }
 0x144   : > { %v856_v24 = vpop.permute.xlu0 %855  ;;  %v876_v35 = vadd.f32 %v871_v58, %v859_v36  ;;  %v1453_v58 = vrot.slane %v1449_v13, 1  ;;  %v1576_v13 = vstv %s2770_s27  ;;  %s3916_s27 = sld [smem:[#allocation6 + $0x70]] }
 0x145   : > { %1325 = vrot.lane.b32.xlu2 %v1321_v59, %s3043_s18  ;;  %v860_v37 = vadd.f32 %v856_v24, %v843_v29  ;;  %v919_v59 = vrot.slane %v915_v51, 1 }
 0x146   : > { %v882_v53 = vadd.f32 %v880_v45, %v876_v35  ;;  %v1495_v35 = vstv %s3730_s19  ;;  %s3875_s19 = sld [smem:[#allocation6 + $0x6a]] }
 0x147   : > { %v3685_v33 = vpop.permute.xlu2 %981  ;;  %v877_v48 = vadd.f32 %v3622_v30, %v860_v37  ;;  %v960_v30 = vstv %s3689_s23  ;;  %v920_v11 = vsel %vm270_vm0, %v918_v56, %v919_v59  ;;  %v1497_v17 = vmul.f32 %v3550_v1, %v1495_v35  ;;  %s3833_s23 = sld [smem:[#allocation6 + $0x64]] }
 0x148   : > { %v961_v6 = vmul.f32 %v3639_v46, %v960_v30  ;;  %v962_v7 = vmul.f32 %v3635_v19, %v960_v30 }
 0x149   : > { %1342 = vrot.lane.b32.xlu1 %v1338_v0, %s3042_s11  ;;  %v883_v55 = vadd.f32 %v881_v21, %v877_v48  ;;  %v1501_v56 = vrot.slane %v1497_v17, 2 }
 0x14a   : > { %1340 = vrot.lane.b32.xlu0 %v1339_v62, %s3042_s11  ;;  %v965_v14 = vrot.slane %v961_v6, 2  ;;  %v966_v16 = vrot.slane %v962_v7, 2  ;;  %v1455_v62 = vsel %vm270_vm0, %v1453_v58, %v1454_v5  ;;  %v1013_v7 = vmul.f32 %v3546_v18, %v1012_v25 }
 0x14b   : > { %v893_v43 = vpop.permute.xlu1 %892  ;;  %v1577_v58 = vmul.f32 %v3586_v60, %v1576_v13 }
 0x14c   : > { %v891_v15 = vpop.permute.xlu0 %890  ;;  %v897_v2 = vadd.f32 %v893_v43, %v883_v55  ;;  %v967_v27 = vsel %vm318_vm1, %v965_v14, %v966_v16 }
 0x14d   : > { %1370 = vrot.lane.b32.xlu2 %v1369_v12, %s3043_s18  ;;  %v896_v32 = vadd.f32 %v891_v15, %v882_v53  ;;  %v1512_v12 = vstv %s2765_s21  ;;  %v1496_v15 = vmul.f32 %v3546_v18, %v1495_v35  ;;  %s3879_s21 = sld [smem:[#allocation6 + $0x6b]] }
 0x14e   : > { %v1514_v51 = vmul.f32 %v3550_v1, %v1512_v12 }
 0x14f   : > { %v3705_v54 = vpop.permute.xlu2 %1000  ;;  %v910_v8 = vadd.f32 %v3647_v41, %v896_v32  ;;  %v1500_v32 = vrot.slane %v1496_v15, 2 }
 0x150   : > { %v1518_v34 = vrot.slane %v1514_v51, 2 }
 0x151   : > { %1387 = vrot.lane.b32.xlu1 %v1386_v50, %s3042_s11  ;;  %v923_v20 = vadd.f32 %v920_v11, %v910_v8  ;;  %v1010_v8 = vstv %s3758_s25  ;;  %v1014_v11 = vmul.f32 %v3550_v1, %v1012_v25  ;;  %s3897_s25 = sld [smem:[#allocation6 + $0x4b]] }
 0x152   : > { %1372 = vrot.lane.b32.xlu0 %v1368_v63, %s3043_s18  ;;  %v1466_v63 = vmul.f32 %v3546_v18, %v1465_v49  ;;  %v1015_v14 = vadd.f32 %v1013_v7, %v1010_v8 }
 0x153   : > { %v935_v38 = vpop.permute.xlu1 %934 }
 0x154   : > { %v907_v61 = vpop.permute.xlu0 %906  ;;  %v940_v23 = vadd.f32 %v935_v38, %v923_v20  ;;  %v1470_v47 = vrot.slane %v1466_v63, 1 }
 0x155   : > { %v911_v9 = vadd.f32 %v907_v61, %v897_v2  ;;  %1389 = vrot.lane.b32.xlu2 %v1385_v40, %s3042_s11  ;;  %v1471_v40 = vrot.slane %v1467_v31, 1  ;;  %v1502_v2 = vsel %vm318_vm1, %v1500_v32, %v1501_v56 }
 0x157   : > { %v3725_v0 = vpop.permute.xlu2 %1037  ;;  %v924_v41 = vadd.f32 %v919_v59, %v911_v9  ;;  %v1472_v55 = vsel %vm270_vm0, %v1470_v47, %v1471_v40  ;;  %v1046_v9 = vstv %s2730_s26  ;;  %s3909_s26 = sld [smem:[#allocation6 + $0x4e]] }
 0x158   : > { %v1048_v20 = vmul.f32 %v3550_v1, %v1046_v9 }
 0x159   : > { %1414 = vrot.lane.b32.xlu1 %v1409_v10, %s3043_s18  ;;  %v941_v28 = vadd.f32 %v3668_v52, %v924_v41  ;;  %v1535_v10 = vstv %s2767_s15  ;;  %s3912_s15 = sld [smem:[#allocation6 + $0x6d]] }
 0x15a   : > { %1412 = vrot.lane.b32.xlu0 %v1408_v44, %s3043_s18  ;;  %v1537_v41 = vmul.f32 %v3593_v4, %v1535_v10  ;;  %v1536_v3 = vmul.f32 %v3586_v60, %v1535_v10 }
 0x15b   : > { %v954_v24 = vpop.permute.xlu1 %953 }
 0x15c   : > { %v952_v26 = vpop.permute.xlu0 %951  ;;  %v958_v36 = vadd.f32 %v954_v24, %v941_v28  ;;  %v1093_v28 = vstv %s3778_s29  ;;  %s3934_s29 = sld [smem:[#allocation6 + $0x71]] }
 0x15d   : > { %v957_v29 = vadd.f32 %v952_v26, %v940_v23  ;;  %1426 = vrot.lane.b32.xlu2 %v1422_v22, %s3042_s11  ;;  %v1016_v22 = vadd.f32 %v1014_v11, %v1010_v8  ;;  %v1052_v26 = vrot.slane %v1048_v20, 1 }
 0x15e   : > { %v971_v45 = vadd.f32 %v966_v16, %v958_v36  ;;  %v1047_v16 = vmul.f32 %v3546_v18, %v1046_v9 }
 0x15f   : > { %v970_v37 = vadd.f32 %v967_v27, %v957_v29  ;;  %v3741_v39 = vpop.permute.xlu2 %1069  ;;  %v1549_v27 = vstv %s3774_s28  ;;  %v1581_v29 = vrot.slane %v1577_v58, 1  ;;  %s3929_s28 = sld [smem:[#allocation6 + $0x6e]] }
 0x160   : > { %v1051_v49 = vrot.slane %v1047_v16, 1 }
 0x161   : > { %1456 = vrot.lane.b32.xlu1 %v1455_v62, %s3043_s18  ;;  %v987_v52 = vadd.f32 %v3685_v33, %v970_v37  ;;  %v1513_v33 = vmul.f32 %v3546_v18, %v1512_v12  ;;  %v1593_v37 = vstv %s3781_s4  ;;  %v1551_v12 = vmul.f32 %v3593_v4, %v1549_v27  ;;  %s3950_s4 = sld [smem:[#allocation6 + $0x73]] }
 0x162   : > { %1428 = vrot.lane.b32.xlu0 %v1423_v57, %s3042_s11  ;;  %v1550_v57 = vmul.f32 %v3586_v60, %v1549_v27  ;;  %v1595_v15 = vmul.f32 %v3593_v4, %v1593_v37 }
 0x163   : > { %v999_v43 = vpop.permute.xlu1 %998  ;;  %v1517_v59 = vrot.slane %v1513_v33, 2 }
 0x164   : > { %v1004_v48 = vadd.f32 %v999_v43, %v987_v52  ;;  %v984_v21 = vpop.permute.xlu0 %983  ;;  %v1094_v43 = vmul.f32 %v3546_v18, %v1093_v28  ;;  %v1599_v51 = vrot.slane %v1595_v15, 1 }
 0x165   : > { %v988_v50 = vadd.f32 %v984_v21, %v971_v45  ;;  %1458 = vrot.lane.b32.xlu2 %v1454_v5, %s3043_s18  ;;  %v1519_v61 = vsel %vm318_vm1, %v1517_v59, %v1518_v34  ;;  %v1578_v5 = vmul.f32 %v3593_v4, %v1576_v13  ;;  %v1095_v45 = vmul.f32 %v3550_v1, %v1093_v28 }
 0x166   : > { %2724 = vst.msk [vmem:[%s3503_s7 + $0x10] sm:$0xff] %vm616_vm2, %v1004_v48  ;;  %v1594_v48 = vmul.f32 %v3586_v60, %v1593_v37  ;;  %v1098_v17 = vrot.slane %v1094_v43, 2  ;;  %v1640_v59 = vstv %s3800_s6  ;;  %s3980_s6 = sld [smem:[#allocation6 + $0x51]] }
 0x167   : > { %v1005_v53 = vadd.f32 %v3705_v54, %v988_v50  ;;  %v3760_v30 = vpop.permute.xlu2 %1114  ;;  %v1582_v62 = vrot.slane %v1578_v5, 1  ;;  %v1099_v33 = vrot.slane %v1095_v45, 2  ;;  %v1641_v7 = vmul.f32 %v3586_v60, %v1640_v59 }
 0x168   : > { %v1642_v8 = vmul.f32 %v3593_v4, %v1640_v59 }
 0x169   : > { %2725 = vst.msk [vmem:[%s3503_s7 + $0x18] sm:$0x3f] %vm618_vm3, %v1005_v53  ;;  %1475 = vrot.lane.b32.xlu1 %v1471_v40, %s3042_s11  ;;  %v1053_v40 = vsel %vm270_vm0, %v1051_v49, %v1052_v26  ;;  %v1583_v47 = vsel %vm270_vm0, %v1581_v29, %v1582_v62  ;;  %v1623_v53 = vstv %s3796_s5  ;;  %s3957_s5 = sld [smem:[#allocation6 + $0x74]] }
 0x16a   : > { %1473 = vrot.lane.b32.xlu0 %v1472_v55, %s3042_s11  ;;  %v1625_v25 = vmul.f32 %v3593_v4, %v1623_v53 }
 0x16b   : > { %v1026_v54 = vpop.permute.xlu1 %1025 }
 0x16c   : > { %v1024_v38 = vpop.permute.xlu0 %1023  ;;  %v1030_v31 = vadd.f32 %v1026_v54, %v1016_v22  ;;  %v1629_v13 = vrot.slane %v1625_v25, 2 }
 0x16d   : > { %1503 = vrot.lane.b32.xlu2 %v1502_v2, %s3043_s18  ;;  %v1029_v24 = vadd.f32 %v1024_v38, %v1015_v14  ;;  %v1646_v14 = vrot.slane %v1642_v8, 2 }
 0x16f   : > { %v3770_v6 = vpop.permute.xlu2 %1133  ;;  %v1043_v52 = vadd.f32 %v3725_v0, %v1029_v24  ;;  %v1174_v24 = vstv %s3822_s8  ;;  %s2760_s8 = sld [smem:[#allocation6 + $0x54]] }
 0x170   : > { %v1175_v28 = vmul.f32 %v3586_v60, %v1174_v24  ;;  %v1176_v29 = vmul.f32 %v3593_v4, %v1174_v24 }
 0x171   : > { %1520 = vrot.lane.b32.xlu1 %v1519_v61, %s3042_s11  ;;  %v1056_v21 = vadd.f32 %v1053_v40, %v1043_v52  ;;  %v1100_v61 = vsel %vm318_vm1, %v1098_v17, %v1099_v33 }
 0x172   : > { %1505 = vrot.lane.b32.xlu0 %v1501_v56, %s3043_s18  ;;  %v1598_v56 = vrot.slane %v1594_v48, 1  ;;  %v1179_v52 = vrot.slane %v1175_v28, 1  ;;  %v1180_v40 = vrot.slane %v1176_v29, 1 }
 0x173   : > { %v1068_v44 = vpop.permute.xlu1 %1067 }
 0x174   : > { %v1040_v42 = vpop.permute.xlu0 %1039  ;;  %v1073_v55 = vadd.f32 %v1068_v44, %v1056_v21  ;;  %v1600_v10 = vsel %vm270_vm0, %v1598_v56, %v1599_v51 }
 0x175   : > { %1522 = vrot.lane.b32.xlu2 %v1518_v34, %s3042_s11  ;;  %v1044_v35 = vadd.f32 %v1040_v42, %v1030_v31  ;;  %v1624_v34 = vmul.f32 %v3586_v60, %v1623_v53  ;;  %v1645_v42 = vrot.slane %v1641_v7, 2  ;;  %v1663_v31 = vstv %s3833_s23  ;;  %s2797_s23 = sld [smem:[#allocation6 + $0x76]] }
 0x176   : > { %v1665_v45 = vmul.f32 %v3635_v19, %v1663_v31 }
 0x177   : > { %v3790_v23 = vpop.permute.xlu2 %1165  ;;  %v1057_v50 = vadd.f32 %v1052_v26, %v1044_v35  ;;  %v1628_v11 = vrot.slane %v1624_v34, 2  ;;  %v1647_v49 = vsel %vm318_vm1, %v1645_v42, %v1646_v14 }
 0x179   : > { %1542 = vrot.lane.b32.xlu1 %v1537_v41, %s3043_s18  ;;  %v1074_v2 = vadd.f32 %v3741_v39, %v1057_v50  ;;  %v1630_v41 = vsel %vm318_vm1, %v1628_v11, %v1629_v13  ;;  %v1181_v50 = vsel %vm270_vm0, %v1179_v52, %v1180_v40 }
 0x17a   : > { %1540 = vrot.lane.b32.xlu0 %v1536_v3, %s3043_s18  ;;  %v1140_v3 = vstv %s3818_s16  ;;  %s3987_s16 = sld [smem:[#allocation7 + $0x3]] }
 0x17b   : > { %v1087_v36 = vpop.permute.xlu1 %1086  ;;  %v1141_v27 = vmul.f32 %v3586_v60, %v1140_v3 }
 0x17c   : > { %v1085_v63 = vpop.permute.xlu0 %1084  ;;  %v1091_v9 = vadd.f32 %v1087_v36, %v1074_v2  ;;  %v1721_v2 = vstv %s3858_s12  ;;  %s4010_s12 = sld [smem:[#allocation6 + $0x7a]] }
 0x17d   : > { %1554 = vrot.lane.b32.xlu2 %v1550_v57, %s3042_s11  ;;  %v1090_v38 = vadd.f32 %v1085_v63, %v1073_v55  ;;  %v1142_v57 = vmul.f32 %v3593_v4, %v1140_v3  ;;  %v1704_v63 = vstv %s3835_s30  ;;  %v1677_v55 = vstv %s3853_s22  ;;  %s2800_s30 = sld [smem:[#allocation6 + $0x79]] }
 0x17e   : > { %v1104_v16 = vadd.f32 %v1099_v33, %v1091_v9  ;;  %v1705_v15 = vmul.f32 %v3639_v46, %v1704_v63  ;;  %v1706_v48 = vmul.f32 %v3635_v19, %v1704_v63  ;;  %v1678_v34 = vmul.f32 %v3639_v46, %v1677_v55  ;;  %s4007_s22 = sld [smem:[#allocation6 + $0x57]] }
 0x17f   : > { %v3811_v0 = vpop.permute.xlu2 %1197  ;;  %v1103_v39 = vadd.f32 %v1100_v61, %v1090_v38  ;;  %v1723_v8 = vmul.f32 %v3635_v19, %v1721_v2 }
 0x180   : > { %v1709_v56 = vrot.slane %v1705_v15, 1  ;;  %v1710_v59 = vrot.slane %v1706_v48, 1 }
 0x181   : > { %1584 = vrot.lane.b32.xlu1 %v1583_v47, %s3043_s18  ;;  %v1120_v5 = vadd.f32 %v3760_v30, %v1103_v39  ;;  %v1664_v47 = vmul.f32 %v3639_v46, %v1663_v31 }
 0x182   : > { %1556 = vrot.lane.b32.xlu0 %v1551_v12, %s3042_s11  ;;  %v1221_v12 = vstv %s3842_s10  ;;  %v1711_v7 = vsel %vm270_vm0, %v1709_v56, %v1710_v59  ;;  %v1796_v56 = vstv %s3912_s15  ;;  %s4003_s10 = sld [smem:[#allocation6 + $0x77]] }
 0x183   : > { %v1132_v32 = vpop.permute.xlu1 %1131  ;;  %v1222_v53 = vmul.f32 %v3586_v60, %v1221_v12  ;;  %s4070_s15 = sld [smem:[#allocation6 + $0x82]] }
 0x184   : > { %v1117_v54 = vpop.permute.xlu0 %1116  ;;  %v1137_v26 = vadd.f32 %v1132_v32, %v1120_v5  ;;  %v1223_v32 = vmul.f32 %v3593_v4, %v1221_v12  ;;  %v1679_v4 = vmul.f32 %v3635_v19, %v1677_v55 }
 0x185   : > { %1586 = vrot.lane.b32.xlu2 %v1582_v62, %s3043_s18  ;;  %v1121_v22 = vadd.f32 %v1117_v54, %v1104_v16  ;;  %v1226_v61 = vrot.slane %v1222_v53, 2  ;;  %v1751_v16 = vstv %s3875_s19  ;;  %s4031_s19 = sld [smem:[#allocation6 + $0x7c]] }
 0x186   : > { %v1143_v36 = vadd.f32 %v1141_v27, %v1137_v26  ;;  %v1227_v60 = vrot.slane %v1223_v32, 2  ;;  %v1752_v5 = vmul.f32 %v3639_v46, %v1751_v16  ;;  %v1753_v24 = vmul.f32 %v3635_v19, %v1751_v16 }
 0x187   : > { %v3829_v44 = vpop.permute.xlu2 %1242  ;;  %v1138_v30 = vadd.f32 %v3770_v6, %v1121_v22 }
 0x188   : > { %v1228_v42 = vsel %vm318_vm1, %v1226_v61, %v1227_v60  ;;  %v1756_v29 = vrot.slane %v1752_v5, 2 }
 0x189   : > { %1603 = vrot.lane.b32.xlu1 %v1599_v51, %s3042_s11  ;;  %v1144_v6 = vadd.f32 %v1142_v57, %v1138_v30  ;;  %v1268_v30 = vstv %s3886_s24  ;;  %s4053_s24 = sld [smem:[#allocation6 + $0x5a]] }
 0x18a   : > { %1601 = vrot.lane.b32.xlu0 %v1600_v10, %s3042_s11  ;;  %v1722_v10 = vmul.f32 %v3639_v46, %v1721_v2  ;;  %v1270_v12 = vmul.f32 %v3635_v19, %v1268_v30 }
 0x18b   : > { %v1154_v20 = vpop.permute.xlu1 %1153 }
 0x18c   : > { %v1152_v58 = vpop.permute.xlu0 %1151  ;;  %v1158_v21 = vadd.f32 %v1154_v20, %v1144_v6  ;;  %v1726_v3 = vrot.slane %v1722_v10, 1  ;;  %v1269_v6 = vmul.f32 %v3639_v46, %v1268_v30 }
 0x18d   : > { %1631 = vrot.lane.b32.xlu2 %v1630_v41, %s3043_s18  ;;  %v1157_v43 = vadd.f32 %v1152_v58, %v1143_v36  ;;  %v1768_v58 = vstv %s3879_s21  ;;  %s4035_s21 = sld [smem:[#allocation6 + $0x7d]] }
 0x18e   : > { %v1770_v26 = vmul.f32 %v3635_v19, %v1768_v58 }
 0x18f   : > { %v3848_v62 = vpop.permute.xlu2 %1261  ;;  %v1171_v33 = vadd.f32 %v3790_v23, %v1157_v43  ;;  %v1302_v43 = vstv %s3897_s25  ;;  %s4057_s25 = sld [smem:[#allocation6 + $0x5d]] }
 0x190   : > { %v1774_v52 = vrot.slane %v1770_v26, 2  ;;  %v1303_v48 = vmul.f32 %v3639_v46, %v1302_v43 }
 0x191   : > { %1648 = vrot.lane.b32.xlu1 %v1647_v49, %s3042_s11  ;;  %v1184_v38 = vadd.f32 %v1181_v50, %v1171_v33  ;;  %v1769_v49 = vmul.f32 %v3639_v46, %v1768_v58 }
 0x192   : > { %1633 = vrot.lane.b32.xlu0 %v1629_v13, %s3043_s18  ;;  %v1307_v55 = vrot.slane %v1303_v48, 1 }
 0x193   : > { %v1196_v37 = vpop.permute.xlu1 %1195  ;;  %v1773_v63 = vrot.slane %v1769_v49, 2 }
 0x194   : > { %v1168_v35 = vpop.permute.xlu0 %1167  ;;  %v1201_v9 = vadd.f32 %v1196_v37, %v1184_v38  ;;  %v1757_v37 = vrot.slane %v1753_v24, 2  ;;  %v3963_v24 = vld [vmem:[%s3150_s9 + $0x8] sm:$0xff] }
 0x195   : > { %1650 = vrot.lane.b32.xlu2 %v1646_v14, %s3042_s11  ;;  %v1172_v51 = vadd.f32 %v1168_v35, %v1158_v21  ;;  %v1727_v14 = vrot.slane %v1723_v8, 1  ;;  %v1775_v15 = vsel %vm318_vm1, %v1773_v63, %v1774_v52  ;;  %v1304_v21 = vmul.f32 %v3635_v19, %v1302_v43 }
 0x197   : > { %v3867_v17 = vpop.permute.xlu2 %1293  ;;  %v1185_v25 = vadd.f32 %v1180_v40, %v1172_v51  ;;  %v1728_v28 = vsel %vm270_vm0, %v1726_v3, %v1727_v14  ;;  %v1308_v32 = vrot.slane %v1304_v21, 1 }
 0x199   : > { %1670 = vrot.lane.b32.xlu1 %v1665_v45, %s3043_s18  ;;  %v1202_v39 = vadd.f32 %v3811_v0, %v1185_v25 }
 0x19a   : > { %1668 = vrot.lane.b32.xlu0 %v1664_v47, %s3043_s18 }
 0x19b   : > { %v1215_v54 = vpop.permute.xlu1 %1214 }
 0x19c   : > { %v1213_v23 = vpop.permute.xlu0 %1212  ;;  %v1219_v20 = vadd.f32 %v1215_v54, %v1202_v39  ;;  %v1837_v54 = vstv %s3916_s27  ;;  %s4077_s27 = sld [smem:[#allocation6 + $0x60]] }
 0x19d   : > { %1682 = vrot.lane.b32.xlu2 %v1678_v34, %s3042_s11  ;;  %v1218_v13 = vadd.f32 %v1213_v23, %v1201_v9  ;;  %v1838_v8 = vmul.f32 %v3546_v18, %v1837_v54  ;;  %v1839_v9 = vmul.f32 %v3550_v1, %v1837_v54  ;;  %v1399_v54 = vstv %s3987_s16  ;;  %s4137_s16 = sld [smem:[#allocation6 + $0x66]] }
 0x19e   : > { %v1232_v27 = vadd.f32 %v1227_v60, %v1219_v20  ;;  %v1798_v60 = vmul.f32 %v3550_v1, %v1796_v56 }
 0x19f   : > { %v3888_v11 = vpop.permute.xlu2 %1325  ;;  %v1231_v0 = vadd.f32 %v1228_v42, %v1218_v13  ;;  %v1810_v13 = vstv %s3929_s28  ;;  %v1842_v42 = vrot.slane %v1838_v8, 1  ;;  %s4088_s28 = sld [smem:[#allocation6 + $0x80]] }
 0x1a0   : > { %v1812_v49 = vmul.f32 %v3963_v24, %v1810_v13 }
 0x1a1   : > { %1712 = vrot.lane.b32.xlu1 %v1711_v7, %s3043_s18  ;;  %v1248_v31 = vadd.f32 %v3829_v44, %v1231_v0  ;;  %v1758_v44 = vsel %vm318_vm1, %v1756_v29, %v1757_v37  ;;  %v1309_v7 = vsel %vm270_vm0, %v1307_v55, %v1308_v32 }
 0x1a2   : > { %1684 = vrot.lane.b32.xlu0 %v1679_v4, %s3042_s11  ;;  %v1797_v4 = vmul.f32 %v3546_v18, %v1796_v56  ;;  %v3953_v18 = vld [vmem:[%s3150_s9] sm:$0xff] }
 0x1a3   : > { %v1260_v41 = vpop.permute.xlu1 %1259  ;;  %v1811_v1 = vmul.f32 %v3953_v18, %v1810_v13 }
 0x1a4   : > { %v1245_v22 = vpop.permute.xlu0 %1244  ;;  %v1265_v40 = vadd.f32 %v1260_v41, %v1248_v31  ;;  %v1854_v41 = vstv %s3934_s29  ;;  %s4093_s29 = sld [smem:[#allocation6 + $0x83]] }
 0x1a5   : > { %1714 = vrot.lane.b32.xlu2 %v1710_v59, %s3043_s18  ;;  %v1249_v36 = vadd.f32 %v1245_v22, %v1232_v27  ;;  %v1856_v26 = vmul.f32 %v3963_v24, %v1854_v41  ;;  %v1855_v29 = vmul.f32 %v3953_v18, %v1854_v41  ;;  %v1938_v41 = vstv %s4003_s10  ;;  %s4170_s10 = sld [smem:[#allocation6 + $0x89]] }
 0x1a6   : > { %v1271_v50 = vadd.f32 %v1269_v6, %v1265_v40  ;;  %v1901_v40 = vstv %s3957_s5  ;;  %s4120_s5 = sld [smem:[#allocation6 + $0x86]] }
 0x1a7   : > { %v3905_v57 = vpop.permute.xlu2 %1370  ;;  %v1266_v47 = vadd.f32 %v3848_v62, %v1249_v36  ;;  %v1349_v62 = vstv %s3909_s26  ;;  %v1860_v31 = vrot.slane %v1856_v26, 1  ;;  %v1884_v36 = vstv %s3950_s4  ;;  %s4068_s26 = sld [smem:[#allocation6 + $0x7f]] }
 0x1a8   : > { %v1350_v23 = vmul.f32 %v3639_v46, %v1349_v62  ;;  %v1351_v38 = vmul.f32 %v3635_v19, %v1349_v62  ;;  %v1982_v26 = vstv %s4010_s12  ;;  %s4116_s4 = sld [smem:[#allocation6 + $0x85]] }
 0x1a9   : > { %1731 = vrot.lane.b32.xlu1 %v1727_v14, %s3042_s11  ;;  %v1272_v51 = vadd.f32 %v1270_v12, %v1266_v47  ;;  %v1843_v14 = vrot.slane %v1839_v9, 1  ;;  %v1903_v47 = vmul.f32 %v3963_v24, %v1901_v40  ;;  %v4015_v9 = vld [vmem:[%s3150_s9 + $0x18] sm:$0xff]  ;;  %s4191_s12 = sld [smem:[#allocation6 + $0x8e]] }
 0x1aa   : > { %1729 = vrot.lane.b32.xlu0 %v1728_v28, %s3042_s11  ;;  %v1354_v46 = vrot.slane %v1350_v23, 2  ;;  %v1355_v10 = vrot.slane %v1351_v38, 2  ;;  %v1924_v23 = vstv %s2797_s23  ;;  %s4153_s23 = sld [smem:[#allocation6 + $0x88]] }
 0x1ab   : > { %v1282_v35 = vpop.permute.xlu1 %1281  ;;  %v1844_v0 = vsel %vm270_vm0, %v1842_v42, %v1843_v14 }
 0x1ac   : > { %v1280_v45 = vpop.permute.xlu0 %1279  ;;  %v1286_v59 = vadd.f32 %v1282_v35, %v1272_v51  ;;  %v1356_v58 = vsel %vm318_vm1, %v1354_v46, %v1355_v10  ;;  %v1885_v35 = vmul.f32 %v3953_v18, %v1884_v36  ;;  %v1926_v46 = vmul.f32 %v4015_v9, %v1924_v23 }
 0x1ad   : > { %1759 = vrot.lane.b32.xlu2 %v1758_v44, %s3043_s18  ;;  %v1285_v53 = vadd.f32 %v1280_v45, %v1271_v50  ;;  %v1886_v45 = vmul.f32 %v3963_v24, %v1884_v36 }
 0x1ae   : > { %v1889_v48 = vrot.slane %v1885_v35, 2 }
 0x1af   : > { %v3925_v33 = vpop.permute.xlu2 %1389  ;;  %v1299_v25 = vadd.f32 %v3867_v17, %v1285_v53  ;;  %v1890_v50 = vrot.slane %v1886_v45, 2  ;;  %v1907_v53 = vrot.slane %v1903_v47, 2 }
 0x1b1   : > { %1776 = vrot.lane.b32.xlu1 %v1775_v15, %s3042_s11  ;;  %v1312_v17 = vadd.f32 %v1309_v7, %v1299_v25  ;;  %v1891_v62 = vsel %vm318_vm1, %v1889_v48, %v1890_v50  ;;  %v2029_v48 = vstv %s4035_s21  ;;  %s4212_s21 = sld [smem:[#allocation6 + $0x6c]] }
 0x1b2   : > { %1761 = vrot.lane.b32.xlu0 %v1757_v37, %s3043_s18 }
 0x1b3   : > { %v1324_v34 = vpop.permute.xlu1 %1323 }
 0x1b4   : > { %v1296_v2 = vpop.permute.xlu0 %1295  ;;  %v1329_v16 = vadd.f32 %v1324_v34, %v1312_v17 }
 0x1b5   : > { %v1300_v61 = vadd.f32 %v1296_v2, %v1286_v59  ;;  %1778 = vrot.lane.b32.xlu2 %v1774_v52, %s3042_s11  ;;  %v1859_v52 = vrot.slane %v1855_v29, 1  ;;  %v1435_v2 = vstv %s2760_s8  ;;  %s4150_s8 = sld [smem:[#allocation6 + $0x69]] }
 0x1b6   : > { %v1437_v8 = vmul.f32 %v3963_v24, %v1435_v2 }
 0x1b7   : > { %v3945_v19 = vpop.permute.xlu2 %1426  ;;  %v1313_v39 = vadd.f32 %v1308_v32, %v1300_v61  ;;  %v1861_v15 = vsel %vm270_vm0, %v1859_v52, %v1860_v31  ;;  %v1401_v32 = vstv %s3980_s6  ;;  %v1965_v61 = vstv %s2800_s30  ;;  %s4127_s6 = sld [smem:[#allocation6 + $0x63]] }
 0x1b8   : > { %v1402_v34 = vmul.f32 %v3953_v18, %v1401_v32  ;;  %v1403_v38 = vmul.f32 %v3963_v24, %v1401_v32  ;;  %v1967_v13 = vmul.f32 %v4015_v9, %v1965_v61  ;;  %v1984_v52 = vmul.f32 %v4015_v9, %v1982_v26  ;;  %s4157_s30 = sld [smem:[#allocation6 + $0x8b]] }
 0x1b9   : > { %1803 = vrot.lane.b32.xlu1 %v1798_v60, %s3043_s18  ;;  %v1330_v5 = vadd.f32 %v3888_v11, %v1313_v39 }
 0x1ba   : > { %1801 = vrot.lane.b32.xlu0 %v1797_v4, %s3043_s18  ;;  %v1404_v7 = vadd.f32 %v1402_v34, %v1399_v54  ;;  %v1436_v4 = vmul.f32 %v3953_v18, %v1435_v2  ;;  %v1405_v42 = vadd.f32 %v1403_v38, %v1399_v54  ;;  %v1988_v45 = vrot.slane %v1984_v52, 1 }
 0x1bb   : > { %v1343_v20 = vpop.permute.xlu1 %1342 }
 0x1bc   : > { %v1341_v3 = vpop.permute.xlu0 %1340  ;;  %v1347_v27 = vadd.f32 %v1343_v20, %v1330_v5  ;;  %v1441_v20 = vrot.slane %v1437_v8, 1  ;;  %v1971_v5 = vrot.slane %v1967_v13, 1  ;;  %v1529_v8 = vstv %s4053_s24  ;;  %s4219_s24 = sld [smem:[#allocation7 + $0x4]] }
 0x1bd   : > { %v1346_v22 = vadd.f32 %v1341_v3, %v1329_v16  ;;  %1815 = vrot.lane.b32.xlu2 %v1811_v1, %s3042_s11  ;;  %v1440_v16 = vrot.slane %v1436_v4, 1  ;;  %v1482_v3 = vstv %s4007_s22  ;;  %v1563_v13 = vstv %s4057_s25  ;;  %s4175_s22 = sld [smem:[#allocation6 + $0x8c]] }
 0x1be   : > { %v1360_v63 = vadd.f32 %v1355_v10, %v1347_v27  ;;  %v4019_v10 = vld [vmem:[%s3150_s9 + $0x10] sm:$0xff]  ;;  %v1484_v36 = vmul.f32 %v3963_v24, %v1482_v3  ;;  %s2790_s25 = sld [smem:[#allocation6 + $0x6f]] }
 0x1bf   : > { %v1359_v28 = vadd.f32 %v1356_v58, %v1346_v22  ;;  %v3969_v30 = vpop.permute.xlu2 %1458  ;;  %v1925_v17 = vmul.f32 %v4019_v10, %v1924_v23  ;;  %v1966_v39 = vmul.f32 %v4019_v10, %v1965_v61  ;;  %v1939_v22 = vmul.f32 %v4019_v10, %v1938_v41 }
 0x1c0   : > { %v1442_v29 = vsel %vm270_vm0, %v1440_v16, %v1441_v20  ;;  %v2030_v32 = vmul.f32 %v4019_v10, %v2029_v48  ;;  %v1530_v16 = vmul.f32 %v4019_v10, %v1529_v8 }
 0x1c1   : > { %1845 = vrot.lane.b32.xlu1 %v1844_v0, %s3043_s18  ;;  %v1376_v11 = vadd.f32 %v3905_v57, %v1359_v28  ;;  %v1902_v57 = vmul.f32 %v3953_v18, %v1901_v40  ;;  %v1970_v58 = vrot.slane %v1966_v39, 1  ;;  %v1983_v40 = vmul.f32 %v4019_v10, %v1982_v26 }
 0x1c2   : > { %1817 = vrot.lane.b32.xlu0 %v1812_v49, %s3042_s11 }
 0x1c3   : > { %v1388_v37 = vpop.permute.xlu1 %1387  ;;  %v1906_v51 = vrot.slane %v1902_v57, 2  ;;  %v2012_v57 = vstv %s4031_s19  ;;  %s2825_s19 = sld [smem:[#allocation6 + $0x8f]] }
 0x1c4   : > { %v1393_v6 = vadd.f32 %v1388_v37, %v1376_v11  ;;  %v1373_v43 = vpop.permute.xlu0 %1372  ;;  %v1972_v37 = vsel %vm270_vm0, %v1970_v58, %v1971_v5  ;;  %v1531_v58 = vmul.f32 %v4015_v9, %v1529_v8 }
 0x1c5   : > { %v1377_v44 = vadd.f32 %v1373_v43, %v1360_v63  ;;  %1847 = vrot.lane.b32.xlu2 %v1843_v14, %s3043_s18  ;;  %v1908_v56 = vsel %vm318_vm1, %v1906_v51, %v1907_v53  ;;  %v1940_v63 = vmul.f32 %v4015_v9, %v1938_v41  ;;  %v1565_v41 = vmul.f32 %v4015_v9, %v1563_v13 }
 0x1c6   : > { %2754 = vst.msk [vmem:[%s3503_s7 + $0x20] sm:$0xff] %vm616_vm2, %v1393_v6 }
 0x1c7   : > { %v1394_v12 = vadd.f32 %v3925_v33, %v1377_v44  ;;  %v3989_v21 = vpop.permute.xlu2 %1503  ;;  %v1488_v44 = vrot.slane %v1484_v36, 2  ;;  %v4100_v36 = vld [vmem:[%s3150_s9 + $0x20] sm:$0xff] }
 0x1c9   : > { %2755 = vst.msk [vmem:[%s3503_s7 + $0x28] sm:$0x3f] %vm618_vm3, %v1394_v12  ;;  %1864 = vrot.lane.b32.xlu1 %v1860_v31, %s3042_s11  ;;  %v1483_v31 = vmul.f32 %v3953_v18, %v1482_v3 }
 0x1ca   : > { %1862 = vrot.lane.b32.xlu0 %v1861_v15, %s3042_s11  ;;  %v1987_v15 = vrot.slane %v1983_v40, 1 }
 0x1cb   : > { %v1415_v33 = vpop.permute.xlu1 %1414  ;;  %v1487_v43 = vrot.slane %v1483_v31, 2 }
 0x1cc   : > { %v1413_v55 = vpop.permute.xlu0 %1412  ;;  %v1419_v0 = vadd.f32 %v1415_v33, %v1405_v42  ;;  %v1989_v54 = vsel %vm270_vm0, %v1987_v15, %v1988_v45 }
 0x1cd   : > { %1892 = vrot.lane.b32.xlu2 %v1891_v62, %s3043_s18  ;;  %v1418_v1 = vadd.f32 %v1413_v55, %v1404_v7  ;;  %v2014_v62 = vmul.f32 %v4015_v9, %v2012_v57  ;;  %v1489_v55 = vsel %vm318_vm1, %v1487_v43, %v1488_v44 }
 0x1cf   : > { %v3999_v59 = vpop.permute.xlu2 %1522  ;;  %v1432_v28 = vadd.f32 %v3945_v19, %v1418_v1  ;;  %v2018_v38 = vrot.slane %v2014_v62, 2 }
 0x1d1   : > { %1909 = vrot.lane.b32.xlu1 %v1908_v56, %s3042_s11  ;;  %v1445_v35 = vadd.f32 %v1442_v29, %v1432_v28  ;;  %v2031_v56 = vmul.f32 %v4015_v9, %v2029_v48 }
 0x1d2   : > { %1894 = vrot.lane.b32.xlu0 %v1890_v50, %s3043_s18  ;;  %v2013_v50 = vmul.f32 %v4019_v10, %v2012_v57 }
 0x1d3   : > { %v1457_v25 = vpop.permute.xlu1 %1456  ;;  %v2035_v61 = vrot.slane %v2031_v56, 2 }
 0x1d4   : > { %v1429_v60 = vpop.permute.xlu0 %1428  ;;  %v1462_v47 = vadd.f32 %v1457_v25, %v1445_v35  ;;  %v2017_v2 = vrot.slane %v2013_v50, 2  ;;  %v2034_v25 = vrot.slane %v2030_v32, 2 }
 0x1d5   : > { %1911 = vrot.lane.b32.xlu2 %v1907_v53, %s3042_s11  ;;  %v1433_v11 = vadd.f32 %v1429_v60, %v1419_v0 }
 0x1d6   : > { %v2019_v4 = vsel %vm318_vm1, %v2017_v2, %v2018_v38  ;;  %v2036_v42 = vsel %vm318_vm1, %v2034_v25, %v2035_v61 }
 0x1d7   : > { %v4025_v14 = vpop.permute.xlu2 %1554  ;;  %v1446_v6 = vadd.f32 %v1441_v20, %v1433_v11  ;;  %v1564_v20 = vmul.f32 %v4019_v10, %v1563_v13  ;;  %v4096_v11 = vld [vmem:[%s3150_s9 + $0x28] sm:$0xff] }
 0x1d9   : > { %1931 = vrot.lane.b32.xlu1 %v1926_v46, %s3043_s18  ;;  %v1463_v53 = vadd.f32 %v3969_v30, %v1446_v6  ;;  %v1568_v26 = vrot.slane %v1564_v20, 1 }
 0x1da   : > { %1929 = vrot.lane.b32.xlu0 %v1925_v17, %s3043_s18 }
 0x1db   : > { %v1476_v49 = vpop.permute.xlu1 %1475 }
 0x1dc   : > { %v1474_v27 = vpop.permute.xlu0 %1473  ;;  %v1480_v34 = vadd.f32 %v1476_v49, %v1463_v53  ;;  %v2093_v49 = vstv %s4070_s15  ;;  %v2110_v53 = vstv %s4093_s29  ;;  %s2830_s15 = sld [smem:[#allocation6 + $0x94]] }
 0x1dd   : > { %1943 = vrot.lane.b32.xlu2 %v1939_v22, %s3042_s11  ;;  %v1479_v33 = vadd.f32 %v1474_v27, %v1462_v47  ;;  %v1569_v27 = vrot.slane %v1565_v41, 1  ;;  %v2094_v52 = vmul.f32 %v4100_v36, %v2093_v49  ;;  %v2095_v40 = vmul.f32 %v4096_v11, %v2093_v49  ;;  %s4242_s29 = sld [smem:[#allocation6 + $0x95]] }
 0x1de   : > { %v1493_v60 = vadd.f32 %v1488_v44, %v1480_v34  ;;  %v2066_v47 = vstv %s4088_s28  ;;  %s4239_s28 = sld [smem:[#allocation6 + $0x72]] }
 0x1df   : > { %v4046_v19 = vpop.permute.xlu2 %1586  ;;  %v1492_v30 = vadd.f32 %v1489_v55, %v1479_v33  ;;  %v1570_v6 = vsel %vm270_vm0, %v1568_v26, %v1569_v27  ;;  %v2098_v15 = vrot.slane %v2094_v52, 1  ;;  %v2099_v48 = vrot.slane %v2095_v40, 1 }
 0x1e0   : > { %v2067_v50 = vmul.f32 %v4100_v36, %v2066_v47  ;;  %v2068_v34 = vmul.f32 %v4096_v11, %v2066_v47 }
 0x1e1   : > { %1973 = vrot.lane.b32.xlu1 %v1972_v37, %s3043_s18  ;;  %v1509_v17 = vadd.f32 %v3989_v21, %v1492_v30  ;;  %v2100_v56 = vsel %vm270_vm0, %v2098_v15, %v2099_v48  ;;  %v2111_v30 = vmul.f32 %v4100_v36, %v2110_v53 }
 0x1e2   : > { %1945 = vrot.lane.b32.xlu0 %v1940_v63, %s3042_s11  ;;  %v1610_v63 = vstv %s4077_s27  ;;  %s4235_s27 = sld [smem:[#allocation6 + $0x92]] }
 0x1e3   : > { %v1521_v12 = vpop.permute.xlu1 %1520  ;;  %v1611_v57 = vmul.f32 %v4019_v10, %v1610_v63 }
 0x1e4   : > { %v1506_v51 = vpop.permute.xlu0 %1505  ;;  %v1526_v1 = vadd.f32 %v1521_v12, %v1509_v17  ;;  %v1612_v12 = vmul.f32 %v4015_v9, %v1610_v63  ;;  %v2115_v17 = vrot.slane %v2111_v30, 1 }
 0x1e5   : > { %1975 = vrot.lane.b32.xlu2 %v1971_v5, %s3043_s18  ;;  %v1510_v39 = vadd.f32 %v1506_v51, %v1493_v60  ;;  %v2052_v5 = vstv %s4068_s26  ;;  %v1615_v55 = vrot.slane %v1611_v57, 2  ;;  %s2827_s26 = sld [smem:[#allocation6 + $0x91]] }
 0x1e6   : > { %v1532_v22 = vadd.f32 %v1530_v16, %v1526_v1  ;;  %v2054_v31 = vmul.f32 %v4096_v11, %v2052_v5  ;;  %v2053_v37 = vmul.f32 %v4100_v36, %v2052_v5  ;;  %v1616_v32 = vrot.slane %v1612_v12, 2 }
 0x1e7   : > { %v4064_v23 = vpop.permute.xlu2 %1631  ;;  %v1527_v21 = vadd.f32 %v3999_v59, %v1510_v39  ;;  %v2157_v39 = vstv %s4120_s5  ;;  %v1657_v5 = vstv %s4127_s6  ;;  %s4261_s5 = sld [smem:[#allocation6 + $0x98]] }
 0x1e8   : > { %v1617_v60 = vsel %vm318_vm1, %v1615_v55, %v1616_v32  ;;  %v2158_v16 = vmul.f32 %v4100_v36, %v2157_v39  ;;  %v2159_v20 = vmul.f32 %v4096_v11, %v2157_v39  ;;  %v1659_v40 = vmul.f32 %v4096_v11, %v1657_v5  ;;  %s4279_s6 = sld [smem:[#allocation6 + $0x75]] }
 0x1e9   : > { %1992 = vrot.lane.b32.xlu1 %v1988_v45, %s3042_s11  ;;  %v1533_v59 = vadd.f32 %v1531_v58, %v1527_v21 }
 0x1ea   : > { %1990 = vrot.lane.b32.xlu0 %v1989_v54, %s3042_s11  ;;  %v2112_v54 = vmul.f32 %v4096_v11, %v2110_v53 }
 0x1eb   : > { %v1543_v7 = vpop.permute.xlu1 %1542 }
 0x1ec   : > { %v1541_v46 = vpop.permute.xlu0 %1540  ;;  %v1547_v35 = vadd.f32 %v1543_v7, %v1533_v59  ;;  %v2116_v7 = vrot.slane %v2112_v54, 1 }
 0x1ed   : > { %2020 = vrot.lane.b32.xlu2 %v2019_v4, %s3043_s18  ;;  %v1546_v29 = vadd.f32 %v1541_v46, %v1532_v22  ;;  %v2140_v4 = vstv %s4116_s4  ;;  %s4257_s4 = sld [smem:[#allocation6 + $0x97]] }
 0x1ee   : > { %v2141_v13 = vmul.f32 %v4100_v36, %v2140_v4  ;;  %v2142_v1 = vmul.f32 %v4096_v11, %v2140_v4  ;;  %v2117_v21 = vsel %vm270_vm0, %v2115_v17, %v2116_v7 }
 0x1ef   : > { %v4083_v3 = vpop.permute.xlu2 %1650  ;;  %v1560_v44 = vadd.f32 %v4025_v14, %v1546_v29 }
 0x1f0   : > { %v2145_v58 = vrot.slane %v2141_v13, 2  ;;  %v2146_v26 = vrot.slane %v2142_v1, 2 }
 0x1f1   : > { %2037 = vrot.lane.b32.xlu1 %v2036_v42, %s3042_s11  ;;  %v1573_v33 = vadd.f32 %v1570_v6, %v1560_v44 }
 0x1f2   : > { %2022 = vrot.lane.b32.xlu0 %v2018_v38, %s3043_s18 }
 0x1f3   : > { %v1585_v0 = vpop.permute.xlu1 %1584 }
 0x1f4   : > { %v1557_v28 = vpop.permute.xlu0 %1556  ;;  %v1590_v2 = vadd.f32 %v1585_v0, %v1573_v33 }
 0x1f5   : > { %2039 = vrot.lane.b32.xlu2 %v2035_v61, %s3042_s11  ;;  %v1561_v45 = vadd.f32 %v1557_v28, %v1547_v35  ;;  %v2163_v28 = vrot.slane %v2159_v20, 2 }
 0x1f7   : > { %v4108_v43 = vpop.permute.xlu2 %1682  ;;  %v1574_v62 = vadd.f32 %v1569_v27, %v1561_v45  ;;  %v2162_v27 = vrot.slane %v2158_v16, 2 }
 0x1f9   : > { %2059 = vrot.lane.b32.xlu1 %v2054_v31, %s3043_s18  ;;  %v1591_v25 = vadd.f32 %v4046_v19, %v1574_v62  ;;  %v1658_v31 = vmul.f32 %v4100_v36, %v1657_v5  ;;  %v2164_v35 = vsel %vm318_vm1, %v2162_v27, %v2163_v28 }
 0x1fa   : > { %2057 = vrot.lane.b32.xlu0 %v2053_v37, %s3043_s18  ;;  %v1691_v37 = vstv %s4137_s16  ;;  %s4283_s16 = sld [smem:[#allocation6 + $0x78]] }
 0x1fb   : > { %v1604_v51 = vpop.permute.xlu1 %1603  ;;  %v1692_v6 = vmul.f32 %v4100_v36, %v1691_v37  ;;  %v1693_v44 = vmul.f32 %v4096_v11, %v1691_v37 }
 0x1fc   : > { %v1602_v14 = vpop.permute.xlu0 %1601  ;;  %v1608_v8 = vadd.f32 %v1604_v51, %v1591_v25 }
 0x1fd   : > { %2071 = vrot.lane.b32.xlu2 %v2067_v50, %s3042_s11  ;;  %v1607_v61 = vadd.f32 %v1602_v14, %v1590_v2  ;;  %v1696_v15 = vrot.slane %v1692_v6, 1  ;;  %v2185_v50 = vstv %s4153_s23  ;;  %v2226_v14 = vstv %s4157_s30  ;;  %s4296_s23 = sld [smem:[#allocation6 + $0x9d]] }
 0x1fe   : > { %v1621_v41 = vadd.f32 %v1616_v32, %v1608_v8  ;;  %v2186_v2 = vmul.f32 %v3953_v18, %v2185_v50  ;;  %v2227_v30 = vmul.f32 %v3953_v18, %v2226_v14  ;;  %v2228_v25 = vmul.f32 %v3963_v24, %v2226_v14  ;;  %s4303_s30 = sld [smem:[#allocation6 + $0x7b]] }
 0x1ff   : > { %v4129_v38 = vpop.permute.xlu2 %1714  ;;  %v1620_v19 = vadd.f32 %v1617_v60, %v1607_v61  ;;  %v2199_v8 = vstv %s4170_s10  ;;  %v1790_v14 = vstv %s4212_s21  ;;  %s4314_s10 = sld [smem:[#allocation6 + $0x9b]] }
 0x200   : > { %v2232_v17 = vrot.slane %v2228_v25, 1  ;;  %v2200_v39 = vmul.f32 %v3953_v18, %v2199_v8  ;;  %s4347_s21 = sld [smem:[#allocation6 + $0x7e]] }
 0x201   : > { %2101 = vrot.lane.b32.xlu1 %v2100_v56, %s3043_s18  ;;  %v1637_v0 = vadd.f32 %v4064_v23, %v1620_v19  ;;  %v2147_v23 = vsel %vm318_vm1, %v2145_v58, %v2146_v26  ;;  %v2243_v19 = vstv %s4175_s22  ;;  %v2201_v58 = vmul.f32 %v3963_v24, %v2199_v8  ;;  %s4319_s22 = sld [smem:[#allocation6 + $0x9e]] }
 0x202   : > { %2073 = vrot.lane.b32.xlu0 %v2068_v34, %s3042_s11  ;;  %v2187_v34 = vmul.f32 %v3963_v24, %v2185_v50  ;;  %v2245_v5 = vmul.f32 %v3963_v24, %v2243_v19 }
 0x203   : > { %v1649_v46 = vpop.permute.xlu1 %1648 }
 0x204   : > { %v1634_v42 = vpop.permute.xlu0 %1633  ;;  %v1654_v59 = vadd.f32 %v1649_v46, %v1637_v0  ;;  %v2231_v46 = vrot.slane %v2227_v30, 1  ;;  %v2354_v30 = vstv %s2830_s15  ;;  %s2823_s15 = sld [smem:[#allocation6 + $0x8d]] }
 0x205   : > { %2103 = vrot.lane.b32.xlu2 %v2099_v48, %s3043_s18  ;;  %v1638_v49 = vadd.f32 %v1634_v42, %v1621_v41  ;;  %v1697_v48 = vrot.slane %v1693_v44, 1 }
 0x206   : > { %v1660_v45 = vadd.f32 %v1658_v31, %v1654_v59  ;;  %v2273_v59 = vstv %s4191_s12  ;;  %s4336_s12 = sld [smem:[#allocation6 + $0xa0]] }
 0x207   : > { %v4146_v22 = vpop.permute.xlu2 %1759  ;;  %v1655_v52 = vadd.f32 %v4083_v3, %v1638_v49  ;;  %v1738_v3 = vstv %s4150_s8  ;;  %v1698_v54 = vsel %vm270_vm0, %v1696_v15, %v1697_v48  ;;  %v2275_v6 = vmul.f32 %v3963_v24, %v2273_v59  ;;  %s4294_s8 = sld [smem:[#allocation6 + $0x9a]] }
 0x208   : > { %v1739_v62 = vmul.f32 %v4100_v36, %v1738_v3  ;;  %v1740_v55 = vmul.f32 %v4096_v11, %v1738_v3 }
 0x209   : > { %2120 = vrot.lane.b32.xlu1 %v2116_v7, %s3042_s11  ;;  %v1661_v47 = vadd.f32 %v1659_v40, %v1655_v52  ;;  %v2279_v15 = vrot.slane %v2275_v6, 2 }
 0x20a   : > { %2118 = vrot.lane.b32.xlu0 %v2117_v21, %s3042_s11  ;;  %v1743_v61 = vrot.slane %v1739_v62, 2  ;;  %v1744_v60 = vrot.slane %v1740_v55, 2  ;;  %v2233_v21 = vsel %vm270_vm0, %v2231_v46, %v2232_v17  ;;  %v1791_v55 = vmul.f32 %v3953_v18, %v1790_v14 }
 0x20b   : > { %v1671_v29 = vpop.permute.xlu1 %1670  ;;  %v2355_v46 = vmul.f32 %v4019_v10, %v2354_v30 }
 0x20c   : > { %v1669_v63 = vpop.permute.xlu0 %1668  ;;  %v1675_v51 = vadd.f32 %v1671_v29, %v1661_v47  ;;  %v1745_v16 = vsel %vm318_vm1, %v1743_v61, %v1744_v60 }
 0x20d   : > { %2148 = vrot.lane.b32.xlu2 %v2147_v23, %s3043_s18  ;;  %v1674_v12 = vadd.f32 %v1669_v63, %v1660_v45  ;;  %v2290_v23 = vstv %s2825_s19  ;;  %v2274_v63 = vmul.f32 %v3953_v18, %v2273_v59  ;;  %s4340_s19 = sld [smem:[#allocation6 + $0xa1]] }
 0x20e   : > { %v2292_v44 = vmul.f32 %v3963_v24, %v2290_v23 }
 0x20f   : > { %v4166_v57 = vpop.permute.xlu2 %1778  ;;  %v1688_v32 = vadd.f32 %v4108_v43, %v1674_v12  ;;  %v2278_v12 = vrot.slane %v2274_v63, 2 }
 0x210   : > { %v2296_v50 = vrot.slane %v2292_v44, 2 }
 0x211   : > { %2165 = vrot.lane.b32.xlu1 %v2164_v35, %s3042_s11  ;;  %v1701_v4 = vadd.f32 %v1698_v54, %v1688_v32  ;;  %v1788_v32 = vstv %s4219_s24  ;;  %v1792_v54 = vmul.f32 %v3963_v24, %v1790_v14  ;;  %s4357_s24 = sld [smem:[#allocation6 + $0x81]] }
 0x212   : > { %2150 = vrot.lane.b32.xlu0 %v2146_v26, %s3043_s18  ;;  %v2244_v26 = vmul.f32 %v3953_v18, %v2243_v19  ;;  %v1793_v61 = vadd.f32 %v1791_v55, %v1788_v32 }
 0x213   : > { %v1713_v53 = vpop.permute.xlu1 %1712 }
 0x214   : > { %v1685_v33 = vpop.permute.xlu0 %1684  ;;  %v1718_v13 = vadd.f32 %v1713_v53, %v1701_v4  ;;  %v2248_v37 = vrot.slane %v2244_v26, 1 }
 0x215   : > { %v1689_v56 = vadd.f32 %v1685_v33, %v1675_v51  ;;  %2167 = vrot.lane.b32.xlu2 %v2163_v28, %s3042_s11  ;;  %v2249_v28 = vrot.slane %v2245_v5, 1  ;;  %v2280_v51 = vsel %vm318_vm1, %v2278_v12, %v2279_v15  ;;  %v2418_v12 = vstv %s4261_s5  ;;  %s2838_s5 = sld [smem:[#allocation6 + $0x9c]] }
 0x216   : > { %v2419_v14 = vmul.f32 %v4019_v10, %v2418_v12 }
 0x217   : > { %v4186_v7 = vpop.permute.xlu2 %1815  ;;  %v1702_v43 = vadd.f32 %v1697_v48, %v1689_v56  ;;  %v2250_v47 = vsel %vm270_vm0, %v2248_v37, %v2249_v28  ;;  %v1824_v56 = vstv %s2790_s25  ;;  %s2811_s25 = sld [smem:[#allocation6 + $0x84]] }
 0x218   : > { %v1826_v4 = vmul.f32 %v3963_v24, %v1824_v56 }
 0x219   : > { %2192 = vrot.lane.b32.xlu1 %v2187_v34, %s3043_s18  ;;  %v1719_v20 = vadd.f32 %v4129_v38, %v1702_v43  ;;  %v2313_v34 = vstv %s2827_s26  ;;  %s2820_s26 = sld [smem:[#allocation6 + $0x8a]] }
 0x21a   : > { %2190 = vrot.lane.b32.xlu0 %v2186_v2, %s3043_s18  ;;  %v2315_v43 = vmul.f32 %v4015_v9, %v2313_v34  ;;  %v2314_v8 = vmul.f32 %v4019_v10, %v2313_v34 }
 0x21b   : > { %v1732_v42 = vpop.permute.xlu1 %1731 }
 0x21c   : > { %v1730_v1 = vpop.permute.xlu0 %1729  ;;  %v1736_v0 = vadd.f32 %v1732_v42, %v1719_v20  ;;  %v1871_v20 = vstv %s4239_s28  ;;  %s2829_s28 = sld [smem:[#allocation6 + $0x93]] }
 0x21d   : > { %v1735_v41 = vadd.f32 %v1730_v1, %v1718_v13  ;;  %2204 = vrot.lane.b32.xlu2 %v2200_v39, %s3042_s11  ;;  %v1794_v39 = vadd.f32 %v1792_v54, %v1788_v32  ;;  %v1830_v1 = vrot.slane %v1826_v4, 1  ;;  %v1918_v4 = vstv %s4279_s6  ;;  %s2841_s6 = sld [smem:[#allocation6 + $0x9f]] }
 0x21e   : > { %v1749_v31 = vadd.f32 %v1744_v60, %v1736_v0  ;;  %v1825_v60 = vmul.f32 %v3953_v18, %v1824_v56 }
 0x21f   : > { %v1748_v49 = vadd.f32 %v1745_v16, %v1735_v41  ;;  %v4202_v27 = vpop.permute.xlu2 %1847  ;;  %v2327_v16 = vstv %s4235_s27  ;;  %v2359_v41 = vrot.slane %v2355_v46, 1  ;;  %s2826_s27 = sld [smem:[#allocation6 + $0x90]] }
 0x220   : > { %v1829_v19 = vrot.slane %v1825_v60, 1 }
 0x221   : > { %2234 = vrot.lane.b32.xlu1 %v2233_v21, %s3043_s18  ;;  %v1765_v38 = vadd.f32 %v4146_v22, %v1748_v49  ;;  %v2291_v22 = vmul.f32 %v3953_v18, %v2290_v23  ;;  %v2371_v49 = vstv %s4242_s29  ;;  %v2329_v23 = vmul.f32 %v4015_v9, %v2327_v16  ;;  %s2832_s29 = sld [smem:[#allocation6 + $0x96]] }
 0x222   : > { %2206 = vrot.lane.b32.xlu0 %v2201_v58, %s3042_s11  ;;  %v2328_v58 = vmul.f32 %v4019_v10, %v2327_v16  ;;  %v2373_v63 = vmul.f32 %v4015_v9, %v2371_v49 }
 0x223   : > { %v1777_v29 = vpop.permute.xlu1 %1776  ;;  %v2295_v48 = vrot.slane %v2291_v22, 2  ;;  %v2401_v22 = vstv %s4257_s4  ;;  %s2835_s4 = sld [smem:[#allocation6 + $0x99]] }
 0x224   : > { %v1782_v52 = vadd.f32 %v1777_v29, %v1765_v38  ;;  %v1762_v40 = vpop.permute.xlu0 %1761  ;;  %v1872_v29 = vmul.f32 %v3953_v18, %v1871_v20 }
 0x225   : > { %v1766_v35 = vadd.f32 %v1762_v40, %v1749_v31  ;;  %2236 = vrot.lane.b32.xlu2 %v2232_v17, %s3043_s18  ;;  %v2297_v33 = vsel %vm318_vm1, %v2295_v48, %v2296_v50  ;;  %v2356_v17 = vmul.f32 %v4015_v9, %v2354_v30  ;;  %v1873_v31 = vmul.f32 %v3963_v24, %v1871_v20 }
 0x226   : > { %2784 = vst.msk [vmem:[%s3503_s7 + $0x30] sm:$0xff] %vm616_vm2, %v1782_v52  ;;  %v2372_v52 = vmul.f32 %v4019_v10, %v2371_v49  ;;  %v1876_v18 = vrot.slane %v1872_v29, 2  ;;  %v2377_v24 = vrot.slane %v2373_v63, 1 }
 0x227   : > { %v1783_v45 = vadd.f32 %v4166_v57, %v1766_v35  ;;  %v4221_v3 = vpop.permute.xlu2 %1892  ;;  %v2360_v21 = vrot.slane %v2356_v17, 1  ;;  %v1877_v6 = vrot.slane %v1873_v31, 2  ;;  %v1952_v17 = vstv %s4283_s16 }
 0x228   : > { %v1954_v16 = vmul.f32 %v4015_v9, %v1952_v17  ;;  %v1999_v31 = vstv %s4303_s30 }
 0x229   : > { %2785 = vst.msk [vmem:[%s3503_s7 + $0x38] sm:$0x3f] %vm618_vm3, %v1783_v45  ;;  %2253 = vrot.lane.b32.xlu1 %v2249_v28, %s3042_s11  ;;  %v1831_v28 = vsel %vm270_vm0, %v1829_v19, %v1830_v1  ;;  %v2361_v37 = vsel %vm270_vm0, %v2359_v41, %v2360_v21  ;;  %v1919_v19 = vmul.f32 %v4019_v10, %v1918_v4 }
 0x22a   : > { %2251 = vrot.lane.b32.xlu0 %v2250_v47, %s3042_s11  ;;  %v2376_v47 = vrot.slane %v2372_v52, 1  ;;  %v1920_v41 = vmul.f32 %v4015_v9, %v1918_v4 }
 0x22b   : > { %v1804_v57 = vpop.permute.xlu1 %1803 }
 0x22c   : > { %v1802_v53 = vpop.permute.xlu0 %1801  ;;  %v1808_v5 = vadd.f32 %v1804_v57, %v1794_v39  ;;  %v2378_v32 = vsel %vm270_vm0, %v2376_v47, %v2377_v24 }
 0x22d   : > { %2281 = vrot.lane.b32.xlu2 %v2280_v51, %s3043_s18  ;;  %v1807_v42 = vadd.f32 %v1802_v53, %v1793_v61  ;;  %v2403_v51 = vmul.f32 %v4015_v9, %v2401_v22  ;;  %v1878_v53 = vsel %vm318_vm1, %v1876_v18, %v1877_v6 }
 0x22f   : > { %v4231_v62 = vpop.permute.xlu2 %1911  ;;  %v1821_v38 = vadd.f32 %v4186_v7, %v1807_v42  ;;  %v2407_v54 = vrot.slane %v2403_v51, 2 }
 0x231   : > { %2298 = vrot.lane.b32.xlu1 %v2297_v33, %s3042_s11  ;;  %v1834_v40 = vadd.f32 %v1831_v28, %v1821_v38  ;;  %v2420_v33 = vmul.f32 %v4015_v9, %v2418_v12 }
 0x232   : > { %2283 = vrot.lane.b32.xlu0 %v2279_v15, %s3043_s18  ;;  %v2402_v15 = vmul.f32 %v4019_v10, %v2401_v22  ;;  %v2001_v22 = vmul.f32 %v4015_v9, %v1999_v31 }
 0x233   : > { %v1846_v2 = vpop.permute.xlu1 %1845  ;;  %v2424_v30 = vrot.slane %v2420_v33, 2 }
 0x234   : > { %v1818_v25 = vpop.permute.xlu0 %1817  ;;  %v1851_v44 = vadd.f32 %v1846_v2, %v1834_v40  ;;  %v2406_v56 = vrot.slane %v2402_v15, 2  ;;  %v2423_v2 = vrot.slane %v2419_v14, 2  ;;  %v2499_v15 = vstv %s4319_s22 }
 0x235   : > { %2300 = vrot.lane.b32.xlu2 %v2296_v50, %s3042_s11  ;;  %v1822_v59 = vadd.f32 %v1818_v25, %v1808_v5  ;;  %v2500_v33 = vmul.f32 %v4100_v36, %v2499_v15 }
 0x236   : > { %v2408_v60 = vsel %vm318_vm1, %v2406_v56, %v2407_v54  ;;  %v2425_v39 = vsel %vm318_vm1, %v2423_v2, %v2424_v30  ;;  %v2529_v2 = vstv %s4336_s12 }
 0x237   : > { %v4251_v13 = vpop.permute.xlu2 %1943  ;;  %v1835_v35 = vadd.f32 %v1830_v1, %v1822_v59  ;;  %v1953_v1 = vmul.f32 %v4019_v10, %v1952_v17  ;;  %v2530_v4 = vmul.f32 %v4100_v36, %v2529_v2 }
 0x239   : > { %2320 = vrot.lane.b32.xlu1 %v2315_v43, %s3043_s18  ;;  %v1852_v50 = vadd.f32 %v4202_v27, %v1835_v35  ;;  %v1957_v49 = vrot.slane %v1953_v1, 1  ;;  %v2046_v1 = vstv %s4347_s21 }
 0x23a   : > { %2318 = vrot.lane.b32.xlu0 %v2314_v8, %s3043_s18 }
 0x23b   : > { %v1865_v0 = vpop.permute.xlu1 %1864 }
 0x23c   : > { %v1863_v26 = vpop.permute.xlu0 %1862  ;;  %v1869_v55 = vadd.f32 %v1865_v0, %v1852_v50  ;;  %v2482_v0 = vstv %s4296_s23 }
 0x23d   : > { %2332 = vrot.lane.b32.xlu2 %v2328_v58, %s3042_s11  ;;  %v1868_v57 = vadd.f32 %v1863_v26, %v1851_v44  ;;  %v1958_v26 = vrot.slane %v1954_v16, 1 }
 0x23e   : > { %v1882_v25 = vadd.f32 %v1877_v6, %v1869_v55  ;;  %v2000_v6 = vmul.f32 %v4019_v10, %v1999_v31  ;;  %v2005_v10 = vrot.slane %v2001_v22, 2 }
 0x23f   : > { %v4272_v7 = vpop.permute.xlu2 %1975  ;;  %v1881_v27 = vadd.f32 %v1878_v53, %v1868_v57  ;;  %v1959_v52 = vsel %vm270_vm0, %v1957_v49, %v1958_v26  ;;  %v2501_v53 = vmul.f32 %v4096_v11, %v2499_v15 }
 0x240   : > { %v2004_v57 = vrot.slane %v2000_v6, 2 }
 0x241   : > { %2362 = vrot.lane.b32.xlu1 %v2361_v37, %s3043_s18  ;;  %v1898_v8 = vadd.f32 %v4221_v3, %v1881_v27  ;;  %v2483_v37 = vmul.f32 %v4100_v36, %v2482_v0 }
 0x242   : > { %2334 = vrot.lane.b32.xlu0 %v2329_v23, %s3042_s11  ;;  %v2484_v23 = vmul.f32 %v4096_v11, %v2482_v0  ;;  %v2006_v27 = vsel %vm318_vm1, %v2004_v57, %v2005_v10 }
 0x243   : > { %v1910_v45 = vpop.permute.xlu1 %1909  ;;  %v2487_v44 = vrot.slane %v2483_v37, 1 }
 0x244   : > { %v1895_v48 = vpop.permute.xlu0 %1894  ;;  %v1915_v42 = vadd.f32 %v1910_v45, %v1898_v8  ;;  %v2488_v45 = vrot.slane %v2484_v23, 1  ;;  %v2531_v8 = vmul.f32 %v4096_v11, %v2529_v2 }
 0x245   : > { %2364 = vrot.lane.b32.xlu2 %v2360_v21, %s3043_s18  ;;  %v1899_v46 = vadd.f32 %v1895_v48, %v1882_v25  ;;  %v2441_v21 = vstv %s4294_s8 }
 0x246   : > { %v1921_v58 = vadd.f32 %v1919_v19, %v1915_v42  ;;  %v2443_v59 = vmul.f32 %v4096_v11, %v2441_v21  ;;  %v2442_v29 = vmul.f32 %v4100_v36, %v2441_v21  ;;  %v2489_v51 = vsel %vm270_vm0, %v2487_v44, %v2488_v45 }
 0x247   : > { %v4290_v34 = vpop.permute.xlu2 %2020  ;;  %v1916_v3 = vadd.f32 %v4231_v62, %v1899_v46  ;;  %v2534_v19 = vrot.slane %v2530_v4, 2  ;;  %v2535_v21 = vrot.slane %v2531_v8, 2  ;;  %v2928_v8 = vld [vmem:[%s3150_s9] sm:$0xff] }
 0x249   : > { %2381 = vrot.lane.b32.xlu1 %v2377_v24, %s3042_s11  ;;  %v1922_v62 = vadd.f32 %v1920_v41, %v1916_v3  ;;  %v2455_v24 = vstv %s4314_s10 }
 0x24a   : > { %2379 = vrot.lane.b32.xlu0 %v2378_v32, %s3042_s11  ;;  %v2456_v47 = vmul.f32 %v4100_v36, %v2455_v24  ;;  %v2457_v9 = vmul.f32 %v4096_v11, %v2455_v24 }
 0x24b   : > { %v1932_v61 = vpop.permute.xlu1 %1931 }
 0x24c   : > { %v1930_v43 = vpop.permute.xlu0 %1929  ;;  %v1936_v63 = vadd.f32 %v1932_v61, %v1922_v62  ;;  %v2504_v61 = vrot.slane %v2500_v33, 1  ;;  %v2536_v62 = vsel %vm318_vm1, %v2534_v19, %v2535_v21  ;;  %v2213_v19 = vstv %s2820_s26 }
 0x24d   : > { %2409 = vrot.lane.b32.xlu2 %v2408_v60, %s3043_s18  ;;  %v1935_v28 = vadd.f32 %v1930_v43, %v1921_v58  ;;  %v2546_v60 = vstv %s4340_s19 }
 0x24e   : > { %v2547_v46 = vmul.f32 %v4100_v36, %v2546_v60  ;;  %v2548_v17 = vmul.f32 %v4096_v11, %v2546_v60 }
 0x24f   : > { %v4309_v20 = vpop.permute.xlu2 %2039  ;;  %v1949_v35 = vadd.f32 %v4251_v13, %v1935_v28 }
 0x250   : > { %v2551_v58 = vrot.slane %v2547_v46, 2 }
 0x251   : > { %2426 = vrot.lane.b32.xlu1 %v2425_v39, %s3042_s11  ;;  %v1962_v48 = vadd.f32 %v1959_v52, %v1949_v35 }
 0x252   : > { %2411 = vrot.lane.b32.xlu0 %v2407_v54, %s3043_s18  ;;  %v2505_v54 = vrot.slane %v2501_v53, 1 }
 0x253   : > { %v1974_v5 = vpop.permute.xlu1 %1973 }
 0x254   : > { %v1946_v38 = vpop.permute.xlu0 %1945  ;;  %v1979_v14 = vadd.f32 %v1974_v5, %v1962_v48  ;;  %v2506_v42 = vsel %vm270_vm0, %v2504_v61, %v2505_v54  ;;  %v2552_v5 = vrot.slane %v2548_v17, 2 }
 0x255   : > { %2428 = vrot.lane.b32.xlu2 %v2424_v30, %s3042_s11  ;;  %v1950_v18 = vadd.f32 %v1946_v38, %v1936_v63  ;;  %v2080_v38 = vstv %s4357_s24 }
 0x256   : > { %v2081_v31 = vmul.f32 %v4100_v36, %v2080_v38  ;;  %v2082_v37 = vmul.f32 %v4096_v11, %v2080_v38 }
 0x257   : > { %v4328_v40 = vpop.permute.xlu2 %2071  ;;  %v1963_v50 = vadd.f32 %v1958_v26, %v1950_v18  ;;  %v2047_v26 = vmul.f32 %v4100_v36, %v2046_v1  ;;  %v2127_v18 = vstv %s2811_s25 }
 0x258   : > { %v2086_v6 = vrot.slane %v2082_v37, 1 }
 0x259   : > { %2448 = vrot.lane.b32.xlu1 %v2443_v59, %s3043_s18  ;;  %v1980_v32 = vadd.f32 %v4272_v7, %v1963_v50 }
 0x25a   : > { %2446 = vrot.lane.b32.xlu0 %v2442_v29, %s3043_s18  ;;  %v2553_v29 = vsel %vm318_vm1, %v2551_v58, %v2552_v5 }
 0x25b   : > { %v1993_v12 = vpop.permute.xlu1 %1992 }
 0x25c   : > { %v1991_v13 = vpop.permute.xlu0 %1990  ;;  %v1997_v30 = vadd.f32 %v1993_v12, %v1980_v32 }
 0x25d   : > { %2460 = vrot.lane.b32.xlu2 %v2456_v47, %s3042_s11  ;;  %v1996_v56 = vadd.f32 %v1991_v13, %v1979_v14  ;;  %v2129_v47 = vmul.f32 %v4096_v11, %v2127_v18 }
 0x25e   : > { %v2010_v39 = vadd.f32 %v2005_v10, %v1997_v30 }
 0x25f   : > { %v4349_v55 = vpop.permute.xlu2 %2103  ;;  %v2009_v7 = vadd.f32 %v2006_v27, %v1996_v56  ;;  %v2133_v50 = vrot.slane %v2129_v47, 2 }
 0x261   : > { %2490 = vrot.lane.b32.xlu1 %v2489_v51, %s3043_s18  ;;  %v2026_v3 = vadd.f32 %v4290_v34, %v2009_v7  ;;  %v2048_v34 = vmul.f32 %v4096_v11, %v2046_v1 }
 0x262   : > { %2462 = vrot.lane.b32.xlu0 %v2457_v9, %s3042_s11 }
 0x263   : > { %v2038_v25 = vpop.permute.xlu1 %2037 }
 0x264   : > { %v2023_v43 = vpop.permute.xlu0 %2022  ;;  %v2043_v0 = vadd.f32 %v2038_v25, %v2026_v3 }
 0x265   : > { %2492 = vrot.lane.b32.xlu2 %v2488_v45, %s3043_s18  ;;  %v2027_v41 = vadd.f32 %v2023_v43, %v2010_v39  ;;  %v2128_v45 = vmul.f32 %v4100_v36, %v2127_v18  ;;  %v2929_v39 = vld [vmem:[%s3150_s9 + $0x8] sm:$0xff] }
 0x266   : > { %v2049_v23 = vadd.f32 %v2047_v26, %v2043_v0  ;;  %v2215_v58 = vmul.f32 %v2929_v39, %v2213_v19 }
 0x267   : > { %v2149_v16 = vpop.permute.xlu2 %2148  ;;  %v2044_v59 = vadd.f32 %v4309_v20, %v2027_v41  ;;  %v2085_v20 = vrot.slane %v2081_v31, 1  ;;  %v2132_v48 = vrot.slane %v2128_v45, 2 }
 0x268   : > { %v2219_v26 = vrot.slane %v2215_v58, 1 }
 0x269   : > { %2509 = vrot.lane.b32.xlu1 %v2505_v54, %s3042_s11  ;;  %v2050_v52 = vadd.f32 %v2048_v34, %v2044_v59  ;;  %v2087_v13 = vsel %vm270_vm0, %v2085_v20, %v2086_v6  ;;  %v2134_v36 = vsel %vm318_vm1, %v2132_v48, %v2133_v50 }
 0x26a   : > { %2507 = vrot.lane.b32.xlu0 %v2506_v42, %s3042_s11 }
 0x26b   : > { %v2060_v49 = vpop.permute.xlu1 %2059 }
 0x26c   : > { %v2058_v28 = vpop.permute.xlu0 %2057  ;;  %v2064_v24 = vadd.f32 %v2060_v49, %v2050_v52 }
 0x26d   : > { %2537 = vrot.lane.b32.xlu2 %v2536_v62, %s3043_s18  ;;  %v2063_v35 = vadd.f32 %v2058_v28, %v2049_v23  ;;  %v2260_v28 = vstv %s2823_s15 }
 0x26e   : > { %v2261_v37 = vmul.f32 %v2928_v8, %v2260_v28  ;;  %v2262_v23 = vmul.f32 %v2929_v39, %v2260_v28 }
 0x26f   : > { %v2168_v63 = vpop.permute.xlu2 %2167  ;;  %v2077_v12 = vadd.f32 %v4328_v40, %v2063_v35 }
 0x270   : > { %v2265_v18 = vrot.slane %v2261_v37, 2  ;;  %v2266_v20 = vrot.slane %v2262_v23, 2 }
 0x271   : > { %2554 = vrot.lane.b32.xlu1 %v2553_v29, %s3042_s11  ;;  %v2090_v10 = vadd.f32 %v2087_v13, %v2077_v12 }
 0x272   : > { %2539 = vrot.lane.b32.xlu0 %v2535_v21, %s3043_s18  ;;  %s2816_s18 = sld [smem:[#allocation7 + $0x5]]  ;;  %v2214_v21 = vmul.f32 %v2928_v8, %v2213_v19  ;;  %v2267_v47 = vsel %vm318_vm1, %v2265_v18, %v2266_v20 }
 0x273   : > { %v2102_v22 = vpop.permute.xlu1 %2101 }
 0x274   : > { %v2074_v44 = vpop.permute.xlu0 %2073  ;;  %v2107_v9 = vadd.f32 %v2102_v22, %v2090_v10  ;;  %v2218_v49 = vrot.slane %v2214_v21, 1 }
 0x275   : > { %v2078_v15 = vadd.f32 %v2074_v44, %v2064_v24  ;;  %2556 = vrot.lane.b32.xlu2 %v2552_v5, %s3042_s11  ;;  %s2817_s11 = sld [smem:[#allocation6 + $0x87]] }
 0x276   : > { %v2220_v31 = vsel %vm270_vm0, %v2218_v49, %v2219_v26 }
 0x277   : > { %v2205_v57 = vpop.permute.xlu2 %2204  ;;  %v2091_v51 = vadd.f32 %v2086_v6, %v2078_v15 }
 0x278   : > { %v2177_v17 = vstv %s2816_s18 }
 0x279   : > { %v2108_v11 = vadd.f32 %v4349_v55, %v2091_v51 }
 0x27b   : > { %v2121_v53 = vpop.permute.xlu1 %2120  ;;  %v2179_v7 = vstv %s2817_s11 }
 0x27c   : > { %v2119_v14 = vpop.permute.xlu0 %2118  ;;  %v2125_v33 = vadd.f32 %v2121_v53, %v2108_v11  ;;  %v2180_v46 = vmul.f32 %v2928_v8, %v2179_v7  ;;  %v2181_v42 = vmul.f32 %v2929_v39, %v2179_v7  ;;  %v2341_v11 = vstv %s2829_s28 }
 0x27d   : > { %v2124_v40 = vadd.f32 %v2119_v14, %v2107_v9  ;;  %v2930_v14 = vld [vmem:[%s3150_s9 + $0x10] sm:$0xff]  ;;  %v2388_v7 = vstv %s2832_s29 }
 0x27e   : > { %v2138_v2 = vadd.f32 %v2133_v50, %v2125_v33  ;;  %v2182_v41 = vadd.f32 %v2180_v46, %v2177_v17  ;;  %v2183_v5 = vadd.f32 %v2181_v42, %v2177_v17  ;;  %v2931_v33 = vld [vmem:[%s3150_s9 + $0x18] sm:$0xff]  ;;  %v2389_v39 = vmul.f32 %v2930_v14, %v2388_v7 }
 0x27f   : > { %v2137_v32 = vadd.f32 %v2134_v36, %v2124_v40  ;;  %v2237_v56 = vpop.permute.xlu2 %2236  ;;  %v2390_v42 = vmul.f32 %v2931_v33, %v2388_v7 }
 0x280   : > { %v2393_v21 = vrot.slane %v2389_v39, 2 }
 0x281   : > { %v2154_v27 = vadd.f32 %v2149_v16, %v2137_v32  ;;  %v2394_v58 = vrot.slane %v2390_v42, 2 }
 0x283   : > { %v2166_v54 = vpop.permute.xlu1 %2165 }
 0x284   : > { %v2171_v30 = vadd.f32 %v2166_v54, %v2154_v27  ;;  %v2151_v25 = vpop.permute.xlu0 %2150  ;;  %v2343_v27 = vmul.f32 %v2931_v33, %v2341_v11 }
 0x285   : > { %v2155_v61 = vadd.f32 %v2151_v25, %v2138_v2 }
 0x286   : > { %2814 = vst.msk [vmem:[%s3503_s7 + $0x40] sm:$0xff] %vm616_vm2, %v2171_v30 }
 0x287   : > { %v2172_v60 = vadd.f32 %v2168_v63, %v2155_v61  ;;  %v2282_v55 = vpop.permute.xlu2 %2281 }
 0x289   : > { %2815 = vst.msk [vmem:[%s3503_s7 + $0x48] sm:$0x3f] %vm618_vm3, %v2172_v60 }
 0x28b   : > { %v2193_v4 = vpop.permute.xlu1 %2192 }
 0x28c   : > { %v2191_v43 = vpop.permute.xlu0 %2190  ;;  %v2197_v38 = vadd.f32 %v2193_v4, %v2183_v5 }
 0x28d   : > { %v2196_v0 = vadd.f32 %v2191_v43, %v2182_v41  ;;  %v2347_v43 = vrot.slane %v2343_v27, 1 }
 0x28f   : > { %v2301_v3 = vpop.permute.xlu2 %2300  ;;  %v2210_v34 = vadd.f32 %v2205_v57, %v2196_v0  ;;  %v2307_v57 = vstv %s2826_s27 }
 0x290   : > { %v2308_v36 = vmul.f32 %v2930_v14, %v2307_v57  ;;  %v2309_v32 = vmul.f32 %v2931_v33, %v2307_v57 }
 0x291   : > { %v2223_v52 = vadd.f32 %v2220_v31, %v2210_v34  ;;  %v2435_v31 = vstv %s2835_s4 }
 0x293   : > { %v2235_v1 = vpop.permute.xlu1 %2234 }
 0x294   : > { %v2207_v16 = vpop.permute.xlu0 %2206  ;;  %v2240_v6 = vadd.f32 %v2235_v1, %v2223_v52 }
 0x295   : > { %v2211_v29 = vadd.f32 %v2207_v16, %v2197_v38 }
 0x297   : > { %v2333_v63 = vpop.permute.xlu2 %2332  ;;  %v2224_v35 = vadd.f32 %v2219_v26, %v2211_v29  ;;  %v2395_v26 = vsel %vm318_vm1, %v2393_v21, %v2394_v58 }
 0x299   : > { %v2241_v44 = vadd.f32 %v2237_v56, %v2224_v35  ;;  %v2342_v56 = vmul.f32 %v2930_v14, %v2341_v11  ;;  %v2932_v35 = vld [vmem:[%s3150_s9 + $0x20] sm:$0xff] }
 0x29a   : > { %v2436_v18 = vmul.f32 %v2932_v35, %v2435_v31 }
 0x29b   : > { %v2254_v62 = vpop.permute.xlu1 %2253  ;;  %v2346_v4 = vrot.slane %v2342_v56, 1 }
 0x29c   : > { %v2252_v59 = vpop.permute.xlu0 %2251  ;;  %v2258_v12 = vadd.f32 %v2254_v62, %v2241_v44 }
 0x29d   : > { %v2257_v45 = vadd.f32 %v2252_v59, %v2240_v6  ;;  %v2348_v17 = vsel %vm270_vm0, %v2346_v4, %v2347_v43 }
 0x29e   : > { %v2271_v48 = vadd.f32 %v2266_v20, %v2258_v12  ;;  %v2469_v20 = vstv %s2838_s5 }
 0x29f   : > { %v2365_v15 = vpop.permute.xlu2 %2364  ;;  %v2270_v13 = vadd.f32 %v2267_v47, %v2257_v45  ;;  %v2470_v45 = vmul.f32 %v2932_v35, %v2469_v20 }
 0x2a1   : > { %v2287_v51 = vadd.f32 %v2282_v55, %v2270_v13  ;;  %v2474_v57 = vrot.slane %v2470_v45, 1 }
 0x2a3   : > { %v2299_v24 = vpop.permute.xlu1 %2298 }
 0x2a4   : > { %v2284_v22 = vpop.permute.xlu0 %2283  ;;  %v2304_v53 = vadd.f32 %v2299_v24, %v2287_v51 }
 0x2a5   : > { %v2288_v9 = vadd.f32 %v2284_v22, %v2271_v48  ;;  %v2933_v22 = vld [vmem:[%s3150_s9 + $0x28] sm:$0xff] }
 0x2a6   : > { %v2310_v2 = vadd.f32 %v2308_v36, %v2304_v53  ;;  %v2437_v44 = vmul.f32 %v2933_v22, %v2435_v31  ;;  %v2471_v47 = vmul.f32 %v2933_v22, %v2469_v20 }
 0x2a7   : > { %v2305_v40 = vadd.f32 %v2301_v3, %v2288_v9  ;;  %v2410_v54 = vpop.permute.xlu2 %2409 }
 0x2a9   : > { %v2311_v61 = vadd.f32 %v2309_v32, %v2305_v40 }
 0x2ab   : > { %v2321_v50 = vpop.permute.xlu1 %2320 }
 0x2ac   : > { %v2319_v10 = vpop.permute.xlu0 %2318  ;;  %v2325_v55 = vadd.f32 %v2321_v50, %v2311_v61  ;;  %v2516_v50 = vstv %s2841_s6 }
 0x2ad   : > { %v2324_v60 = vadd.f32 %v2319_v10, %v2310_v2  ;;  %v2475_v10 = vrot.slane %v2471_v47, 1  ;;  %v2517_v14 = vmul.f32 %v2932_v35, %v2516_v50  ;;  %v2518_v36 = vmul.f32 %v2933_v22, %v2516_v50 }
 0x2af   : > { %v2338_v8 = vadd.f32 %v2333_v63, %v2324_v60  ;;  %v2429_v16 = vpop.permute.xlu2 %2428  ;;  %v2476_v33 = vsel %vm270_vm0, %v2474_v57, %v2475_v10  ;;  %v2521_v32 = vrot.slane %v2517_v14, 2  ;;  %v2522_v56 = vrot.slane %v2518_v36, 2 }
 0x2b1   : > { %v2351_v3 = vadd.f32 %v2348_v17, %v2338_v8  ;;  %v2523_v60 = vsel %vm318_vm1, %v2521_v32, %v2522_v56 }
 0x2b3   : > { %v2363_v30 = vpop.permute.xlu1 %2362 }
 0x2b4   : > { %v2335_v25 = vpop.permute.xlu0 %2334  ;;  %v2368_v5 = vadd.f32 %v2363_v30, %v2351_v3 }
 0x2b5   : > { %v2339_v46 = vadd.f32 %v2335_v25, %v2325_v55 }
 0x2b7   : > { %v2352_v41 = vadd.f32 %v2347_v43, %v2339_v46  ;;  %v2461_v34 = vpop.permute.xlu2 %2460 }
 0x2b9   : > { %v2369_v0 = vadd.f32 %v2365_v15, %v2352_v41 }
 0x2bb   : > { %v2382_v19 = vpop.permute.xlu1 %2381 }
 0x2bc   : > { %v2380_v1 = vpop.permute.xlu0 %2379  ;;  %v2386_v38 = vadd.f32 %v2382_v19, %v2369_v0 }
 0x2bd   : > { %v2385_v49 = vadd.f32 %v2380_v1, %v2368_v5 }
 0x2be   : > { %v2399_v29 = vadd.f32 %v2394_v58, %v2386_v38 }
 0x2bf   : > { %v2398_v59 = vadd.f32 %v2395_v26, %v2385_v49  ;;  %v2493_v15 = vpop.permute.xlu2 %2492 }
 0x2c1   : > { %v2415_v37 = vadd.f32 %v2410_v54, %v2398_v59 }
 0x2c3   : > { %v2427_v62 = vpop.permute.xlu1 %2426 }
 0x2c4   : > { %v2412_v28 = vpop.permute.xlu0 %2411  ;;  %v2432_v63 = vadd.f32 %v2427_v62, %v2415_v37 }
 0x2c5   : > { %v2416_v23 = vadd.f32 %v2412_v28, %v2399_v29 }
 0x2c6   : > { %v2438_v12 = vadd.f32 %v2436_v18, %v2432_v63 }
 0x2c7   : > { %v2433_v24 = vadd.f32 %v2429_v16, %v2416_v23  ;;  %v2538_v2 = vpop.permute.xlu2 %2537 }
 0x2c9   : > { %v2439_v13 = vadd.f32 %v2437_v44, %v2433_v24 }
 0x2cb   : > { %v2449_v52 = vpop.permute.xlu1 %2448 }
 0x2cc   : > { %v2447_v6 = vpop.permute.xlu0 %2446  ;;  %v2453_v51 = vadd.f32 %v2449_v52, %v2439_v13 }
 0x2cd   : > { %v2452_v48 = vadd.f32 %v2447_v6, %v2438_v12 }
 0x2cf   : > { %v2466_v11 = vadd.f32 %v2461_v34, %v2452_v48  ;;  %v2557_v19 = vpop.permute.xlu2 %2556 }
 0x2d1   : > { %v2479_v27 = vadd.f32 %v2476_v33, %v2466_v11 }
 0x2d3   : > { %v2491_v9 = vpop.permute.xlu1 %2490 }
 0x2d4   : > { %v2463_v53 = vpop.permute.xlu0 %2462  ;;  %v2496_v30 = vadd.f32 %v2491_v9, %v2479_v27 }
 0x2d5   : > { %v2467_v40 = vadd.f32 %v2463_v53, %v2453_v51 }
 0x2d7   : > { %v2480_v54 = vadd.f32 %v2475_v10, %v2467_v40 }
 0x2d9   : > { %v2497_v4 = vadd.f32 %v2493_v15, %v2480_v54 }
 0x2db   : > { %v2510_v25 = vpop.permute.xlu1 %2509 }
 0x2dc   : > { %v2508_v61 = vpop.permute.xlu0 %2507  ;;  %v2514_v55 = vadd.f32 %v2510_v25, %v2497_v4 }
 0x2dd   : > { %v2513_v43 = vadd.f32 %v2508_v61, %v2496_v30 }
 0x2de   : > { %v2527_v17 = vadd.f32 %v2522_v56, %v2514_v55 }
 0x2df   : > { %v2526_v7 = vadd.f32 %v2523_v60, %v2513_v43 }
 0x2e1   : > { %v2543_v8 = vadd.f32 %v2538_v2, %v2526_v7 }
 0x2e3   : > { %v2555_v46 = vpop.permute.xlu1 %2554 }
 0x2e4   : > { %v2560_v39 = vadd.f32 %v2555_v46, %v2543_v8  ;;  %v2540_v42 = vpop.permute.xlu0 %2539 }
 0x2e5   : > { %v2544_v1 = vadd.f32 %v2540_v42, %v2527_v17 }
 0x2e6   : > { %2844 = vst.msk [vmem:[%s3503_s7 + $0x50] sm:$0xff] %vm616_vm2, %v2560_v39 }
 0x2e7   : > { %v2561_v16 = vadd.f32 %v2557_v19, %v2544_v1 }
 0x2e9   : > { %2845 = vst.msk [vmem:[%s3503_s7 + $0x58] sm:$0x3f] %vm618_vm3, %v2561_v16 }
 0x2ea PF: > { %p15_p8 = scmp.ge.s32.totalorder %s3086_s17, 4   ;;  %s4428_s12 = smov %s3028_s13 }
 0x2eb   : > { %s4429_s13 = smov %s3032_s14  ;;  %s4430_s14 = smov %s3096_s20 }
 0x2ec   : > { %s4431_s15 = smov %s3086_s17  ;;  %17 = sbr.rel (!%p15_p8) target bundleno = 5 (0x5), region = 89 }
 0x2f1   :  { %2586 = vsyncpa [#allocation3], 1 }
 0x2f2   :  { %2588 = vsyncpa [#allocation3 + $0x1], 1 }
 0x2f3   :  { %2589 = vsyncpa [#allocation4], 1 }
 0x2f4   :  { %2591 = vsyncpa [#allocation4 + $0x1], 1 }
 0x2f5   :  { %2592 = vsyncpa [#allocation5], 1 }
 0x2f6   :  { %2594 = vsyncpa [#allocation5 + $0x1], 1 }

</bundles_post_ra>
